<compile_context>
chip_gen: v7x
topology: tpu7x:2x2x1
jax: 0.10.0
libtpu: 0.0.40
codegen_flags: <defaults>
</compile_context>

<pallas_src>
import math
import jax
import jax.numpy as jnp
import numpy as np
from jax import lax
from jax.experimental import pallas as pl
from jax.experimental.pallas import tpu as pltpu


# ----------------------------------------------------------------------------- kernel
def _hgnn_fused_kernel(fe0_ref, adj_ref, wcat_ref, w3_ref,
                       bns_ref, bnsh_ref, fb1_ref, fw2_ref,
                       new_fe_ref, edge_bn_ref):
    G, N, E = adj_ref.shape
    D = fe0_ref.shape[1]

    # Loop-invariant parameters: read once, reused across all unrolled subgraph steps.
    wcat = wcat_ref[...]            # [D, 2D] bf16 = [HGAT weight2 | Fusion W1^T]
    w1t_b = wcat[:, D:]             # [D, D]  bf16 (Fusion linear1 weight, transposed)
    w3_b = w3_ref[...]              # [D, D]  bf16
    bn_s = bns_ref[...]             # [1, D]  f32  BatchNorm scale
    bn_sh = bnsh_ref[...]           # [1, D]  f32  BatchNorm shift
    b1 = fb1_ref[...]               # [1, D]  f32  Fusion linear1 bias
    w2row = fw2_ref[...]            # [1, D]  f32  Fusion linear2 weight row

    def step(g, fe):
        adj = adj_ref[g]            # [N, E] f32 (dynamic leading-axis load from VMEM)
        fe_b = fe.astype(jnp.bfloat16)

        # Fused shared-LHS matmul: fe @ [weight2 | W1^T] -> [N, 2D]
        both = jnp.dot(fe_b, wcat, preferred_element_type=jnp.float32)
        nf = both[:, :D]            # node_features = fe @ weight2
        h_h_pre = both[:, D:]       # fe @ W1^T  (Fusion "hidden" branch, pre-bias)

        # softmax(adj.T, dim=1): computed in [E, N] layout via one small in-kernel XLU
        # transpose (no wrapper-side adj.T materialization).  Normalization uses the EUP
        # reciprocal + broadcast multiply instead of a full-tile f32 divide; input-side
        # scaling is cheaper here because these weights feed two matmuls.
        adjt = jnp.transpose(adj)                                        # [E, N]
        tmax = jnp.max(adjt, axis=1, keepdims=True)
        texp = jnp.exp(adjt - tmax)
        inv_tsum = pl.reciprocal(jnp.sum(texp, axis=1, keepdims=True), approx=True)
        col_sm_t = (texp * inv_tsum).astype(jnp.bfloat16)                # [E, N] bf16

        # softmax(adj, dim=1), same reciprocal trick.
        rmax = jnp.max(adj, axis=1, keepdims=True)
        rexp = jnp.exp(adj - rmax)
        inv_rsum = pl.reciprocal(jnp.sum(rexp, axis=1, keepdims=True), approx=True)
        row_sm = (rexp * inv_rsum).astype(jnp.bfloat16)                  # [N, E] bf16

        # HGAT attention chain (dropout = identity in eval mode).
        edge_emb = jnp.maximum(
            jnp.dot(col_sm_t, nf.astype(jnp.bfloat16),
                    preferred_element_type=jnp.float32), 0.0)            # [E, D]
        edge_trans = jnp.dot(edge_emb.astype(jnp.bfloat16), w3_b,
                             preferred_element_type=jnp.float32)         # [E, D]
        node_att = jnp.maximum(
            jnp.dot(row_sm, edge_trans.astype(jnp.bfloat16),
                    preferred_element_type=jnp.float32), 0.0)            # [N, D]
        edge_out = jnp.maximum(
            jnp.dot(col_sm_t, node_att.astype(jnp.bfloat16),
                    preferred_element_type=jnp.float32), 0.0)            # [E, D]

        # BatchNorm1d (eval) folded to scale/shift.
        node_bn = node_att * bn_s + bn_sh                                # [N, D]
        edge_bn = edge_out * bn_s + bn_sh                                # [E, D]

        # Fusion gate: both branches stacked into one [2N, D] pass (one tanh launch, one
        # cross-lane reduction).  The shared linear2 bias cancels exactly in the 2-way
        # softmax, so it is dropped.
        h_d_pre = jnp.dot(node_bn.astype(jnp.bfloat16), w1t_b,
                          preferred_element_type=jnp.float32)            # [N, D]
        t = jnp.tanh(jnp.concatenate([h_h_pre, h_d_pre], axis=0) + b1)   # [2N, D]
        s = jnp.sum(t * w2row, axis=-1, keepdims=True)                   # [2N, 1]
        s_h = s[:N]
        s_d = s[N:]
        m = jnp.maximum(s_h, s_d)
        eh = jnp.exp(s_h - m)
        ed = jnp.exp(s_d - m)
        inv_den = pl.reciprocal(eh + ed, approx=True)
        new_fe = (eh * inv_den) * fe + (ed * inv_den) * node_bn          # [N, D]

        new_fe_ref[g] = new_fe
        edge_bn_ref[g] = edge_bn
        return new_fe

    # Serial recurrence over subgraphs (fe is the carry); fully unrolled so the scheduler
    # can overlap adjacent steps' VPU/EUP/XLU work with MXU matmuls.
    lax.fori_loop(0, G, step, fe0_ref[...], unroll=True)


# ----------------------------------------------------------------------------- wrapper
@jax.jit
def hgnn_forward_fused(fe, adj_stack, raw_params):
    """All G subgraph steps in one (grid-collapsed) pallas_call.

    Returns (new_friendship [G,N,D], edge_embedding_after_BN [G,E,D])."""
    (w2, w3, bn_g, bn_b, bn_rm, bn_rv, fw1t, fb1, fw2row, _fb2) = raw_params
    G, N, E = adj_stack.shape
    D = fe.shape[1]

    # One-time parameter prep (tiny, outside the kernel):
    bn_scale = (bn_g * lax.rsqrt(bn_rv + 1e-5)).astype(jnp.float32)      # [1, D]
    bn_shift = (bn_b - bn_rm * bn_scale).astype(jnp.float32)             # [1, D]
    w_cat = jnp.concatenate([w2, fw1t], axis=1).astype(jnp.bfloat16)     # [D, 2D]
    w3_b = w3.astype(jnp.bfloat16)                                       # [D, D]
    # Note: _fb2 (Fusion linear2 bias) cancels in the 2-way gate softmax -> not passed.
    # Note: no adj.T materialization in the wrapper any more (transposed in-kernel).

    def const(shape):
        return pl.BlockSpec(shape, lambda i: (0,) * len(shape))

    grid_spec = pltpu.PrefetchScalarGridSpec(
        num_scalar_prefetch=0,
        grid=(1,),                                   # single pipeline step; G loop in-kernel
        in_specs=[
            const((N, D)),                           # initial friendship embedding
            const((G, N, E)),                        # all adjacency matrices (VMEM-resident)
            const((D, 2 * D)),                       # [weight2 | W1^T] (bf16)
            const((D, D)),                           # weight3 (bf16)
            const((1, D)), const((1, D)),            # BN scale / shift
            const((1, D)), const((1, D)),            # fusion b1, linear2 weight row
        ],
        out_specs=(
            const((G, N, D)),                        # new friendship embedding per subgraph
            const((G, E, D)),                        # edge embedding per subgraph
        ),
    )
    return pl.pallas_call(
        _hgnn_fused_kernel,
        out_shape=(jax.ShapeDtypeStruct((G, N, D), jnp.float32),
                   jax.ShapeDtypeStruct((G, E, D), jnp.float32)),
        grid_spec=grid_spec,
        # The fe recurrence is serial -> "arbitrary".  (v7x: second TensorCore would only
        # help with batch-level parallelism across independent instances, absent here.)
        compiler_params=pltpu.CompilerParams(dimension_semantics=("arbitrary",)),
    )(fe, adj_stack, w_cat, w3_b, bn_scale, bn_shift, fb1, fw2row)


def hierarchical_gnn_forward(friendship_embedding, hypergraph_structure, raw_params):
    """Mirror of HierarchicalGNNWithAttention.forward (inference semantics)."""
    hypergraph, _root_idx = hypergraph_structure
    # F.embedding(root_idx, friendship_embedding) is produced by the PyTorch module but is
    # never consumed by HGATLayer -> dead work on the critical path, omitted here.
    keys = list(hypergraph.keys())
    adj_stack = jnp.stack([hypergraph[k] for k in keys], axis=0)          # [G, N, E]
    new_fe_all, edge_bn_all = hgnn_forward_fused(friendship_embedding, adj_stack, raw_params)
    return {k: [new_fe_all[i], edge_bn_all[i]] for i, k in enumerate(keys)}


# ----------------------------------------------------------------------------- reference
def _bdot(a, b):
    # Reference uses the same MXU precision policy as the kernel: bf16 inputs, f32 acc.
    return jnp.dot(a.astype(jnp.bfloat16), b.astype(jnp.bfloat16),
                   preferred_element_type=jnp.float32)


def _ref_step(fe, adj, raw_params):
    w2, w3, bn_g, bn_b, bn_rm, bn_rv, fw1t, fb1, fw2row, fb2 = raw_params
    nf = _bdot(fe, w2)
    adjT_s = jax.nn.softmax(adj.T, axis=1)
    edge_emb = jnp.maximum(_bdot(adjT_s, nf), 0.0)
    edge_trans = _bdot(edge_emb, w3)
    adj_s = jax.nn.softmax(adj, axis=1)
    node_att = jnp.maximum(_bdot(adj_s, edge_trans), 0.0)
    edge_out = jnp.maximum(_bdot(adjT_s, node_att), 0.0)
    inv = 1.0 / jnp.sqrt(bn_rv + 1e-5)
    node_bn = (node_att - bn_rm) * inv * bn_g + bn_b
    edge_bn = (edge_out - bn_rm) * inv * bn_g + bn_b
    s_h = jnp.sum(jnp.tanh(_bdot(fe, fw1t) + fb1) * fw2row, -1, keepdims=True) + fb2
    s_d = jnp.sum(jnp.tanh(_bdot(node_bn, fw1t) + fb1) * fw2row, -1, keepdims=True) + fb2
    sc = jax.nn.softmax(jnp.stack([s_h, s_d], axis=0), axis=0)
    new_fe = sc[0] * fe + sc[1] * node_bn
    return new_fe, edge_bn


# ----------------------------------------------------------------------------- main
if __name__ == "__main__":
    # nodes, hyper-edges per subgraph, feature dim (lane-dense), number of subgraphs
    N, E, D, G = 64, 32, 128, 3

    key = jax.random.PRNGKey(0)
    ks = jax.random.split(key, 16)
    f32 = jnp.float32

    # --- HGATLayer params (transfer=False, bias=False): weight2, weight3 ~ U(-stdv, stdv)
    stdv = 1.0 / math.sqrt(D)
    w2 = jax.random.uniform(ks[0], (D, D), f32, -stdv, stdv)
    w3 = jax.random.uniform(ks[1], (D, D), f32, -stdv, stdv)

    # --- BatchNorm1d(D) params / running stats (eval mode)
    bn_g = (1.0 + 0.1 * jax.random.normal(ks[2], (D,))).astype(f32).reshape(1, D)
    bn_b = (0.1 * jax.random.normal(ks[3], (D,))).astype(f32).reshape(1, D)
    bn_rm = (0.1 * jax.random.normal(ks[4], (D,))).astype(f32).reshape(1, D)
    bn_rv = jax.random.uniform(ks[5], (D,), f32, 0.5, 1.5).reshape(1, D)

    # --- Fusion params: linear1 (D->D, xavier_normal), linear2 (D->1, xavier_normal)
    fw1 = (jax.random.normal(ks[6], (D, D)) * math.sqrt(2.0 / (D + D))).astype(f32)  # torch [out,in]
    fb1 = jax.random.uniform(ks[7], (D,), f32, -stdv, stdv).reshape(1, D)
    fw2 = (jax.random.normal(ks[8], (1, D)) * math.sqrt(2.0 / (D + 1))).astype(f32)  # torch [1, D]
    fb2 = jax.random.uniform(ks[9], (1,), f32, -stdv, stdv).reshape(1, 1)
    fw1t = fw1.T  # x @ fw1t == x @ W1.T (torch Linear)

    raw_params = (w2, w3, bn_g, bn_b, bn_rm, bn_rv, fw1t, fb1, fw2, fb2)

    # --- inputs: friendship embedding + hypergraph structure (dict of adjacency, root idx)
    friendship = jax.random.normal(ks[10], (N, D), f32)
    hypergraph = {f"g{i}": jax.random.uniform(ks[11 + i], (N, E), f32) for i in range(G)}
    root_idx = jnp.array([0, 3, 7, 11], dtype=jnp.int32)

    results = hierarchical_gnn_forward(friendship, (hypergraph, root_idx), raw_params)
    jax.block_until_ready(results)

    # --- check against a pure-JAX reference using the same MXU precision policy.
    #     Tolerance accounts for the kernel's approx (EUP) reciprocals in the softmax
    #     normalizations and the 2-way fusion gate (~2^-12 relative) on top of the shared
    #     bf16-input / f32-accumulate matmul rounding.
    fe_ref = friendship
    for k in hypergraph.keys():
        fe_ref, edge_bn_ref = _ref_step(fe_ref, hypergraph[k], raw_params)
        got_fe, got_edge = results[k]
        np.testing.assert_allclose(np.asarray(got_fe), np.asarray(fe_ref),
                                   rtol=5e-3, atol=5e-3)
        np.testing.assert_allclose(np.asarray(got_edge), np.asarray(edge_bn_ref),
                                   rtol=5e-3, atol=5e-3)

    print("KERNEL_OK")
</pallas_src>

<mosaic_0001>
module attributes {stable_mosaic.version = 11 : i64} {
  func.func @_hgnn_fused_kernel(%arg0: i32, %arg1: memref<64x128xf32, #tpu.memory_space<vmem>>, %arg2: memref<3x64x32xf32, #tpu.memory_space<vmem>>, %arg3: memref<128x256xbf16, #tpu.memory_space<vmem>>, %arg4: memref<128x128xbf16, #tpu.memory_space<vmem>>, %arg5: memref<1x128xf32, #tpu.memory_space<vmem>>, %arg6: memref<1x128xf32, #tpu.memory_space<vmem>>, %arg7: memref<1x128xf32, #tpu.memory_space<vmem>>, %arg8: memref<1x128xf32, #tpu.memory_space<vmem>>, %arg9: memref<3x64x128xf32, #tpu.memory_space<vmem>>, %arg10: memref<3x32x128xf32, #tpu.memory_space<vmem>>) attributes {dimension_semantics = [#tpu.dimension_semantics<arbitrary>], iteration_bounds = array<i64: 1>, scalar_prefetch = 0 : i64, scratch_operands = 0 : i64, tpu.core_type = #tpu.core_type<tc>, window_params = [{pipeline_mode = #tpu.pipeline_mode<synchronous>, transform_indices = @transform_0, window_bounds = array<i64: 64, 128>}, {pipeline_mode = #tpu.pipeline_mode<synchronous>, transform_indices = @transform_1, window_bounds = array<i64: 3, 64, 32>}, {pipeline_mode = #tpu.pipeline_mode<synchronous>, transform_indices = @transform_2, window_bounds = array<i64: 128, 256>}, {pipeline_mode = #tpu.pipeline_mode<synchronous>, transform_indices = @transform_3, window_bounds = array<i64: 128, 128>}, {pipeline_mode = #tpu.pipeline_mode<synchronous>, transform_indices = @transform_4, window_bounds = array<i64: 1, 128>}, {pipeline_mode = #tpu.pipeline_mode<synchronous>, transform_indices = @transform_5, window_bounds = array<i64: 1, 128>}, {pipeline_mode = #tpu.pipeline_mode<synchronous>, transform_indices = @transform_6, window_bounds = array<i64: 1, 128>}, {pipeline_mode = #tpu.pipeline_mode<synchronous>, transform_indices = @transform_7, window_bounds = array<i64: 1, 128>}, {pipeline_mode = #tpu.pipeline_mode<synchronous>, transform_indices = @transform_8, window_bounds = array<i64: 3, 64, 128>}, {pipeline_mode = #tpu.pipeline_mode<synchronous>, transform_indices = @transform_9, window_bounds = array<i64: 3, 32, 128>}]} {
    %c0 = arith.constant 0 : index
    %c0_0 = arith.constant 0 : index
    %0 = vector.load %arg3[%c0, %c0_0] : memref<128x256xbf16, #tpu.memory_space<vmem>>, vector<128x256xbf16>
    %1 = vector.extract_strided_slice %0 {offsets = [0, 128], sizes = [128, 128], strides = [1, 1]} : vector<128x256xbf16> to vector<128x128xbf16>
    %c0_1 = arith.constant 0 : index
    %c0_2 = arith.constant 0 : index
    %2 = vector.load %arg4[%c0_1, %c0_2] : memref<128x128xbf16, #tpu.memory_space<vmem>>, vector<128x128xbf16>
    %c0_3 = arith.constant 0 : index
    %c0_4 = arith.constant 0 : index
    %3 = vector.load %arg5[%c0_3, %c0_4] : memref<1x128xf32, #tpu.memory_space<vmem>>, vector<1x128xf32>
    %c0_5 = arith.constant 0 : index
    %c0_6 = arith.constant 0 : index
    %4 = vector.load %arg6[%c0_5, %c0_6] : memref<1x128xf32, #tpu.memory_space<vmem>>, vector<1x128xf32>
    %c0_7 = arith.constant 0 : index
    %c0_8 = arith.constant 0 : index
    %5 = vector.load %arg7[%c0_7, %c0_8] : memref<1x128xf32, #tpu.memory_space<vmem>>, vector<1x128xf32>
    %c0_9 = arith.constant 0 : index
    %c0_10 = arith.constant 0 : index
    %6 = vector.load %arg8[%c0_9, %c0_10] : memref<1x128xf32, #tpu.memory_space<vmem>>, vector<1x128xf32>
    %c0_11 = arith.constant 0 : index
    %c0_12 = arith.constant 0 : index
    %7 = vector.load %arg1[%c0_11, %c0_12] : memref<64x128xf32, #tpu.memory_space<vmem>>, vector<64x128xf32>
    %c0_i32 = arith.constant 0 : i32
    %8 = arith.index_cast %c0_i32 : i32 to index
    %c0_13 = arith.constant 0 : index
    %c0_14 = arith.constant 0 : index
    %9 = vector.load %arg2[%8, %c0_13, %c0_14] : memref<3x64x32xf32, #tpu.memory_space<vmem>>, vector<1x64x32xf32>
    %10 = vector.shape_cast %9 : vector<1x64x32xf32> to vector<64x32xf32>
    %11 = arith.truncf %7 : vector<64x128xf32> to vector<64x128xbf16>
    %cst = arith.constant dense<0.000000e+00> : vector<64x256xf32>
    %12 = tpu.matmul %11, %0, %cst {dimension_numbers = #tpu.dot_dimension_numbers<[1], [0], [0], [1], [0, 0, 1, 1], [], []>} : vector<64x128xbf16>, vector<128x256xbf16>, vector<64x256xf32> -> vector<64x256xf32>
    %13 = vector.extract_strided_slice %12 {offsets = [0, 0], sizes = [64, 128], strides = [1, 1]} : vector<64x256xf32> to vector<64x128xf32>
    %14 = vector.extract_strided_slice %12 {offsets = [0, 128], sizes = [64, 128], strides = [1, 1]} : vector<64x256xf32> to vector<64x128xf32>
    %15 = tpu.transpose %10, [1, 0] : vector<64x32xf32> -> vector<32x64xf32>
    %cst_15 = arith.constant dense<0xFF800000> : vector<32xf32>
    %16 = vector.multi_reduction <maximumf>, %15, %cst_15 [1] : vector<32x64xf32> to vector<32xf32>
    %17 = vector.shape_cast %16 : vector<32xf32> to vector<32x1xf32>
    %18 = vector.broadcast %17 : vector<32x1xf32> to vector<32x64xf32>
    %19 = arith.subf %15, %18 : vector<32x64xf32>
    %20 = math.exp %19 : vector<32x64xf32>
    %cst_16 = arith.constant dense<0.000000e+00> : vector<32xf32>
    %21 = vector.multi_reduction <add>, %20, %cst_16 [1] : vector<32x64xf32> to vector<32xf32>
    %22 = vector.shape_cast %21 : vector<32xf32> to vector<32x1xf32>
    %23 = tpu.reciprocal %22 {approx = true} : vector<32x1xf32> -> vector<32x1xf32>
    %24 = vector.broadcast %23 : vector<32x1xf32> to vector<32x64xf32>
    %25 = arith.mulf %20, %24 : vector<32x64xf32>
    %26 = arith.truncf %25 : vector<32x64xf32> to vector<32x64xbf16>
    %cst_17 = arith.constant dense<0xFF800000> : vector<64xf32>
    %27 = vector.multi_reduction <maximumf>, %10, %cst_17 [1] : vector<64x32xf32> to vector<64xf32>
    %28 = vector.shape_cast %27 : vector<64xf32> to vector<64x1xf32>
    %29 = vector.broadcast %28 : vector<64x1xf32> to vector<64x32xf32>
    %30 = arith.subf %10, %29 : vector<64x32xf32>
    %31 = math.exp %30 : vector<64x32xf32>
    %cst_18 = arith.constant dense<0.000000e+00> : vector<64xf32>
    %32 = vector.multi_reduction <add>, %31, %cst_18 [1] : vector<64x32xf32> to vector<64xf32>
    %33 = vector.shape_cast %32 : vector<64xf32> to vector<64x1xf32>
    %34 = tpu.reciprocal %33 {approx = true} : vector<64x1xf32> -> vector<64x1xf32>
    %35 = vector.broadcast %34 : vector<64x1xf32> to vector<64x32xf32>
    %36 = arith.mulf %31, %35 : vector<64x32xf32>
    %37 = arith.truncf %36 : vector<64x32xf32> to vector<64x32xbf16>
    %38 = arith.truncf %13 : vector<64x128xf32> to vector<64x128xbf16>
    %cst_19 = arith.constant dense<0.000000e+00> : vector<32x128xf32>
    %39 = tpu.matmul %26, %38, %cst_19 {dimension_numbers = #tpu.dot_dimension_numbers<[1], [0], [0], [1], [0, 0, 1, 1], [], []>} : vector<32x64xbf16>, vector<64x128xbf16>, vector<32x128xf32> -> vector<32x128xf32>
    %cst_20 = arith.constant 0.000000e+00 : f32
    %40 = vector.broadcast %cst_20 : f32 to vector<32x128xf32>
    %41 = arith.maximumf %39, %40 : vector<32x128xf32>
    %42 = arith.truncf %41 : vector<32x128xf32> to vector<32x128xbf16>
    %cst_21 = arith.constant dense<0.000000e+00> : vector<32x128xf32>
    %43 = tpu.matmul %42, %2, %cst_21 {dimension_numbers = #tpu.dot_dimension_numbers<[1], [0], [0], [1], [0, 0, 1, 1], [], []>} : vector<32x128xbf16>, vector<128x128xbf16>, vector<32x128xf32> -> vector<32x128xf32>
    %44 = arith.truncf %43 : vector<32x128xf32> to vector<32x128xbf16>
    %cst_22 = arith.constant dense<0.000000e+00> : vector<64x128xf32>
    %45 = tpu.matmul %37, %44, %cst_22 {dimension_numbers = #tpu.dot_dimension_numbers<[1], [0], [0], [1], [0, 0, 1, 1], [], []>} : vector<64x32xbf16>, vector<32x128xbf16>, vector<64x128xf32> -> vector<64x128xf32>
    %cst_23 = arith.constant 0.000000e+00 : f32
    %46 = vector.broadcast %cst_23 : f32 to vector<64x128xf32>
    %47 = arith.maximumf %45, %46 : vector<64x128xf32>
    %48 = arith.truncf %47 : vector<64x128xf32> to vector<64x128xbf16>
    %cst_24 = arith.constant dense<0.000000e+00> : vector<32x128xf32>
    %49 = tpu.matmul %26, %48, %cst_24 {dimension_numbers = #tpu.dot_dimension_numbers<[1], [0], [0], [1], [0, 0, 1, 1], [], []>} : vector<32x64xbf16>, vector<64x128xbf16>, vector<32x128xf32> -> vector<32x128xf32>
    %cst_25 = arith.constant 0.000000e+00 : f32
    %50 = vector.broadcast %cst_25 : f32 to vector<32x128xf32>
    %51 = arith.maximumf %49, %50 : vector<32x128xf32>
    %52 = vector.broadcast %3 : vector<1x128xf32> to vector<64x128xf32>
    %53 = arith.mulf %47, %52 : vector<64x128xf32>
    %54 = vector.broadcast %4 : vector<1x128xf32> to vector<64x128xf32>
    %55 = arith.addf %53, %54 : vector<64x128xf32>
    %56 = vector.broadcast %3 : vector<1x128xf32> to vector<32x128xf32>
    %57 = arith.mulf %51, %56 : vector<32x128xf32>
    %58 = vector.broadcast %4 : vector<1x128xf32> to vector<32x128xf32>
    %59 = arith.addf %57, %58 : vector<32x128xf32>
    %60 = arith.truncf %55 : vector<64x128xf32> to vector<64x128xbf16>
    %cst_26 = arith.constant dense<0.000000e+00> : vector<64x128xf32>
    %61 = tpu.matmul %60, %1, %cst_26 {dimension_numbers = #tpu.dot_dimension_numbers<[1], [0], [0], [1], [0, 0, 1, 1], [], []>} : vector<64x128xbf16>, vector<128x128xbf16>, vector<64x128xf32> -> vector<64x128xf32>
    %62 = tpu.concatenate %14, %61 in 0 : vector<64x128xf32>, vector<64x128xf32> -> vector<128x128xf32>
    %63 = vector.broadcast %5 : vector<1x128xf32> to vector<128x128xf32>
    %64 = arith.addf %62, %63 : vector<128x128xf32>
    %65 = math.tanh %64 : vector<128x128xf32>
    %66 = vector.broadcast %6 : vector<1x128xf32> to vector<128x128xf32>
    %67 = arith.mulf %65, %66 : vector<128x128xf32>
    %cst_27 = arith.constant dense<0.000000e+00> : vector<128xf32>
    %68 = vector.multi_reduction <add>, %67, %cst_27 [1] : vector<128x128xf32> to vector<128xf32>
    %69 = vector.shape_cast %68 : vector<128xf32> to vector<128x1xf32>
    %70 = vector.extract_strided_slice %69 {offsets = [0, 0], sizes = [64, 1], strides = [1, 1]} : vector<128x1xf32> to vector<64x1xf32>
    %71 = vector.extract_strided_slice %69 {offsets = [64, 0], sizes = [64, 1], strides = [1, 1]} : vector<128x1xf32> to vector<64x1xf32>
    %72 = arith.maximumf %70, %71 : vector<64x1xf32>
    %73 = arith.subf %70, %72 : vector<64x1xf32>
    %74 = math.exp %73 : vector<64x1xf32>
    %75 = arith.subf %71, %72 : vector<64x1xf32>
    %76 = math.exp %75 : vector<64x1xf32>
    %77 = arith.addf %74, %76 : vector<64x1xf32>
    %78 = tpu.reciprocal %77 {approx = true} : vector<64x1xf32> -> vector<64x1xf32>
    %79 = arith.mulf %74, %78 : vector<64x1xf32>
    %80 = vector.broadcast %79 : vector<64x1xf32> to vector<64x128xf32>
    %81 = arith.mulf %80, %7 : vector<64x128xf32>
    %82 = arith.mulf %76, %78 : vector<64x1xf32>
    %83 = vector.broadcast %82 : vector<64x1xf32> to vector<64x128xf32>
    %84 = arith.mulf %83, %55 : vector<64x128xf32>
    %85 = arith.addf %81, %84 : vector<64x128xf32>
    %86 = arith.index_cast %c0_i32 : i32 to index
    %c0_28 = arith.constant 0 : index
    %c0_29 = arith.constant 0 : index
    %87 = vector.load %arg9[%86, %c0_28, %c0_29] : memref<3x64x128xf32, #tpu.memory_space<vmem>>, vector<1x64x128xf32>
    %88 = vector.shape_cast %87 : vector<1x64x128xf32> to vector<64x128xf32>
    %89 = vector.shape_cast %85 : vector<64x128xf32> to vector<1x64x128xf32>
    tpu.vector_store %arg9[%86, %c0_28, %c0_29], %89 {strides = array<i32>} : memref<3x64x128xf32, #tpu.memory_space<vmem>>, vector<1x64x128xf32>,
    %90 = arith.index_cast %c0_i32 : i32 to index
    %c0_30 = arith.constant 0 : index
    %c0_31 = arith.constant 0 : index
    %91 = vector.load %arg10[%90, %c0_30, %c0_31] : memref<3x32x128xf32, #tpu.memory_space<vmem>>, vector<1x32x128xf32>
    %92 = vector.shape_cast %91 : vector<1x32x128xf32> to vector<32x128xf32>
    %93 = vector.shape_cast %59 : vector<32x128xf32> to vector<1x32x128xf32>
    tpu.vector_store %arg10[%90, %c0_30, %c0_31], %93 {strides = array<i32>} : memref<3x32x128xf32, #tpu.memory_space<vmem>>, vector<1x32x128xf32>,
    %c1_i32 = arith.constant 1 : i32
    %94 = arith.index_cast %c1_i32 : i32 to index
    %c0_32 = arith.constant 0 : index
    %c0_33 = arith.constant 0 : index
    %95 = vector.load %arg2[%94, %c0_32, %c0_33] : memref<3x64x32xf32, #tpu.memory_space<vmem>>, vector<1x64x32xf32>
    %96 = vector.shape_cast %95 : vector<1x64x32xf32> to vector<64x32xf32>
    %97 = arith.truncf %85 : vector<64x128xf32> to vector<64x128xbf16>
    %cst_34 = arith.constant dense<0.000000e+00> : vector<64x256xf32>
    %98 = tpu.matmul %97, %0, %cst_34 {dimension_numbers = #tpu.dot_dimension_numbers<[1], [0], [0], [1], [0, 0, 1, 1], [], []>} : vector<64x128xbf16>, vector<128x256xbf16>, vector<64x256xf32> -> vector<64x256xf32>
    %99 = vector.extract_strided_slice %98 {offsets = [0, 0], sizes = [64, 128], strides = [1, 1]} : vector<64x256xf32> to vector<64x128xf32>
    %100 = vector.extract_strided_slice %98 {offsets = [0, 128], sizes = [64, 128], strides = [1, 1]} : vector<64x256xf32> to vector<64x128xf32>
    %101 = tpu.transpose %96, [1, 0] : vector<64x32xf32> -> vector<32x64xf32>
    %cst_35 = arith.constant dense<0xFF800000> : vector<32xf32>
    %102 = vector.multi_reduction <maximumf>, %101, %cst_35 [1] : vector<32x64xf32> to vector<32xf32>
    %103 = vector.shape_cast %102 : vector<32xf32> to vector<32x1xf32>
    %104 = vector.broadcast %103 : vector<32x1xf32> to vector<32x64xf32>
    %105 = arith.subf %101, %104 : vector<32x64xf32>
    %106 = math.exp %105 : vector<32x64xf32>
    %cst_36 = arith.constant dense<0.000000e+00> : vector<32xf32>
    %107 = vector.multi_reduction <add>, %106, %cst_36 [1] : vector<32x64xf32> to vector<32xf32>
    %108 = vector.shape_cast %107 : vector<32xf32> to vector<32x1xf32>
    %109 = tpu.reciprocal %108 {approx = true} : vector<32x1xf32> -> vector<32x1xf32>
    %110 = vector.broadcast %109 : vector<32x1xf32> to vector<32x64xf32>
    %111 = arith.mulf %106, %110 : vector<32x64xf32>
    %112 = arith.truncf %111 : vector<32x64xf32> to vector<32x64xbf16>
    %cst_37 = arith.constant dense<0xFF800000> : vector<64xf32>
    %113 = vector.multi_reduction <maximumf>, %96, %cst_37 [1] : vector<64x32xf32> to vector<64xf32>
    %114 = vector.shape_cast %113 : vector<64xf32> to vector<64x1xf32>
    %115 = vector.broadcast %114 : vector<64x1xf32> to vector<64x32xf32>
    %116 = arith.subf %96, %115 : vector<64x32xf32>
    %117 = math.exp %116 : vector<64x32xf32>
    %cst_38 = arith.constant dense<0.000000e+00> : vector<64xf32>
    %118 = vector.multi_reduction <add>, %117, %cst_38 [1] : vector<64x32xf32> to vector<64xf32>
    %119 = vector.shape_cast %118 : vector<64xf32> to vector<64x1xf32>
    %120 = tpu.reciprocal %119 {approx = true} : vector<64x1xf32> -> vector<64x1xf32>
    %121 = vector.broadcast %120 : vector<64x1xf32> to vector<64x32xf32>
    %122 = arith.mulf %117, %121 : vector<64x32xf32>
    %123 = arith.truncf %122 : vector<64x32xf32> to vector<64x32xbf16>
    %124 = arith.truncf %99 : vector<64x128xf32> to vector<64x128xbf16>
    %cst_39 = arith.constant dense<0.000000e+00> : vector<32x128xf32>
    %125 = tpu.matmul %112, %124, %cst_39 {dimension_numbers = #tpu.dot_dimension_numbers<[1], [0], [0], [1], [0, 0, 1, 1], [], []>} : vector<32x64xbf16>, vector<64x128xbf16>, vector<32x128xf32> -> vector<32x128xf32>
    %cst_40 = arith.constant 0.000000e+00 : f32
    %126 = vector.broadcast %cst_40 : f32 to vector<32x128xf32>
    %127 = arith.maximumf %125, %126 : vector<32x128xf32>
    %128 = arith.truncf %127 : vector<32x128xf32> to vector<32x128xbf16>
    %cst_41 = arith.constant dense<0.000000e+00> : vector<32x128xf32>
    %129 = tpu.matmul %128, %2, %cst_41 {dimension_numbers = #tpu.dot_dimension_numbers<[1], [0], [0], [1], [0, 0, 1, 1], [], []>} : vector<32x128xbf16>, vector<128x128xbf16>, vector<32x128xf32> -> vector<32x128xf32>
    %130 = arith.truncf %129 : vector<32x128xf32> to vector<32x128xbf16>
    %cst_42 = arith.constant dense<0.000000e+00> : vector<64x128xf32>
    %131 = tpu.matmul %123, %130, %cst_42 {dimension_numbers = #tpu.dot_dimension_numbers<[1], [0], [0], [1], [0, 0, 1, 1], [], []>} : vector<64x32xbf16>, vector<32x128xbf16>, vector<64x128xf32> -> vector<64x128xf32>
    %cst_43 = arith.constant 0.000000e+00 : f32
    %132 = vector.broadcast %cst_43 : f32 to vector<64x128xf32>
    %133 = arith.maximumf %131, %132 : vector<64x128xf32>
    %134 = arith.truncf %133 : vector<64x128xf32> to vector<64x128xbf16>
    %cst_44 = arith.constant dense<0.000000e+00> : vector<32x128xf32>
    %135 = tpu.matmul %112, %134, %cst_44 {dimension_numbers = #tpu.dot_dimension_numbers<[1], [0], [0], [1], [0, 0, 1, 1], [], []>} : vector<32x64xbf16>, vector<64x128xbf16>, vector<32x128xf32> -> vector<32x128xf32>
    %cst_45 = arith.constant 0.000000e+00 : f32
    %136 = vector.broadcast %cst_45 : f32 to vector<32x128xf32>
    %137 = arith.maximumf %135, %136 : vector<32x128xf32>
    %138 = vector.broadcast %3 : vector<1x128xf32> to vector<64x128xf32>
    %139 = arith.mulf %133, %138 : vector<64x128xf32>
    %140 = vector.broadcast %4 : vector<1x128xf32> to vector<64x128xf32>
    %141 = arith.addf %139, %140 : vector<64x128xf32>
    %142 = vector.broadcast %3 : vector<1x128xf32> to vector<32x128xf32>
    %143 = arith.mulf %137, %142 : vector<32x128xf32>
    %144 = vector.broadcast %4 : vector<1x128xf32> to vector<32x128xf32>
    %145 = arith.addf %143, %144 : vector<32x128xf32>
    %146 = arith.truncf %141 : vector<64x128xf32> to vector<64x128xbf16>
    %cst_46 = arith.constant dense<0.000000e+00> : vector<64x128xf32>
    %147 = tpu.matmul %146, %1, %cst_46 {dimension_numbers = #tpu.dot_dimension_numbers<[1], [0], [0], [1], [0, 0, 1, 1], [], []>} : vector<64x128xbf16>, vector<128x128xbf16>, vector<64x128xf32> -> vector<64x128xf32>
    %148 = tpu.concatenate %100, %147 in 0 : vector<64x128xf32>, vector<64x128xf32> -> vector<128x128xf32>
    %149 = vector.broadcast %5 : vector<1x128xf32> to vector<128x128xf32>
    %150 = arith.addf %148, %149 : vector<128x128xf32>
    %151 = math.tanh %150 : vector<128x128xf32>
    %152 = vector.broadcast %6 : vector<1x128xf32> to vector<128x128xf32>
    %153 = arith.mulf %151, %152 : vector<128x128xf32>
    %cst_47 = arith.constant dense<0.000000e+00> : vector<128xf32>
    %154 = vector.multi_reduction <add>, %153, %cst_47 [1] : vector<128x128xf32> to vector<128xf32>
    %155 = vector.shape_cast %154 : vector<128xf32> to vector<128x1xf32>
    %156 = vector.extract_strided_slice %155 {offsets = [0, 0], sizes = [64, 1], strides = [1, 1]} : vector<128x1xf32> to vector<64x1xf32>
    %157 = vector.extract_strided_slice %155 {offsets = [64, 0], sizes = [64, 1], strides = [1, 1]} : vector<128x1xf32> to vector<64x1xf32>
    %158 = arith.maximumf %156, %157 : vector<64x1xf32>
    %159 = arith.subf %156, %158 : vector<64x1xf32>
    %160 = math.exp %159 : vector<64x1xf32>
    %161 = arith.subf %157, %158 : vector<64x1xf32>
    %162 = math.exp %161 : vector<64x1xf32>
    %163 = arith.addf %160, %162 : vector<64x1xf32>
    %164 = tpu.reciprocal %163 {approx = true} : vector<64x1xf32> -> vector<64x1xf32>
    %165 = arith.mulf %160, %164 : vector<64x1xf32>
    %166 = vector.broadcast %165 : vector<64x1xf32> to vector<64x128xf32>
    %167 = arith.mulf %166, %85 : vector<64x128xf32>
    %168 = arith.mulf %162, %164 : vector<64x1xf32>
    %169 = vector.broadcast %168 : vector<64x1xf32> to vector<64x128xf32>
    %170 = arith.mulf %169, %141 : vector<64x128xf32>
    %171 = arith.addf %167, %170 : vector<64x128xf32>
    %172 = arith.index_cast %c1_i32 : i32 to index
    %c0_48 = arith.constant 0 : index
    %c0_49 = arith.constant 0 : index
    %173 = vector.load %arg9[%172, %c0_48, %c0_49] : memref<3x64x128xf32, #tpu.memory_space<vmem>>, vector<1x64x128xf32>
    %174 = vector.shape_cast %173 : vector<1x64x128xf32> to vector<64x128xf32>
    %175 = vector.shape_cast %171 : vector<64x128xf32> to vector<1x64x128xf32>
    tpu.vector_store %arg9[%172, %c0_48, %c0_49], %175 {strides = array<i32>} : memref<3x64x128xf32, #tpu.memory_space<vmem>>, vector<1x64x128xf32>,
    %176 = arith.index_cast %c1_i32 : i32 to index
    %c0_50 = arith.constant 0 : index
    %c0_51 = arith.constant 0 : index
    %177 = vector.load %arg10[%176, %c0_50, %c0_51] : memref<3x32x128xf32, #tpu.memory_space<vmem>>, vector<1x32x128xf32>
    %178 = vector.shape_cast %177 : vector<1x32x128xf32> to vector<32x128xf32>
    %179 = vector.shape_cast %145 : vector<32x128xf32> to vector<1x32x128xf32>
    tpu.vector_store %arg10[%176, %c0_50, %c0_51], %179 {strides = array<i32>} : memref<3x32x128xf32, #tpu.memory_space<vmem>>, vector<1x32x128xf32>,
    %c2_i32 = arith.constant 2 : i32
    %180 = arith.index_cast %c2_i32 : i32 to index
    %c0_52 = arith.constant 0 : index
    %c0_53 = arith.constant 0 : index
    %181 = vector.load %arg2[%180, %c0_52, %c0_53] : memref<3x64x32xf32, #tpu.memory_space<vmem>>, vector<1x64x32xf32>
    %182 = vector.shape_cast %181 : vector<1x64x32xf32> to vector<64x32xf32>
    %183 = arith.truncf %171 : vector<64x128xf32> to vector<64x128xbf16>
    %cst_54 = arith.constant dense<0.000000e+00> : vector<64x256xf32>
    %184 = tpu.matmul %183, %0, %cst_54 {dimension_numbers = #tpu.dot_dimension_numbers<[1], [0], [0], [1], [0, 0, 1, 1], [], []>} : vector<64x128xbf16>, vector<128x256xbf16>, vector<64x256xf32> -> vector<64x256xf32>
    %185 = vector.extract_strided_slice %184 {offsets = [0, 0], sizes = [64, 128], strides = [1, 1]} : vector<64x256xf32> to vector<64x128xf32>
    %186 = vector.extract_strided_slice %184 {offsets = [0, 128], sizes = [64, 128], strides = [1, 1]} : vector<64x256xf32> to vector<64x128xf32>
    %187 = tpu.transpose %182, [1, 0] : vector<64x32xf32> -> vector<32x64xf32>
    %cst_55 = arith.constant dense<0xFF800000> : vector<32xf32>
    %188 = vector.multi_reduction <maximumf>, %187, %cst_55 [1] : vector<32x64xf32> to vector<32xf32>
    %189 = vector.shape_cast %188 : vector<32xf32> to vector<32x1xf32>
    %190 = vector.broadcast %189 : vector<32x1xf32> to vector<32x64xf32>
    %191 = arith.subf %187, %190 : vector<32x64xf32>
    %192 = math.exp %191 : vector<32x64xf32>
    %cst_56 = arith.constant dense<0.000000e+00> : vector<32xf32>
    %193 = vector.multi_reduction <add>, %192, %cst_56 [1] : vector<32x64xf32> to vector<32xf32>
    %194 = vector.shape_cast %193 : vector<32xf32> to vector<32x1xf32>
    %195 = tpu.reciprocal %194 {approx = true} : vector<32x1xf32> -> vector<32x1xf32>
    %196 = vector.broadcast %195 : vector<32x1xf32> to vector<32x64xf32>
    %197 = arith.mulf %192, %196 : vector<32x64xf32>
    %198 = arith.truncf %197 : vector<32x64xf32> to vector<32x64xbf16>
    %cst_57 = arith.constant dense<0xFF800000> : vector<64xf32>
    %199 = vector.multi_reduction <maximumf>, %182, %cst_57 [1] : vector<64x32xf32> to vector<64xf32>
    %200 = vector.shape_cast %199 : vector<64xf32> to vector<64x1xf32>
    %201 = vector.broadcast %200 : vector<64x1xf32> to vector<64x32xf32>
    %202 = arith.subf %182, %201 : vector<64x32xf32>
    %203 = math.exp %202 : vector<64x32xf32>
    %cst_58 = arith.constant dense<0.000000e+00> : vector<64xf32>
    %204 = vector.multi_reduction <add>, %203, %cst_58 [1] : vector<64x32xf32> to vector<64xf32>
    %205 = vector.shape_cast %204 : vector<64xf32> to vector<64x1xf32>
    %206 = tpu.reciprocal %205 {approx = true} : vector<64x1xf32> -> vector<64x1xf32>
    %207 = vector.broadcast %206 : vector<64x1xf32> to vector<64x32xf32>
    %208 = arith.mulf %203, %207 : vector<64x32xf32>
    %209 = arith.truncf %208 : vector<64x32xf32> to vector<64x32xbf16>
    %210 = arith.truncf %185 : vector<64x128xf32> to vector<64x128xbf16>
    %cst_59 = arith.constant dense<0.000000e+00> : vector<32x128xf32>
    %211 = tpu.matmul %198, %210, %cst_59 {dimension_numbers = #tpu.dot_dimension_numbers<[1], [0], [0], [1], [0, 0, 1, 1], [], []>} : vector<32x64xbf16>, vector<64x128xbf16>, vector<32x128xf32> -> vector<32x128xf32>
    %cst_60 = arith.constant 0.000000e+00 : f32
    %212 = vector.broadcast %cst_60 : f32 to vector<32x128xf32>
    %213 = arith.maximumf %211, %212 : vector<32x128xf32>
    %214 = arith.truncf %213 : vector<32x128xf32> to vector<32x128xbf16>
    %cst_61 = arith.constant dense<0.000000e+00> : vector<32x128xf32>
    %215 = tpu.matmul %214, %2, %cst_61 {dimension_numbers = #tpu.dot_dimension_numbers<[1], [0], [0], [1], [0, 0, 1, 1], [], []>} : vector<32x128xbf16>, vector<128x128xbf16>, vector<32x128xf32> -> vector<32x128xf32>
    %216 = arith.truncf %215 : vector<32x128xf32> to vector<32x128xbf16>
    %cst_62 = arith.constant dense<0.000000e+00> : vector<64x128xf32>
    %217 = tpu.matmul %209, %216, %cst_62 {dimension_numbers = #tpu.dot_dimension_numbers<[1], [0], [0], [1], [0, 0, 1, 1], [], []>} : vector<64x32xbf16>, vector<32x128xbf16>, vector<64x128xf32> -> vector<64x128xf32>
    %cst_63 = arith.constant 0.000000e+00 : f32
    %218 = vector.broadcast %cst_63 : f32 to vector<64x128xf32>
    %219 = arith.maximumf %217, %218 : vector<64x128xf32>
    %220 = arith.truncf %219 : vector<64x128xf32> to vector<64x128xbf16>
    %cst_64 = arith.constant dense<0.000000e+00> : vector<32x128xf32>
    %221 = tpu.matmul %198, %220, %cst_64 {dimension_numbers = #tpu.dot_dimension_numbers<[1], [0], [0], [1], [0, 0, 1, 1], [], []>} : vector<32x64xbf16>, vector<64x128xbf16>, vector<32x128xf32> -> vector<32x128xf32>
    %cst_65 = arith.constant 0.000000e+00 : f32
    %222 = vector.broadcast %cst_65 : f32 to vector<32x128xf32>
    %223 = arith.maximumf %221, %222 : vector<32x128xf32>
    %224 = vector.broadcast %3 : vector<1x128xf32> to vector<64x128xf32>
    %225 = arith.mulf %219, %224 : vector<64x128xf32>
    %226 = vector.broadcast %4 : vector<1x128xf32> to vector<64x128xf32>
    %227 = arith.addf %225, %226 : vector<64x128xf32>
    %228 = vector.broadcast %3 : vector<1x128xf32> to vector<32x128xf32>
    %229 = arith.mulf %223, %228 : vector<32x128xf32>
    %230 = vector.broadcast %4 : vector<1x128xf32> to vector<32x128xf32>
    %231 = arith.addf %229, %230 : vector<32x128xf32>
    %232 = arith.truncf %227 : vector<64x128xf32> to vector<64x128xbf16>
    %cst_66 = arith.constant dense<0.000000e+00> : vector<64x128xf32>
    %233 = tpu.matmul %232, %1, %cst_66 {dimension_numbers = #tpu.dot_dimension_numbers<[1], [0], [0], [1], [0, 0, 1, 1], [], []>} : vector<64x128xbf16>, vector<128x128xbf16>, vector<64x128xf32> -> vector<64x128xf32>
    %234 = tpu.concatenate %186, %233 in 0 : vector<64x128xf32>, vector<64x128xf32> -> vector<128x128xf32>
    %235 = vector.broadcast %5 : vector<1x128xf32> to vector<128x128xf32>
    %236 = arith.addf %234, %235 : vector<128x128xf32>
    %237 = math.tanh %236 : vector<128x128xf32>
    %238 = vector.broadcast %6 : vector<1x128xf32> to vector<128x128xf32>
    %239 = arith.mulf %237, %238 : vector<128x128xf32>
    %cst_67 = arith.constant dense<0.000000e+00> : vector<128xf32>
    %240 = vector.multi_reduction <add>, %239, %cst_67 [1] : vector<128x128xf32> to vector<128xf32>
    %241 = vector.shape_cast %240 : vector<128xf32> to vector<128x1xf32>
    %242 = vector.extract_strided_slice %241 {offsets = [0, 0], sizes = [64, 1], strides = [1, 1]} : vector<128x1xf32> to vector<64x1xf32>
    %243 = vector.extract_strided_slice %241 {offsets = [64, 0], sizes = [64, 1], strides = [1, 1]} : vector<128x1xf32> to vector<64x1xf32>
    %244 = arith.maximumf %242, %243 : vector<64x1xf32>
    %245 = arith.subf %242, %244 : vector<64x1xf32>
    %246 = math.exp %245 : vector<64x1xf32>
    %247 = arith.subf %243, %244 : vector<64x1xf32>
    %248 = math.exp %247 : vector<64x1xf32>
    %249 = arith.addf %246, %248 : vector<64x1xf32>
    %250 = tpu.reciprocal %249 {approx = true} : vector<64x1xf32> -> vector<64x1xf32>
    %251 = arith.mulf %246, %250 : vector<64x1xf32>
    %252 = vector.broadcast %251 : vector<64x1xf32> to vector<64x128xf32>
    %253 = arith.mulf %252, %171 : vector<64x128xf32>
    %254 = arith.mulf %248, %250 : vector<64x1xf32>
    %255 = vector.broadcast %254 : vector<64x1xf32> to vector<64x128xf32>
    %256 = arith.mulf %255, %227 : vector<64x128xf32>
    %257 = arith.addf %253, %256 : vector<64x128xf32>
    %258 = arith.index_cast %c2_i32 : i32 to index
    %c0_68 = arith.constant 0 : index
    %c0_69 = arith.constant 0 : index
    %259 = vector.load %arg9[%258, %c0_68, %c0_69] : memref<3x64x128xf32, #tpu.memory_space<vmem>>, vector<1x64x128xf32>
    %260 = vector.shape_cast %259 : vector<1x64x128xf32> to vector<64x128xf32>
    %261 = vector.shape_cast %257 : vector<64x128xf32> to vector<1x64x128xf32>
    tpu.vector_store %arg9[%258, %c0_68, %c0_69], %261 {strides = array<i32>} : memref<3x64x128xf32, #tpu.memory_space<vmem>>, vector<1x64x128xf32>,
    %262 = arith.index_cast %c2_i32 : i32 to index
    %c0_70 = arith.constant 0 : index
    %c0_71 = arith.constant 0 : index
    %263 = vector.load %arg10[%262, %c0_70, %c0_71] : memref<3x32x128xf32, #tpu.memory_space<vmem>>, vector<1x32x128xf32>
    %264 = vector.shape_cast %263 : vector<1x32x128xf32> to vector<32x128xf32>
    %265 = vector.shape_cast %231 : vector<32x128xf32> to vector<1x32x128xf32>
    tpu.vector_store %arg10[%262, %c0_70, %c0_71], %265 {strides = array<i32>} : memref<3x32x128xf32, #tpu.memory_space<vmem>>, vector<1x32x128xf32>,
    %c3_i32 = arith.constant 3 : i32
    return
  }
  func.func @transform_0(%arg0: i32) -> (i32, i32) {
    %c0_i32 = arith.constant 0 : i32
    %c0_i32_0 = arith.constant 0 : i32
    %c0_i32_1 = arith.constant 0 : i32
    return %c0_i32, %c0_i32_0 : i32, i32
  }
  func.func @transform_1(%arg0: i32) -> (i32, i32, i32) {
    %c0_i32 = arith.constant 0 : i32
    %c0_i32_0 = arith.constant 0 : i32
    %c0_i32_1 = arith.constant 0 : i32
    %c0_i32_2 = arith.constant 0 : i32
    return %c0_i32, %c0_i32_0, %c0_i32_1 : i32, i32, i32
  }
  func.func @transform_2(%arg0: i32) -> (i32, i32) {
    %c0_i32 = arith.constant 0 : i32
    %c0_i32_0 = arith.constant 0 : i32
    %c0_i32_1 = arith.constant 0 : i32
    return %c0_i32, %c0_i32_0 : i32, i32
  }
  func.func @transform_3(%arg0: i32) -> (i32, i32) {
    %c0_i32 = arith.constant 0 : i32
    %c0_i32_0 = arith.constant 0 : i32
    %c0_i32_1 = arith.constant 0 : i32
    return %c0_i32, %c0_i32_0 : i32, i32
  }
  func.func @transform_4(%arg0: i32) -> (i32, i32) {
    %c0_i32 = arith.constant 0 : i32
    %c0_i32_0 = arith.constant 0 : i32
    %c0_i32_1 = arith.constant 0 : i32
    return %c0_i32, %c0_i32_0 : i32, i32
  }
  func.func @transform_5(%arg0: i32) -> (i32, i32) {
    %c0_i32 = arith.constant 0 : i32
    %c0_i32_0 = arith.constant 0 : i32
    %c0_i32_1 = arith.constant 0 : i32
    return %c0_i32, %c0_i32_0 : i32, i32
  }
  func.func @transform_6(%arg0: i32) -> (i32, i32) {
    %c0_i32 = arith.constant 0 : i32
    %c0_i32_0 = arith.constant 0 : i32
    %c0_i32_1 = arith.constant 0 : i32
    return %c0_i32, %c0_i32_0 : i32, i32
  }
  func.func @transform_7(%arg0: i32) -> (i32, i32) {
    %c0_i32 = arith.constant 0 : i32
    %c0_i32_0 = arith.constant 0 : i32
    %c0_i32_1 = arith.constant 0 : i32
    return %c0_i32, %c0_i32_0 : i32, i32
  }
  func.func @transform_8(%arg0: i32) -> (i32, i32, i32) {
    %c0_i32 = arith.constant 0 : i32
    %c0_i32_0 = arith.constant 0 : i32
    %c0_i32_1 = arith.constant 0 : i32
    %c0_i32_2 = arith.constant 0 : i32
    return %c0_i32, %c0_i32_0, %c0_i32_1 : i32, i32, i32
  }
  func.func @transform_9(%arg0: i32) -> (i32, i32, i32) {
    %c0_i32 = arith.constant 0 : i32
    %c0_i32_0 = arith.constant 0 : i32
    %c0_i32_1 = arith.constant 0 : i32
    %c0_i32_2 = arith.constant 0 : i32
    return %c0_i32, %c0_i32_0, %c0_i32_1 : i32, i32, i32
  }
}

</mosaic_0001>

<bundles_post_ra>
// kernel: hgnn_forward_fused.1
= control target key start
LH: loop header
LB: loop body
LE: loop exit
PB: predicated region body
PF: predicated region fallthrough
CT: control target
= control target key end

     0   :  { %15 = vsyncpa [#allocation3], 0  ;;  %s4984_s0 = inlined_call_operand.vmem [shape: f32[64,128], index: 0, kind: input, shape index: {}]   ;;  %s4985_s1 = inlined_call_operand.vmem [shape: f32[3,64,32], index: 1, kind: input, shape index: {}]   ;;  %s4986_s2 = inlined_call_operand.vmem [shape: bf16[128,256], index: 2, kind: input, shape index: {}]   ;;  %s4987_s3 = inlined_call_operand.vmem [shape: bf16[128,128], index: 3, kind: input, shape index: {}]   ;;  %s4988_s4 = inlined_call_operand.vmem [shape: f32[1,128], index: 4, kind: input, shape index: {}]   ;;  %s4989_s5 = inlined_call_operand.vmem [shape: f32[1,128], index: 5, kind: input, shape index: {}]   ;;  %s4990_s6 = inlined_call_operand.vmem [shape: f32[1,128], index: 6, kind: input, shape index: {}]   ;;  %s4991_s7 = inlined_call_operand.vmem [shape: f32[1,128], index: 7, kind: input, shape index: {}]   ;;  %s4992_s8 = inlined_call_operand.hbm [shape: f32[3,64,128], index: 8, kind: output, shape index: {0}]   ;;  %s4993_s9 = inlined_call_operand.hbm [shape: f32[3,32,128], index: 9, kind: output, shape index: {1}]  }
   0x1   :  { %v3720_v0 = vld [vmem:[%s4985_s1] sm:$0xff]  ;;  %v3726_v1 = vld [vmem:[%s4985_s1 + $0x8] sm:$0xff]  ;;  %v3731_v2 = vld [vmem:[%s4985_s1 + $0x10] sm:$0xff] }
   0x2   :  { %243 = vxpose.xlu0.b32.start [1/8] (short) (narrow) %v3720_v0, 32  ;;  %v3738_v3 = vld [vmem:[%s4985_s1 + $0x18] sm:$0xff]  ;;  %v3744_v4 = vld [vmem:[%s4985_s1 + $0x20] sm:$0xff] }
   0x6   :  { %244 = vxpose.xlu0.b32.cont [2/8] (short) (narrow) %v3726_v1, 32 }
   0xa   :  { %245 = vxpose.xlu0.b32.cont [3/8] (short) (narrow) %v3731_v2, 32 }
   0xe   :  { %246 = vxpose.xlu0.b32.cont [4/8] (short) (narrow) %v3738_v3, 32 }
   0xf   :  { %16 = vsyncpa [#allocation5], 0  ;;  %v3749_v5 = vld [vmem:[%s4986_s2 + $0x4] ss:$8 sps:$4 sm:$0xff]   ;;  %v3754_v6 = vld [vmem:[%s4986_s2] ss:$8 sps:$4 sm:$0xff]  }
  0x10   :  { %v3759_v7 = vld [vmem:[%s4986_s2 + $0x14] ss:$8 sps:$4 sm:$0xff]   ;;  %170 = vmatprep.subr.bf16.mxu0 %v3749_v5  ;;  %v3766_v8 = vld [vmem:[%s4985_s1 + $0x28] sm:$0xff]  ;;  %v3772_v9 = vld [vmem:[%s4986_s2 + $0x10] ss:$8 sps:$4 sm:$0xff]   ;;  %v3662_v10 = vmov 0  }
  0x11   :  { %171 = vmatpush1.bf16.msra.mxu0 %v3754_v6  ;;  %202 = vmatprep.mubr.bf16.mxu0 %v3662_v10  ;;  %v3779_v11 = vld [vmem:[%s4986_s2 + $0x24] ss:$8 sps:$4 sm:$0xff]   ;;  %v3785_v12 = vld [vmem:[%s4985_s1 + $0x30] sm:$0xff]  ;;  %v3791_v13 = vld [vmem:[%s4986_s2 + $0x20] ss:$8 sps:$4 sm:$0xff]   ;;  %vm275_vm0 = vcmask 523264  }
  0x12   :  { %247 = vxpose.xlu0.b32.cont [5/8] (short) (narrow) %v3744_v4, 32  ;;  %172 = vmatprep.subr.bf16.mxu0 %v3759_v7  ;;  %v3797_v14 = vld [vmem:[%s4986_s2 + $0x34] ss:$8 sps:$4 sm:$0xff]   ;;  %v3809_v16 = vld [vmem:[%s4986_s2 + $0x30] ss:$8 sps:$4 sm:$0xff]   ;;  %v70_v25 = vld [vmem:[%s4984_s0] sm:$0xff] }
  0x13   :  { %v3803_v15 = vld [vmem:[%s4985_s1 + $0x38] sm:$0xff]  ;;  %v3815_v17 = vld [vmem:[%s4986_s2 + $0x44] ss:$8 sps:$4 sm:$0xff]   ;;  %v3822_v18 = vld [vmem:[%s4986_s2 + $0x40] ss:$8 sps:$4 sm:$0xff]   ;;  %vm322_vm1 = vcmask 261120  }
  0x14   :  { %v3828_v19 = vld [vmem:[%s4986_s2 + $0x54] ss:$8 sps:$4 sm:$0xff]   ;;  %v3834_v20 = vld [vmem:[%s4986_s2 + $0x50] ss:$8 sps:$4 sm:$0xff]   ;;  %v3840_v21 = vld [vmem:[%s4986_s2 + $0x64] ss:$8 sps:$4 sm:$0xff]  }
  0x15   :  { %173 = vmatpush1.bf16.msra.mxu0 %v3772_v9  ;;  %v3846_v22 = vld [vmem:[%s4986_s2 + $0x60] ss:$8 sps:$4 sm:$0xff]   ;;  %v3852_v23 = vld [vmem:[%s4986_s2 + $0x74] ss:$8 sps:$4 sm:$0xff]   ;;  %v3858_v24 = vld [vmem:[%s4986_s2 + $0x70] ss:$8 sps:$4 sm:$0xff]  }
  0x16   :  { %248 = vxpose.xlu0.b32.cont [6/8] (short) (narrow) %v3766_v8, 32  ;;  %174 = vmatprep.subr.bf16.mxu0 %v3779_v11  ;;  %v71_v26 = vld [vmem:[%s4984_s0 + $0x8] sm:$0xff]  ;;  %v72_v28 = vld [vmem:[%s4984_s0 + $0x10] sm:$0xff]  ;;  %v73_v29 = vld [vmem:[%s4984_s0 + $0x18] sm:$0xff]  ;;  %v323_v45 = vsel %vm322_vm1, %v3720_v0, -inf }
  0x17   :  { %v86_v27 = vpack.c.bf16 %v71_v26, %v70_v25  ;;  %v87_v30 = vpack.c.bf16 %v73_v29, %v72_v28  ;;  %v74_v31 = vld [vmem:[%s4984_s0 + $0x20] sm:$0xff]  ;;  %v75_v32 = vld [vmem:[%s4984_s0 + $0x28] sm:$0xff]  ;;  %v76_v34 = vld [vmem:[%s4984_s0 + $0x30] sm:$0xff] }
  0x18   :  { %v88_v33 = vpack.c.bf16 %v75_v32, %v74_v31  ;;  %v77_v35 = vld [vmem:[%s4984_s0 + $0x38] sm:$0xff] }
  0x19   :  { %175 = vmatpush1.bf16.msra.mxu0 %v3791_v13  ;;  %v89_v36 = vpack.c.bf16 %v77_v35, %v76_v34 }
  0x1a   :  { %249 = vxpose.xlu0.b32.cont [7/8] (short) (narrow) %v3785_v12, 32  ;;  %176 = vmatprep.subr.bf16.mxu0 %v3797_v14 }
  0x1d   :  { %177 = vmatpush1.bf16.msra.mxu0 %v3809_v16 }
  0x1e   :  { %250 = vxpose.xlu0.b32.end [8/8] (short) (narrow) %v3803_v15, 32  ;;  %178 = vmatprep.subr.bf16.mxu0 %v3815_v17 }
  0x21   :  { %179 = vmatpush1.bf16.msra.mxu0 %v3822_v18 }
  0x22   :  { %180 = vmatprep.subr.bf16.mxu0 %v3828_v19 }
  0x25   :  { %181 = vmatpush1.bf16.msra.mxu0 %v3834_v20 }
  0x26   :  { %182 = vmatprep.subr.bf16.mxu0 %v3840_v21 }
  0x29   :  { %183 = vmatpush1.bf16.msra.mxu0 %v3846_v22 }
  0x2a   :  { %184 = vmatprep.subr.bf16.mxu0 %v3852_v23 }
  0x2d   :  { %185 = vmatpush1.bf16.msra.mxu0 %v3858_v24 }
  0x30   :  { %203 = vmatmul.mubr.bf16.vlgmr.msra.gmra.mrb[0].mxu0 %v86_v27 }
  0x31   :  { %212 = vmatprep.mubr.bf16.mxu0 %v3662_v10 }
  0x38   :  { %213 = vmatmul.mubr.bf16.gmra.mrb[4].mxu0 %v87_v30 }
  0x39   :  { %222 = vmatprep.mubr.bf16.mxu0 %v3662_v10 }
  0x40   :  { %223 = vmatmul.mubr.bf16.gmra.mrb[8].mxu0 %v88_v33 }
  0x41   :  { %232 = vmatprep.mubr.bf16.mxu0 %v3662_v10 }
  0x48   :  { %233 = vmatmul.mubr.bf16.gmra.mrb[12].mxu0 %v89_v36 }
  0x4b   :  { %324 = vmax.xlane.f32.xlu0 %v323_v45  ;;  %v335_v45 = vsel %vm322_vm1, %v3744_v4, -inf }
  0x82   :  { %v259_v37 = vpop.trf.xlu0 }
  0x83   :  { %v276_v38 = vsel %vm275_vm0, %v259_v37, -inf }
  0x84   :  { %277 = vmax.xlane.f32.xlu1 %v276_v38  ;;  %v329_v38 = vsel %vm322_vm1, %v3731_v2, -inf }
  0x86   :  { %v260_v39 = vpop.trf.xlu0 }
  0x87   :  { %v279_v40 = vsel %vm275_vm0, %v260_v39, -inf }
  0x88   :  { %280 = vmax.xlane.f32.xlu1 %v279_v40 }
  0x8a   :  { %v261_v41 = vpop.trf.xlu0 }
  0x8b   :  { %v282_v42 = vsel %vm275_vm0, %v261_v41, -inf }
  0x8c   :  { %283 = vmax.xlane.f32.xlu1 %v282_v42  ;;  %v332_v42 = vsel %vm322_vm1, %v3738_v3, -inf }
  0x8e   :  { %v262_v43 = vpop.trf.xlu0 }
  0x8f   :  { %v285_v44 = vsel %vm275_vm0, %v262_v43, -inf }
  0x90   :  { %286 = vmax.xlane.f32.xlu1 %v285_v44 }
 0x103   :  { %v204_v46 = vpop.f32.mrb[0].mxu0 }
 0x104   :  { %v3895_v47 = vpop.f32.mrb[1].mxu0 }
 0x105   :  { %v208_v48 = vpop.f32.mrb[2].mxu0 }
 0x106   :  { %v415_v49 = vpack.c.bf16 %v208_v48, %v204_v46  ;;  %v3897_v50 = vpop.f32.mrb[3].mxu0  ;;  %v338_v46 = vsel %vm322_vm1, %v3766_v8, -inf }
 0x108   :  { %2888 = vmatprep.subr.bf16.mxu0 %v415_v49 }
 0x109   :  { %2889 = vmatpush3.bf16.msra.mxu0 %v415_v49  ;;  %v325_v49 = vpop.xlane.xlu0 %324 }
 0x10b   :  { %v214_v51 = vpop.f32.mrb[4].mxu0 }
 0x10c   :  { %v3899_v52 = vpop.f32.mrb[5].mxu0 }
 0x10d   :  { %v218_v53 = vpop.f32.mrb[6].mxu0 }
 0x10e   :  { %v416_v54 = vpack.c.bf16 %v218_v53, %v214_v51  ;;  %v3901_v55 = vpop.f32.mrb[7].mxu0  ;;  %v347_v53 = vsub.f32 %v3720_v0, %v325_v49 }
 0x110   :  { %2890 = vmatprep.subr.bf16.mxu0 %v416_v54 }
 0x111   :  { %v278_v56 = vpop.xlane.xlu1 %277  ;;  %2891 = vmatpush3.bf16.msra.mxu0 %v416_v54 }
 0x112   :  { %v288_v57 = vsub.f32 %v259_v37, %v278_v56  ;;  %v326_v37 = vsel %vm322_vm1, %v3726_v1, -inf }
 0x114   :  { %v292_v58 = vmul.f32 1.442695, %v288_v57 }
 0x115   :  { %v281_v59 = vpop.xlane.xlu1 %280 }
 0x116   :  { %3166 = vpow2.f32 %v292_v58  ;;  %v289_v60 = vsub.f32 %v260_v39, %v281_v59  ;;  %v224_v39 = vpop.f32.mrb[8].mxu0  ;;  %v355_v58 = vmul.f32 1.442695, %v347_v53  ;;  %v341_v59 = vsel %vm322_vm1, %v3785_v12, -inf }
 0x117   :  { %v3914_v40 = vpop.f32.mrb[9].mxu0 }
 0x118   :  { %v294_v61 = vmul.f32 1.442695, %v289_v60  ;;  %v344_v60 = vsel %vm322_vm1, %v3803_v15, -inf }
 0x119   :  { %v284_v62 = vpop.xlane.xlu1 %283 }
 0x11a   :  { %3168 = vpow2.f32 %v294_v61  ;;  %v290_v63 = vsub.f32 %v261_v41, %v284_v62  ;;  %v228_v41 = vpop.f32.mrb[10].mxu0 }
 0x11b   :  { %v3918_v44 = vpop.f32.mrb[11].mxu0 }
 0x11c   :  { %v296_v25 = vmul.f32 1.442695, %v290_v63  ;;  %v234_v48 = vpop.f32.mrb[12].mxu0 }
 0x11d   :  { %v287_v26 = vpop.xlane.xlu1 %286  ;;  %v3924_v51 = vpop.f32.mrb[13].mxu0 }
 0x11e   :  { %3170 = vpow2.f32 %v296_v25  ;;  %v291_v27 = vsub.f32 %v262_v43, %v287_v26  ;;  %v417_v43 = vpack.c.bf16 %v228_v41, %v224_v39  ;;  %v238_v54 = vpop.f32.mrb[14].mxu0 }
 0x11f   :  { %v418_v56 = vpack.c.bf16 %v238_v54, %v234_v48  ;;  %v3927_v57 = vpop.f32.mrb[15].mxu0 }
 0x120   :  { %v3167_v28 = vpop.eup %3166  ;;  %v298_v29 = vmul.f32 1.442695, %v291_v27  ;;  %2892 = vmatprep.subr.bf16.mxu0 %v417_v43 }
 0x121   :  { %v300_v30 = vsel %vm275_vm0, %v3167_v28, 0.0  ;;  %2893 = vmatpush3.bf16.msra.mxu0 %v417_v43 }
 0x122   :  { %3172 = vpow2.f32 %v298_v29  ;;  %301 = vadd.xlane.f32.xlu1 %v300_v30  ;;  %2894 = vmatprep.subr.bf16.mxu0 %v418_v56 }
 0x123   :  { %3174 = vpow2.f32 %v355_v58 }
 0x124   :  { %v3169_v31 = vpop.eup %3168 }
 0x125   :  { %v303_v32 = vsel %vm275_vm0, %v3169_v31, 0.0  ;;  %2895 = vmatpush3.bf16.msra.mxu0 %v418_v56 }
 0x126   :  { %304 = vadd.xlane.f32.xlu1 %v303_v32 }
 0x128   :  { %v3905_v33 = vpop.eup %3170 }
 0x129   :  { %v306_v34 = vsel %vm275_vm0, %v3905_v33, 0.0 }
 0x12a   :  { %307 = vadd.xlane.f32.xlu1 %v306_v34 }
 0x12c   :  { %v3173_v35 = vpop.eup %3172 }
 0x12d   :  { %v309_v36 = vsel %vm275_vm0, %v3173_v35, 0.0  ;;  %v3933_v61 = vpop.eup %3174 }
 0x12e   :  { %310 = vadd.xlane.f32.xlu1 %v309_v36  ;;  %v371_v0 = vsel %vm322_vm1, %v3933_v61, 0.0 }
 0x132   :  { %327 = vmax.xlane.f32.xlu1 %v326_v37 }
 0x136   :  { %330 = vmax.xlane.f32.xlu1 %v329_v38 }
 0x13a   :  { %333 = vmax.xlane.f32.xlu1 %v332_v42 }
 0x13e   :  { %336 = vmax.xlane.f32.xlu1 %v335_v45 }
 0x142   :  { %339 = vmax.xlane.f32.xlu1 %v338_v46 }
 0x146   :  { %342 = vmax.xlane.f32.xlu1 %v341_v59  ;;  %v3958_v59 = vld [vmem:[%s4990_s6] ss:$0 sm:$0xff] }
 0x14a   :  { %345 = vmax.xlane.f32.xlu1 %v344_v60 }
 0x14e   :  { %372 = vadd.xlane.f32.xlu1 %v371_v0 }
 0x1af   :  { %v302_v62 = vpop.xlane.xlu1 %301 }
 0x1b0   :  { %3176 = vrcp.f32 %v302_v62 }
 0x1b3   :  { %v305_v63 = vpop.xlane.xlu1 %304 }
 0x1b4   :  { %3178 = vrcp.f32 %v305_v63 }
 0x1b7   :  { %v308_v25 = vpop.xlane.xlu1 %307 }
 0x1b8   :  { %3180 = vrcp.f32 %v308_v25 }
 0x1ba   :  { %v3177_v27 = vpop.eup %3176 }
 0x1bb   :  { %v311_v26 = vpop.xlane.xlu1 %310  ;;  %v316_v32 = vmul.f32 %v3177_v27, %v3167_v28 }
 0x1bc   :  { %3182 = vrcp.f32 %v311_v26 }
 0x1be   :  { %v3179_v29 = vpop.eup %3178 }
 0x1bf   :  { %v328_v30 = vpop.xlane.xlu1 %327  ;;  %v317_v34 = vmul.f32 %v3179_v29, %v3169_v31 }
 0x1c0   :  { %v348_v36 = vsub.f32 %v3726_v1, %v328_v30  ;;  %v833_v30 = vadd.f32 %v3958_v59, %v3897_v50 }
 0x1c1   :  { %v320_v37 = vpack.c.bf16 %v317_v34, %v316_v32 }
 0x1c2   :  { %v357_v38 = vmul.f32 1.442695, %v348_v36  ;;  %v3181_v41 = vpop.eup %3180 }
 0x1c3   :  { %v331_v39 = vpop.xlane.xlu1 %330  ;;  %2896 = vmatprep.mubr.msk.bf16.mxu0 %vm275_vm0, %v320_v37  ;;  %v318_v46 = vmul.f32 %v3181_v41, %v3905_v33 }
 0x1c4   :  { %3184 = vpow2.f32 %v357_v38  ;;  %v349_v42 = vsub.f32 %v3731_v2, %v331_v39  ;;  %v3987_v38 = vld [vmem:[%s4991_s7] ss:$0 sm:$0xff] }
 0x1c6   :  { %v3183_v43 = vpop.eup %3182  ;;  %v359_v45 = vmul.f32 1.442695, %v349_v42 }
 0x1c7   :  { %v319_v48 = vmul.f32 %v3183_v43, %v3173_v35  ;;  %v334_v49 = vpop.xlane.xlu1 %333 }
 0x1c8   :  { %3186 = vpow2.f32 %v359_v45  ;;  %v350_v28 = vsub.f32 %v3738_v3, %v334_v49  ;;  %v4011_v49 = vld [vmem:[%s4987_s3 + $0x10] sm:$0xff]  }
 0x1c9   :  { %v3942_v31 = vpack.c.bf16 %v319_v48, %v318_v46  ;;  %v3998_v46 = vld [vmem:[%s4987_s3] sm:$0xff]   ;;  %v4003_v48 = vld [vmem:[%s4987_s3 + $0x8] sm:$0xff]  }
 0x1ca   :  { %v361_v1 = vmul.f32 1.442695, %v350_v28  ;;  %2900 = vmatprep.subr.bf16.mxu1 %v3998_v46  ;;  %v4018_v28 = vld [vmem:[%s4987_s3 + $0x18] sm:$0xff]  }
 0x1cb   :  { %v337_v53 = vpop.xlane.xlu1 %336  ;;  %2897 = vmatmul.mubr.msk.bf16.vlgmr.msra.gmra.mrb[16].mxu0 %vm275_vm0, %v3942_v31  ;;  %2901 = vmatpush3.bf16.msra.mxu1 %v3998_v46 }
 0x1cc   :  { %3188 = vpow2.f32 %v361_v1  ;;  %v351_v54 = vsub.f32 %v3744_v4, %v337_v53  ;;  %2940 = vmatprep.mubr.msk.bf16.mxu0 %vm275_vm0, %v320_v37  ;;  %2902 = vmatprep.subr.bf16.mxu1 %v4003_v48  ;;  %v4025_v1 = vld [vmem:[%s4987_s3 + $0x20] sm:$0xff]   ;;  %v4032_v53 = vld [vmem:[%s4987_s3 + $0x28] sm:$0xff]  }
 0x1ce   :  { %v3948_v2 = vpop.eup %3184  ;;  %v363_v33 = vmul.f32 1.442695, %v351_v54  ;;  %v4040_v54 = vld [vmem:[%s4987_s3 + $0x30] sm:$0xff]  }
 0x1cf   :  { %v340_v35 = vpop.xlane.xlu1 %339  ;;  %v374_v56 = vsel %vm322_vm1, %v3948_v2, 0.0  ;;  %2903 = vmatpush3.bf16.msra.mxu1 %v4003_v48 }
 0x1d0   :  { %3190 = vpow2.f32 %v363_v33  ;;  %v352_v3 = vsub.f32 %v3766_v8, %v340_v35  ;;  %375 = vadd.xlane.f32.xlu1 %v374_v56  ;;  %v832_v8 = vadd.f32 %v3958_v59, %v3895_v47  ;;  %2904 = vmatprep.subr.bf16.mxu1 %v4011_v49  ;;  %v4047_v33 = vld [vmem:[%s4987_s3 + $0x38] sm:$0xff]  }
 0x1d2   :  { %v3953_v58 = vpop.eup %3186  ;;  %v365_v4 = vmul.f32 1.442695, %v352_v3 }
 0x1d3   :  { %v343_v60 = vpop.xlane.xlu1 %342  ;;  %v377_v0 = vsel %vm322_vm1, %v3953_v58, 0.0  ;;  %2905 = vmatpush3.bf16.msra.mxu1 %v4011_v49 }
 0x1d4   :  { %3192 = vpow2.f32 %v365_v4  ;;  %v353_v62 = vsub.f32 %v3785_v12, %v343_v60  ;;  %378 = vadd.xlane.f32.xlu1 %v377_v0  ;;  %2906 = vmatprep.subr.bf16.mxu1 %v4018_v28 }
 0x1d6   :  { %v3965_v63 = vpop.eup %3188  ;;  %v367_v25 = vmul.f32 1.442695, %v353_v62 }
 0x1d7   :  { %v346_v26 = vpop.xlane.xlu1 %345  ;;  %v380_v27 = vsel %vm322_vm1, %v3965_v63, 0.0  ;;  %2907 = vmatpush3.bf16.msra.mxu1 %v4018_v28 }
 0x1d8   :  { %3194 = vpow2.f32 %v367_v25  ;;  %v354_v29 = vsub.f32 %v3803_v15, %v346_v26  ;;  %381 = vadd.xlane.f32.xlu1 %v380_v27  ;;  %2908 = vmatprep.subr.bf16.mxu1 %v4025_v1 }
 0x1d9   :  { %3196 = vtanh.f32 %v832_v8 }
 0x1da   :  { %v3972_v12 = vpop.eup %3190  ;;  %v369_v32 = vmul.f32 1.442695, %v354_v29 }
 0x1db   :  { %v383_v47 = vsel %vm322_vm1, %v3972_v12, 0.0  ;;  %2909 = vmatpush3.bf16.msra.mxu1 %v4025_v1  ;;  %v373_v35 = vpop.xlane.xlu1 %372 }
 0x1dc   :  { %3198 = vpow2.f32 %v369_v32  ;;  %384 = vadd.xlane.f32.xlu1 %v383_v47  ;;  %2910 = vmatprep.subr.bf16.mxu1 %v4032_v53 }
 0x1dd   :  { %3200 = vtanh.f32 %v833_v30 }
 0x1de   :  { %v3976_v34 = vpop.eup %3192  ;;  %3202 = vrcp.f32 %v373_v35 }
 0x1df   :  { %v386_v36 = vsel %vm322_vm1, %v3976_v34, 0.0  ;;  %2911 = vmatpush3.bf16.msra.mxu1 %v4032_v53 }
 0x1e0   :  { %387 = vadd.xlane.f32.xlu0 %v386_v36  ;;  %2912 = vmatprep.subr.bf16.mxu1 %v4040_v54 }
 0x1e2   :  { %v3980_v15 = vpop.eup %3194 }
 0x1e3   :  { %v3197_v37 = vpop.eup %3196  ;;  %v389_v50 = vsel %vm322_vm1, %v3980_v15, 0.0  ;;  %2913 = vmatpush3.bf16.msra.mxu1 %v4040_v54 }
 0x1e4   :  { %390 = vadd.xlane.f32.xlu1 %v389_v50  ;;  %v870_v41 = vmul.f32 %v3197_v37, %v3987_v38  ;;  %2914 = vmatprep.subr.bf16.mxu1 %v4047_v33 }
 0x1e6   :  { %v3989_v39 = vpop.eup %3198 }
 0x1e7   :  { %v3201_v42 = vpop.eup %3200  ;;  %v392_v43 = vsel %vm322_vm1, %v3989_v39, 0.0  ;;  %2915 = vmatpush3.bf16.msra.mxu1 %v4047_v33 }
 0x1e8   :  { %393 = vadd.xlane.f32.xlu0 %v392_v43  ;;  %886 = vadd.xlane.f32.xlu1 %v870_v41  ;;  %v871_v45 = vmul.f32 %v3201_v42, %v3987_v38  ;;  %v3203_v3 = vpop.eup %3202 }
 0x1e9   :  { %v403_v8 = vmul.f32 %v3203_v3, %v3933_v61 }
 0x1ec   :  { %888 = vadd.xlane.f32.xlu0 %v871_v45 }
 0x25d   :  { %v376_v56 = vpop.xlane.xlu1 %375 }
 0x25e   :  { %3204 = vrcp.f32 %v376_v56 }
 0x261   :  { %v379_v50 = vpop.xlane.xlu1 %378 }
 0x262   :  { %3206 = vrcp.f32 %v379_v50 }
 0x265   :  { %v382_v41 = vpop.xlane.xlu1 %381 }
 0x266   :  { %3208 = vrcp.f32 %v382_v41 }
 0x268   :  { %v3205_v4 = vpop.eup %3204 }
 0x269   :  { %v404_v25 = vmul.f32 %v3205_v4, %v3948_v2  ;;  %v385_v42 = vpop.xlane.xlu1 %384 }
 0x26a   :  { %3210 = vrcp.f32 %v385_v42 }
 0x26b   :  { %v411_v37 = vpack.c.bf16 %v404_v25, %v403_v8 }
 0x26c   :  { %v3207_v3 = vpop.eup %3206 }
 0x26d   :  { %v388_v61 = vpop.xlane.xlu0 %387 }
 0x26e   :  { %3212 = vrcp.f32 %v388_v61 }
 0x271   :  { %v391_v43 = vpop.xlane.xlu1 %390 }
 0x272   :  { %3214 = vrcp.f32 %v391_v43 }
 0x275   :  { %v394_v35 = vpop.xlane.xlu0 %393 }
 0x276   :  { %3216 = vrcp.f32 %v394_v35  ;;  %v4088_v35 = vld [vmem:[%s4989_s5] ss:$0 sm:$0xff] }
 0x29e   :  { %v2898_v60 = vpop.f32.mrb[16].mxu0 }
 0x29f   :  { %v459_v0 = vpop.f32.mrb[17].mxu0  ;;  %v476_v26 = vmax.f32 %v2898_v60, 0.0 }
 0x2a0   :  { %v2899_v62 = vpop.f32.mrb[18].mxu0  ;;  %v474_v30 = vmax.f32 %v459_v0, 0.0  ;;  %v3209_v0 = vpop.eup %3208 }
 0x2a1   :  { %v477_v27 = vmax.f32 %v2899_v62, 0.0  ;;  %v462_v29 = vpop.f32.mrb[19].mxu0  ;;  %v3211_v8 = vpop.eup %3210 }
 0x2a2   :  { %v475_v32 = vmax.f32 %v462_v29, 0.0  ;;  %v3213_v25 = vpop.eup %3212  ;;  %v407_v29 = vmul.f32 %v3211_v8, %v3972_v12 }
 0x2a3   :  { %v479_v47 = vpack.c.bf16 %v477_v27, %v476_v26  ;;  %v405_v26 = vmul.f32 %v3207_v3, %v3953_v58  ;;  %v406_v27 = vmul.f32 %v3209_v0, %v3965_v63 }
 0x2a4   :  { %v478_v36 = vpack.c.bf16 %v475_v32, %v474_v30  ;;  %v408_v30 = vmul.f32 %v3213_v25, %v3976_v34  ;;  %v3215_v32 = vpop.eup %3214 }
 0x2a5   :  { %v409_v58 = vmul.f32 %v3215_v32, %v3980_v15  ;;  %v4082_v15 = vld [vmem:[%s4988_s4] ss:$0 sm:$0xff] }
 0x2a6   :  { %2916 = vmatprep.mubr.bf16.mxu1 %v478_v36  ;;  %v3217_v36 = vpop.eup %3216 }
 0x2a7   :  { %2917 = vmatmul.mubr.bf16.vlgmr.msra.gmra.mrb[0].mxu1 %v479_v47  ;;  %v412_v47 = vpack.c.bf16 %v406_v27, %v405_v26  ;;  %v410_v63 = vmul.f32 %v3217_v36, %v3989_v39 }
 0x2a8   :  { %2924 = vmatprep.mubr.msk.bf16.mxu1 %vm322_vm1, %v411_v37  ;;  %v413_v37 = vpack.c.bf16 %v408_v30, %v407_v29 }
 0x2a9   :  { %v414_v12 = vpack.c.bf16 %v410_v63, %v409_v58 }
 0x37a   :  { %v2918_v2 = vpop.f32.mrb[0].mxu1 }
 0x37b   :  { %v562_v45 = vpop.f32.mrb[1].mxu1 }
 0x37c   :  { %v2919_v56 = vpop.f32.mrb[2].mxu1 }
 0x37d   :  { %v578_v4 = vpack.c.bf16 %v2919_v56, %v2918_v2  ;;  %v565_v60 = vpop.f32.mrb[3].mxu1 }
 0x37e   :  { %v577_v62 = vpack.c.bf16 %v565_v60, %v562_v45 }
 0x380   :  { %2920 = vmatprep.subr.bf16.mxu1 %v577_v62 }
 0x381   :  { %2921 = vmatpush3.bf16.msra.mxu1 %v577_v62 }
 0x382   :  { %2922 = vmatprep.subr.bf16.mxu1 %v578_v4 }
 0x385   :  { %2923 = vmatpush3.bf16.msra.mxu1 %v578_v4 }
 0x386   :  { %2944 = vmatprep.subr.bf16.mxu1 %v3749_v5 }
 0x388   :  { %2925 = vmatmul.mubr.msk.bf16.vlgmr.msra.gmra.mrb[4].mxu1 %vm322_vm1, %v412_v47 }
 0x389   :  { %2928 = vmatprep.mubr.msk.bf16.mxu1 %vm322_vm1, %v413_v37  ;;  %2945 = vmatpush3.bf16.msra.mxu1 %v3749_v5 }
 0x38a   :  { %2946 = vmatprep.subr.bf16.mxu1 %v3759_v7 }
 0x38d   :  { %2947 = vmatpush3.bf16.msra.mxu1 %v3759_v7 }
 0x38e   :  { %2948 = vmatprep.subr.bf16.mxu1 %v3779_v11 }
 0x390   :  { %2929 = vmatmul.mubr.msk.bf16.gmra.mrb[8].mxu1 %vm322_vm1, %v414_v12 }
 0x391   :  { %2949 = vmatpush3.bf16.msra.mxu1 %v3779_v11 }
 0x392   :  { %2950 = vmatprep.subr.bf16.mxu1 %v3797_v14 }
 0x395   :  { %2951 = vmatpush3.bf16.msra.mxu1 %v3797_v14 }
 0x396   :  { %2952 = vmatprep.subr.bf16.mxu1 %v3815_v17 }
 0x399   :  { %2953 = vmatpush3.bf16.msra.mxu1 %v3815_v17 }
 0x39a   :  { %2954 = vmatprep.subr.bf16.mxu1 %v3828_v19 }
 0x39d   :  { %2955 = vmatpush3.bf16.msra.mxu1 %v3828_v19 }
 0x39e   :  { %2956 = vmatprep.subr.bf16.mxu1 %v3840_v21 }
 0x3a1   :  { %2957 = vmatpush3.bf16.msra.mxu1 %v3840_v21 }
 0x3a2   :  { %2958 = vmatprep.subr.bf16.mxu1 %v3852_v23 }
 0x3a5   :  { %2959 = vmatpush3.bf16.msra.mxu1 %v3852_v23 }
 0x45b   :  { %v2926_v34 = vpop.f32.mrb[4].mxu1 }
 0x45c   :  { %v658_v39 = vmax.f32 %v2926_v34, 0.0  ;;  %v625_v50 = vpop.f32.mrb[5].mxu1 }
 0x45d   :  { %v656_v41 = vmax.f32 %v625_v50, 0.0  ;;  %v2927_v42 = vpop.f32.mrb[6].mxu1 }
 0x45e   :  { %v659_v61 = vmax.f32 %v2927_v42, 0.0  ;;  %v628_v2 = vpop.f32.mrb[7].mxu1  ;;  %v729_v56 = vmul.f32 %v4082_v15, %v658_v39 }
 0x45f   :  { %v727_v43 = vmul.f32 %v4082_v15, %v656_v41  ;;  %v657_v45 = vmax.f32 %v628_v2, 0.0 }
 0x460   :  { %v665_v3 = vpack.c.bf16 %v659_v61, %v658_v39  ;;  %v730_v4 = vmul.f32 %v4082_v15, %v659_v61  ;;  %v4103_v27 = vadd.f32 %v4088_v35, %v729_v56 }
 0x461   :  { %v664_v60 = vpack.c.bf16 %v657_v45, %v656_v41  ;;  %v728_v0 = vmul.f32 %v4082_v15, %v657_v45  ;;  %v4097_v8 = vadd.f32 %v4088_v35, %v727_v43 }
 0x462   :  { %v4094_v62 = vadd.f32 %v4088_v35, %v730_v4 }
 0x463   :  { %v4100_v25 = vadd.f32 %v4088_v35, %v728_v0  ;;  %v2930_v26 = vpop.f32.mrb[8].mxu1  ;;  %2932 = vmatprep.subr.bf16.mxu0 %v664_v60 }
 0x464   :  { %v662_v29 = vmax.f32 %v2930_v26, 0.0  ;;  %v641_v30 = vpop.f32.mrb[9].mxu1  ;;  %2933 = vmatpush3.bf16.msra.mxu0 %v664_v60  ;;  %v758_v37 = vpack.c.bf16 %v4094_v62, %v4103_v27 }
 0x465   :  { %v660_v32 = vmax.f32 %v641_v30, 0.0  ;;  %v2931_v47 = vpop.f32.mrb[10].mxu1  ;;  %2934 = vmatprep.subr.bf16.mxu0 %v665_v3  ;;  %v757_v36 = vpack.c.bf16 %v4100_v25, %v4097_v8 }
 0x466   :  { %v663_v58 = vmax.f32 %v2931_v47, 0.0  ;;  %v644_v63 = vpop.f32.mrb[11].mxu1  ;;  %v733_v39 = vmul.f32 %v4082_v15, %v662_v29 }
 0x467   :  { %v731_v12 = vmul.f32 %v4082_v15, %v660_v32  ;;  %v661_v34 = vmax.f32 %v644_v63, 0.0  ;;  %2960 = vmatprep.mubr.bf16.mxu1 %v757_v36 }
 0x468   :  { %v667_v50 = vpack.c.bf16 %v663_v58, %v662_v29  ;;  %v734_v41 = vmul.f32 %v4082_v15, %v663_v58  ;;  %2935 = vmatpush3.bf16.msra.mxu0 %v665_v3  ;;  %2961 = vmatmul.mubr.bf16.vlgmr.msra.gmra.mrb[12].mxu1 %v758_v37  ;;  %v4123_v56 = vadd.f32 %v4088_v35, %v733_v39 }
 0x469   :  { %v666_v42 = vpack.c.bf16 %v661_v34, %v660_v32  ;;  %v732_v61 = vmul.f32 %v4082_v15, %v661_v34  ;;  %v4117_v43 = vadd.f32 %v4088_v35, %v731_v12 }
 0x46a   :  { %v4114_v2 = vadd.f32 %v4088_v35, %v734_v41 }
 0x46b   :  { %v4120_v45 = vadd.f32 %v4088_v35, %v732_v61  ;;  %2936 = vmatprep.subr.bf16.mxu0 %v666_v42  ;;  %v838_v61 = vadd.f32 %v3958_v59, %v3924_v51 }
 0x46c   :  { %2937 = vmatpush3.bf16.msra.mxu0 %v666_v42  ;;  %v760_v4 = vpack.c.bf16 %v4114_v2, %v4123_v56 }
 0x46d   :  { %2938 = vmatprep.subr.bf16.mxu0 %v667_v50  ;;  %v759_v3 = vpack.c.bf16 %v4120_v45, %v4117_v43 }
 0x46f   :  { %2964 = vmatprep.mubr.bf16.mxu1 %v759_v3 }
 0x470   :  { %2939 = vmatpush3.bf16.msra.mxu0 %v667_v50  ;;  %2965 = vmatmul.mubr.bf16.gmra.mrb[16].mxu1 %v760_v4 }
 0x471   :  { %1055 = vmatprep.subr.bf16.mxu0 %v3749_v5 }
 0x473   :  { %2941 = vmatmul.mubr.msk.bf16.vlgmr.msra.gmra.mrb[20].mxu0 %vm275_vm0, %v3942_v31 }
 0x474   :  { %1056 = vmatpush1.bf16.msra.mxu0 %v3754_v6  ;;  %1087 = vmatprep.mubr.bf16.mxu0 %v3662_v10  ;;  %v834_v6 = vadd.f32 %v3958_v59, %v3899_v52  ;;  %v837_v52 = vadd.f32 %v3958_v59, %v3918_v44 }
 0x475   :  { %1057 = vmatprep.subr.bf16.mxu0 %v3759_v7 }
 0x478   :  { %1058 = vmatpush1.bf16.msra.mxu0 %v3772_v9 }
 0x479   :  { %1059 = vmatprep.subr.bf16.mxu0 %v3779_v11 }
 0x47c   :  { %1060 = vmatpush1.bf16.msra.mxu0 %v3791_v13 }
 0x47d   :  { %1061 = vmatprep.subr.bf16.mxu0 %v3797_v14  ;;  %v835_v14 = vadd.f32 %v3958_v59, %v3901_v55 }
 0x480   :  { %1062 = vmatpush1.bf16.msra.mxu0 %v3809_v16 }
 0x481   :  { %1063 = vmatprep.subr.bf16.mxu0 %v3815_v17 }
 0x484   :  { %1064 = vmatpush1.bf16.msra.mxu0 %v3822_v18 }
 0x485   :  { %1065 = vmatprep.subr.bf16.mxu0 %v3828_v19 }
 0x488   :  { %1066 = vmatpush1.bf16.msra.mxu0 %v3834_v20 }
 0x489   :  { %1067 = vmatprep.subr.bf16.mxu0 %v3840_v21  ;;  %v836_v21 = vadd.f32 %v3958_v59, %v3914_v40 }
 0x48c   :  { %1068 = vmatpush1.bf16.msra.mxu0 %v3846_v22 }
 0x48d   :  { %1069 = vmatprep.subr.bf16.mxu0 %v3852_v23 }
 0x490   :  { %1070 = vmatpush1.bf16.msra.mxu0 %v3858_v24 }
 0x491   :  { %2980 = vmatprep.subr.bf16.mxu0 %v3998_v46 }
 0x53b   :  { %v2962_v5 = vpop.f32.mrb[12].mxu1 }
 0x53c   :  { %v795_v7 = vpop.f32.mrb[13].mxu1  ;;  %v842_v17 = vadd.f32 %v2962_v5, %v3958_v59 }
 0x53d   :  { %v840_v9 = vadd.f32 %v3958_v59, %v795_v7  ;;  %v2963_v11 = vpop.f32.mrb[14].mxu1 }
 0x53e   :  { %v798_v13 = vpop.f32.mrb[15].mxu1  ;;  %v843_v18 = vadd.f32 %v2963_v11, %v3958_v59 }
 0x53f   :  { %3218 = vtanh.f32 %v840_v9  ;;  %v841_v16 = vadd.f32 %v3958_v59, %v798_v13 }
 0x540   :  { %3220 = vtanh.f32 %v834_v6 }
 0x541   :  { %3222 = vtanh.f32 %v841_v16 }
 0x542   :  { %3224 = vtanh.f32 %v835_v14 }
 0x543   :  { %v2966_v19 = vpop.f32.mrb[16].mxu1  ;;  %3226 = vtanh.f32 %v842_v17 }
 0x544   :  { %v811_v20 = vpop.f32.mrb[17].mxu1  ;;  %3228 = vtanh.f32 %v843_v18  ;;  %v846_v9 = vadd.f32 %v2966_v19, %v3958_v59 }
 0x545   :  { %v2967_v22 = vpop.f32.mrb[18].mxu1  ;;  %3230 = vtanh.f32 %v836_v21  ;;  %v844_v29 = vadd.f32 %v3958_v59, %v811_v20 }
 0x546   :  { %v2942_v23 = vpop.f32.mrb[20].mxu0  ;;  %v814_v24 = vpop.f32.mrb[19].mxu1  ;;  %3232 = vtanh.f32 %v837_v52  ;;  %v847_v13 = vadd.f32 %v2967_v22, %v3958_v59 }
 0x547   :  { %v719_v55 = vmax.f32 %v2942_v23, 0.0  ;;  %v702_v31 = vpop.f32.mrb[21].mxu0  ;;  %v845_v12 = vadd.f32 %v3958_v59, %v814_v24  ;;  %3234 = vtanh.f32 %v844_v29  ;;  %v4206_v29 = vld [vmem:[%s4985_s1 + $0x50] sm:$0xff] }
 0x548   :  { %v717_v60 = vmax.f32 %v702_v31, 0.0  ;;  %v2943_v0 = vpop.f32.mrb[22].mxu0 }
 0x549   :  { %v3219_v26 = vpop.eup %3218  ;;  %v751_v30 = vmul.f32 %v4082_v15, %v719_v55  ;;  %v720_v32 = vmax.f32 %v2943_v0, 0.0  ;;  %v705_v40 = vpop.f32.mrb[23].mxu0  ;;  %3236 = vtanh.f32 %v845_v12  ;;  %v4194_v0 = vld [vmem:[%s4985_s1 + $0x40] sm:$0xff] }
 0x54a   :  { %v3221_v47 = vpop.eup %3220  ;;  %v749_v36 = vmul.f32 %v4082_v15, %v717_v60  ;;  %v718_v37 = vmax.f32 %v705_v40, 0.0  ;;  %v878_v58 = vmul.f32 %v3219_v26, %v3987_v38  ;;  %3238 = vtanh.f32 %v838_v61  ;;  %v4200_v26 = vld [vmem:[%s4985_s1 + $0x48] sm:$0xff]  ;;  %v4230_v40 = vld [vmem:[%s4985_s1 + $0x70] sm:$0xff] }
 0x54b   :  { %v3223_v44 = vpop.eup %3222  ;;  %v755_v63 = vadd.f32 %v4088_v35, %v751_v30  ;;  %v752_v34 = vmul.f32 %v4082_v15, %v720_v32  ;;  %v872_v5 = vmul.f32 %v3221_v47, %v3987_v38  ;;  %v4218_v30 = vld [vmem:[%s4985_s1 + $0x60] sm:$0xff]  ;;  %v4224_v32 = vld [vmem:[%s4985_s1 + $0x68] sm:$0xff]  ;;  %v4236_v47 = vld [vmem:[%s4985_s1 + $0x78] sm:$0xff] }
 0x54c   :  { %v753_v39 = vadd.f32 %v4088_v35, %v749_v36  ;;  %v750_v50 = vmul.f32 %v4082_v15, %v718_v37  ;;  %902 = vadd.xlane.f32.xlu1 %v878_v58  ;;  %v879_v41 = vmul.f32 %v3223_v44, %v3987_v38  ;;  %v3225_v42 = vpop.eup %3224  ;;  %v839_v15 = vadd.f32 %v3958_v59, %v3927_v57  ;;  %v887_v36 = vpop.xlane.xlu1 %886 }
 0x54d   :  { %1040 = vst [vmem:[#allocation4 + $0x10] sm:$0xff] %v755_v63  ;;  %v756_v3 = vadd.f32 %v4088_v35, %v752_v34  ;;  %v3227_v6 = vpop.eup %3226  ;;  %v873_v51 = vmul.f32 %v3225_v42, %v3987_v38  ;;  %v889_v37 = vpop.xlane.xlu0 %888 }
 0x54e   :  { %1038 = vst [vmem:[#allocation4] sm:$0xff] %v753_v39  ;;  %v754_v4 = vadd.f32 %v4088_v35, %v750_v50  ;;  %904 = vadd.xlane.f32.xlu0 %v879_v41  ;;  %v3229_v7 = vpop.eup %3228  ;;  %v880_v35 = vmul.f32 %v3227_v6, %v3987_v38  ;;  %3240 = vtanh.f32 %v839_v15 }
 0x54f   :  { %1041 = vst [vmem:[#allocation4 + $0x18] sm:$0xff] %v756_v3  ;;  %v3231_v11 = vpop.eup %3230  ;;  %v881_v57 = vmul.f32 %v3229_v7, %v3987_v38  ;;  %3242 = vtanh.f32 %v846_v9 }
 0x550   :  { %1039 = vst [vmem:[#allocation4 + $0x8] sm:$0xff] %v754_v4  ;;  %890 = vadd.xlane.f32.xlu1 %v872_v5  ;;  %v3233_v14 = vpop.eup %3232  ;;  %v874_v16 = vmul.f32 %v3231_v11, %v3987_v38  ;;  %3244 = vtanh.f32 %v847_v13 }
 0x551   :  { %v3235_v17 = vpop.eup %3234  ;;  %v875_v18 = vmul.f32 %v3233_v14, %v3987_v38 }
 0x552   :  { %892 = vadd.xlane.f32.xlu0 %v873_v51  ;;  %v882_v20 = vmul.f32 %v3235_v17, %v3987_v38 }
 0x553   :  { %v3237_v19 = vpop.eup %3236 }
 0x554   :  { %906 = vadd.xlane.f32.xlu1 %v880_v35  ;;  %v3239_v21 = vpop.eup %3238  ;;  %v883_v59 = vmul.f32 %v3237_v19, %v3987_v38 }
 0x555   :  { %v876_v23 = vmul.f32 %v3239_v21, %v3987_v38 }
 0x556   :  { %908 = vadd.xlane.f32.xlu0 %v881_v57 }
 0x558   :  { %894 = vadd.xlane.f32.xlu1 %v874_v16  ;;  %v3241_v22 = vpop.eup %3240 }
 0x559   :  { %v3243_v24 = vpop.eup %3242  ;;  %v877_v52 = vmul.f32 %v3241_v22, %v3987_v38 }
 0x55a   :  { %896 = vadd.xlane.f32.xlu0 %v875_v18  ;;  %v3245_v55 = vpop.eup %3244  ;;  %v884_v31 = vmul.f32 %v3243_v24, %v3987_v38 }
 0x55b   :  { %v885_v60 = vmul.f32 %v3245_v55, %v3987_v38  ;;  %v4212_v38 = vld [vmem:[%s4985_s1 + $0x58] sm:$0xff] }
 0x55c   :  { %910 = vadd.xlane.f32.xlu1 %v882_v20 }
 0x55e   :  { %912 = vadd.xlane.f32.xlu0 %v883_v59 }
 0x560   :  { %898 = vadd.xlane.f32.xlu1 %v876_v23 }
 0x562   :  { %900 = vadd.xlane.f32.xlu0 %v877_v52 }
 0x564   :  { %914 = vadd.xlane.f32.xlu1 %v884_v31 }
 0x566   :  { %916 = vadd.xlane.f32.xlu0 %v885_v60 }
 0x597   :  { %1128 = vxpose.xlu1.b32.start [1/8] (short) (narrow) %v4194_v0, 32 }
 0x59b   :  { %1129 = vxpose.xlu1.b32.cont [2/8] (short) (narrow) %v4200_v26, 32 }
 0x59f   :  { %1130 = vxpose.xlu1.b32.cont [3/8] (short) (narrow) %v4206_v29, 32 }
 0x5a3   :  { %1131 = vxpose.xlu1.b32.cont [4/8] (short) (narrow) %v4212_v38, 32 }
 0x5a7   :  { %1132 = vxpose.xlu1.b32.cont [5/8] (short) (narrow) %v4218_v30, 32 }
 0x5ab   :  { %1133 = vxpose.xlu1.b32.cont [6/8] (short) (narrow) %v4224_v32, 32 }
 0x5af   :  { %1134 = vxpose.xlu1.b32.cont [7/8] (short) (narrow) %v4230_v40, 32 }
 0x5b3   :  { %1135 = vxpose.xlu1.b32.end [8/8] (short) (narrow) %v4236_v47, 32 }
 0x5d9   :  { %v903_v58 = vpop.xlane.xlu1 %902 }
 0x5da   :  { %v918_v44 = vmax.f32 %v887_v36, %v903_v58 }
 0x5db   :  { %v905_v63 = vpop.xlane.xlu0 %904 }
 0x5dc   :  { %v926_v12 = vsub.f32 %v887_v36, %v918_v44  ;;  %v950_v34 = vsub.f32 %v903_v58, %v918_v44  ;;  %v919_v39 = vmax.f32 %v889_v37, %v905_v63 }
 0x5dd   :  { %v891_v50 = vpop.xlane.xlu1 %890 }
 0x5de   :  { %v934_v41 = vmul.f32 1.442695, %v926_v12  ;;  %v958_v42 = vmul.f32 1.442695, %v950_v34  ;;  %v927_v61 = vsub.f32 %v889_v37, %v919_v39  ;;  %v951_v3 = vsub.f32 %v905_v63, %v919_v39 }
 0x5df   :  { %v893_v4 = vpop.xlane.xlu0 %892 }
 0x5e0   :  { %3246 = vpow2.f32 %v934_v41  ;;  %v936_v5 = vmul.f32 1.442695, %v927_v61  ;;  %v960_v6 = vmul.f32 1.442695, %v951_v3 }
 0x5e1   :  { %3248 = vpow2.f32 %v958_v42  ;;  %v907_v15 = vpop.xlane.xlu1 %906 }
 0x5e2   :  { %3250 = vpow2.f32 %v936_v5  ;;  %v920_v51 = vmax.f32 %v891_v50, %v907_v15 }
 0x5e3   :  { %3252 = vpow2.f32 %v960_v6  ;;  %v909_v7 = vpop.xlane.xlu0 %908 }
 0x5e4   :  { %v928_v9 = vsub.f32 %v891_v50, %v920_v51  ;;  %v952_v35 = vsub.f32 %v907_v15, %v920_v51  ;;  %v921_v11 = vmax.f32 %v893_v4, %v909_v7 }
 0x5e5   :  { %v895_v13 = vpop.xlane.xlu1 %894 }
 0x5e6   :  { %v938_v57 = vmul.f32 1.442695, %v928_v9  ;;  %v962_v14 = vmul.f32 1.442695, %v952_v35  ;;  %v929_v16 = vsub.f32 %v893_v4, %v921_v11  ;;  %v953_v17 = vsub.f32 %v909_v7, %v921_v11 }
 0x5e7   :  { %v897_v18 = vpop.xlane.xlu0 %896 }
 0x5e8   :  { %3254 = vpow2.f32 %v938_v57  ;;  %v940_v19 = vmul.f32 1.442695, %v929_v16  ;;  %v964_v20 = vmul.f32 1.442695, %v953_v17 }
 0x5e9   :  { %3256 = vpow2.f32 %v962_v14  ;;  %v911_v21 = vpop.xlane.xlu1 %910 }
 0x5ea   :  { %v3247_v59 = vpop.eup %3246  ;;  %3258 = vpow2.f32 %v940_v19  ;;  %v922_v22 = vmax.f32 %v895_v13, %v911_v21 }
 0x5eb   :  { %v3249_v23 = vpop.eup %3248  ;;  %3260 = vpow2.f32 %v964_v20  ;;  %v913_v24 = vpop.xlane.xlu0 %912 }
 0x5ec   :  { %v3251_v52 = vpop.eup %3250  ;;  %v974_v55 = vadd.f32 %v3249_v23, %v3247_v59  ;;  %v930_v31 = vsub.f32 %v895_v13, %v922_v22  ;;  %v954_v60 = vsub.f32 %v911_v21, %v922_v22  ;;  %v923_v36 = vmax.f32 %v897_v18, %v913_v24 }
 0x5ed   :  { %v3253_v37 = vpop.eup %3252  ;;  %v899_v58 = vpop.xlane.xlu1 %898 }
 0x5ee   :  { %3262 = vrcp.f32 %v974_v55  ;;  %v975_v44 = vadd.f32 %v3253_v37, %v3251_v52  ;;  %v942_v63 = vmul.f32 1.442695, %v930_v31  ;;  %v966_v12 = vmul.f32 1.442695, %v954_v60 }
 0x5ef   :  { %v931_v34 = vsub.f32 %v897_v18, %v923_v36  ;;  %v955_v39 = vsub.f32 %v913_v24, %v923_v36  ;;  %v901_v50 = vpop.xlane.xlu0 %900 }
 0x5f0   :  { %3264 = vrcp.f32 %v975_v44  ;;  %v3550_v44 = vld [vmem:[%s4984_s0] sm:$0xff] }
 0x5f1   :  { %3266 = vpow2.f32 %v942_v63  ;;  %v944_v41 = vmul.f32 1.442695, %v931_v34  ;;  %v968_v42 = vmul.f32 1.442695, %v955_v39  ;;  %v915_v61 = vpop.xlane.xlu1 %914  ;;  %v3551_v34 = vld [vmem:[%s4984_s0 + $0x8] sm:$0xff] }
 0x5f2   :  { %v3255_v3 = vpop.eup %3254  ;;  %3268 = vpow2.f32 %v966_v12  ;;  %v924_v4 = vmax.f32 %v899_v58, %v915_v61 }
 0x5f3   :  { %v3257_v5 = vpop.eup %3256  ;;  %3270 = vpow2.f32 %v944_v41  ;;  %v917_v6 = vpop.xlane.xlu0 %916 }
 0x5f4   :  { %v3259_v15 = vpop.eup %3258  ;;  %v976_v51 = vadd.f32 %v3257_v5, %v3255_v3  ;;  %3272 = vpow2.f32 %v968_v42  ;;  %v932_v7 = vsub.f32 %v899_v58, %v924_v4  ;;  %v956_v9 = vsub.f32 %v915_v61, %v924_v4 }
 0x5f5   :  { %v3261_v35 = vpop.eup %3260  ;;  %v925_v11 = vmax.f32 %v901_v50, %v917_v6 }
 0x5f6   :  { %3274 = vrcp.f32 %v976_v51  ;;  %v977_v13 = vadd.f32 %v3261_v35, %v3259_v15  ;;  %v946_v57 = vmul.f32 1.442695, %v932_v7  ;;  %v970_v14 = vmul.f32 1.442695, %v956_v9 }
 0x5f7   :  { %v933_v16 = vsub.f32 %v901_v50, %v925_v11  ;;  %v957_v17 = vsub.f32 %v917_v6, %v925_v11 }
 0x5f8   :  { %v3263_v18 = vpop.eup %3262  ;;  %3276 = vrcp.f32 %v977_v13 }
 0x5f9   :  { %v1006_v19 = vmul.f32 %v3263_v18, %v3249_v23  ;;  %3278 = vpow2.f32 %v946_v57  ;;  %v948_v20 = vmul.f32 1.442695, %v933_v16  ;;  %v972_v21 = vmul.f32 1.442695, %v957_v17 }
 0x5fa   :  { %v3265_v22 = vpop.eup %3264  ;;  %3280 = vpow2.f32 %v970_v14  ;;  %v990_v24 = vmul.f32 %v3263_v18, %v3247_v59 }
 0x5fb   :  { %v3267_v55 = vpop.eup %3266  ;;  %v1007_v31 = vmul.f32 %v3265_v22, %v3253_v37  ;;  %3282 = vpow2.f32 %v948_v20  ;;  %v991_v60 = vmul.f32 %v3265_v22, %v3251_v52  ;;  %v1014_v36 = vmul.f32 %v1006_v19, %v4097_v8 }
 0x5fc   :  { %v3269_v58 = vpop.eup %3268  ;;  %3284 = vpow2.f32 %v972_v21  ;;  %v998_v63 = vmul.f32 %v3550_v44, %v990_v24  ;;  %v3554_v24 = vld [vmem:[%s4984_s0 + $0x20] sm:$0xff] }
 0x5fd   :  { %v3271_v23 = vpop.eup %3270  ;;  %v978_v12 = vadd.f32 %v3269_v58, %v3267_v55  ;;  %v999_v59 = vmul.f32 %v3551_v34, %v991_v60  ;;  %v1015_v37 = vmul.f32 %v1007_v31, %v4100_v25  ;;  %v3552_v25 = vld [vmem:[%s4984_s0 + $0x10] sm:$0xff] }
 0x5fe   :  { %v3273_v39 = vpop.eup %3272  ;;  %v1022_v52 = vadd.f32 %v1014_v36, %v998_v63 }
 0x5ff   :  { %3286 = vrcp.f32 %v978_v12  ;;  %v979_v8 = vadd.f32 %v3273_v39, %v3271_v23  ;;  %v1023_v50 = vadd.f32 %v1015_v37, %v999_v59 }
 0x600   :  { %v3275_v41 = vpop.eup %3274  ;;  %1030 = vst [vmem:[#allocation2] sm:$0xff] %v1022_v52 }
 0x601   :  { %3288 = vrcp.f32 %v979_v8  ;;  %1031 = vst [vmem:[#allocation2 + $0x8] sm:$0xff] %v1023_v50  ;;  %v1051_v42 = vpack.c.bf16 %v1023_v50, %v1022_v52  ;;  %v992_v61 = vmul.f32 %v3275_v41, %v3255_v3  ;;  %v1008_v4 = vmul.f32 %v3275_v41, %v3257_v5  ;;  %v3553_v5 = vld [vmem:[%s4984_s0 + $0x18] sm:$0xff] }
 0x602   :  { %v3277_v6 = vpop.eup %3276 }
 0x603   :  { %v3279_v51 = vpop.eup %3278  ;;  %1088 = vmatmul.mubr.bf16.vlgmr.msra.gmra.mrb[24].mxu0 %v1051_v42  ;;  %v993_v7 = vmul.f32 %v3277_v6, %v3259_v15  ;;  %v1000_v9 = vmul.f32 %v3552_v25, %v992_v61  ;;  %v1009_v11 = vmul.f32 %v3277_v6, %v3261_v35  ;;  %v1016_v13 = vmul.f32 %v1008_v4, %v4103_v27 }
 0x604   :  { %v3281_v57 = vpop.eup %3280  ;;  %1097 = vmatprep.mubr.bf16.mxu0 %v3662_v10  ;;  %2981 = vmatpush3.bf16.msra.mxu0 %v3998_v46 }
 0x605   :  { %v3283_v14 = vpop.eup %3282  ;;  %v980_v3 = vadd.f32 %v3281_v57, %v3279_v51  ;;  %v1001_v15 = vmul.f32 %v3553_v5, %v993_v7  ;;  %v1017_v16 = vmul.f32 %v1009_v11, %v4094_v62  ;;  %v1024_v17 = vadd.f32 %v1016_v13, %v1000_v9  ;;  %2982 = vmatprep.subr.bf16.mxu0 %v4003_v48 }
 0x606   :  { %v3285_v35 = vpop.eup %3284 }
 0x607   :  { %3290 = vrcp.f32 %v980_v3  ;;  %v981_v27 = vadd.f32 %v3285_v35, %v3283_v14  ;;  %v1025_v18 = vadd.f32 %v1017_v16, %v1001_v15  ;;  %1032 = vst [vmem:[#allocation2 + $0x10] sm:$0xff] %v1024_v17 }
 0x608   :  { %2983 = vmatpush3.bf16.msra.mxu0 %v4003_v48 }
 0x609   :  { %v3287_v46 = vpop.eup %3286  ;;  %3292 = vrcp.f32 %v981_v27  ;;  %1033 = vst [vmem:[#allocation2 + $0x18] sm:$0xff] %v1025_v18  ;;  %v1052_v19 = vpack.c.bf16 %v1025_v18, %v1024_v17  ;;  %2984 = vmatprep.subr.bf16.mxu0 %v4011_v49 }
 0x60a   :  { %v994_v20 = vmul.f32 %v3287_v46, %v3267_v55  ;;  %v1010_v21 = vmul.f32 %v3287_v46, %v3269_v58  ;;  %v3555_v55 = vld [vmem:[%s4984_s0 + $0x28] sm:$0xff] }
 0x60b   :  { %v3289_v22 = vpop.eup %3288  ;;  %1098 = vmatmul.mubr.bf16.gmra.mrb[28].mxu0 %v1052_v19 }
 0x60c   :  { %1107 = vmatprep.mubr.bf16.mxu0 %v3662_v10  ;;  %v995_v62 = vmul.f32 %v3289_v22, %v3271_v23  ;;  %v1002_v31 = vmul.f32 %v3554_v24, %v994_v20  ;;  %v1011_v60 = vmul.f32 %v3289_v22, %v3273_v39  ;;  %v1018_v48 = vmul.f32 %v1010_v21, %v4117_v43 }
 0x60d   :  { %2985 = vmatpush3.bf16.msra.mxu0 %v4011_v49  ;;  %v1209_v24 = vsel %vm322_vm1, %v4200_v26, -inf }
 0x60e   :  { %v1003_v36 = vmul.f32 %v3555_v55, %v995_v62  ;;  %v1019_v58 = vmul.f32 %v1011_v60, %v4120_v45  ;;  %v1026_v44 = vadd.f32 %v1018_v48, %v1002_v31  ;;  %2986 = vmatprep.subr.bf16.mxu0 %v4018_v28  ;;  %v3556_v45 = vld [vmem:[%s4984_s0 + $0x30] sm:$0xff]  ;;  %v1206_v62 = vsel %vm322_vm1, %v4194_v0, -inf }
 0x60f   :  { %v1212_v31 = vsel %vm322_vm1, %v4206_v29, -inf  ;;  %v1215_v60 = vsel %vm322_vm1, %v4212_v38, -inf  ;;  %v1218_v48 = vsel %vm322_vm1, %v4218_v30, -inf }
 0x610   :  { %v1027_v63 = vadd.f32 %v1019_v58, %v1003_v36  ;;  %1034 = vst [vmem:[#allocation2 + $0x20] sm:$0xff] %v1026_v44 }
 0x611   :  { %v3291_v23 = vpop.eup %3290  ;;  %2987 = vmatpush3.bf16.msra.mxu0 %v4018_v28  ;;  %v3557_v28 = vld [vmem:[%s4984_s0 + $0x38] sm:$0xff] }
 0x612   :  { %1035 = vst [vmem:[#allocation2 + $0x28] sm:$0xff] %v1027_v63  ;;  %v1053_v12 = vpack.c.bf16 %v1027_v63, %v1026_v44  ;;  %v996_v43 = vmul.f32 %v3291_v23, %v3279_v51  ;;  %v1012_v34 = vmul.f32 %v3291_v23, %v3281_v57  ;;  %2988 = vmatprep.subr.bf16.mxu0 %v4025_v1  ;;  %v1221_v44 = vsel %vm322_vm1, %v4224_v32, -inf }
 0x613   :  { %v3293_v49 = vpop.eup %3292 }
 0x614   :  { %1108 = vmatmul.mubr.bf16.gmra.mrb[32].mxu0 %v1053_v12  ;;  %v997_v59 = vmul.f32 %v3293_v49, %v3283_v14  ;;  %v1004_v37 = vmul.f32 %v3556_v45, %v996_v43  ;;  %v1013_v39 = vmul.f32 %v3293_v49, %v3285_v35  ;;  %v1020_v52 = vmul.f32 %v1012_v34, %v4123_v56 }
 0x615   :  { %1117 = vmatprep.mubr.bf16.mxu0 %v3662_v10  ;;  %2989 = vmatpush3.bf16.msra.mxu0 %v4025_v1  ;;  %v1224_v12 = vsel %vm322_vm1, %v4230_v40, -inf }
 0x616   :  { %v1005_v8 = vmul.f32 %v3557_v28, %v997_v59  ;;  %v1021_v50 = vmul.f32 %v1013_v39, %v4114_v2  ;;  %v1028_v41 = vadd.f32 %v1020_v52, %v1004_v37  ;;  %2990 = vmatprep.subr.bf16.mxu0 %v4032_v53  ;;  %v1227_v59 = vsel %vm322_vm1, %v4236_v47, -inf }
 0x617   :  { %v1144_v42 = vpop.trf.xlu1 }
 0x618   :  { %v1160_v61 = vsel %vm275_vm0, %v1144_v42, -inf  ;;  %v1029_v4 = vadd.f32 %v1021_v50, %v1005_v8  ;;  %1036 = vst [vmem:[#allocation2 + $0x30] sm:$0xff] %v1028_v41 }
 0x619   :  { %1161 = vmax.xlane.f32.xlu0 %v1160_v61  ;;  %2991 = vmatpush3.bf16.msra.mxu0 %v4032_v53  ;;  %v4295_v53 = vld [vmem:[%s4986_s2 + $0x4] ss:$8 sps:$4 sm:$0xff]  }
 0x61a   :  { %1037 = vst [vmem:[#allocation2 + $0x38] sm:$0xff] %v1029_v4  ;;  %v1054_v1 = vpack.c.bf16 %v1029_v4, %v1028_v41  ;;  %2992 = vmatprep.subr.bf16.mxu0 %v4040_v54 }
 0x61b   :  { %v1145_v56 = vpop.trf.xlu1 }
 0x61c   :  { %1118 = vmatmul.mubr.bf16.gmra.mrb[36].mxu0 %v1054_v1  ;;  %v1163_v6 = vsel %vm275_vm0, %v1145_v56, -inf }
 0x61d   :  { %1164 = vmax.xlane.f32.xlu0 %v1163_v6  ;;  %2993 = vmatpush3.bf16.msra.mxu0 %v4040_v54 }
 0x61e   :  { %2994 = vmatprep.subr.bf16.mxu0 %v4047_v33 }
 0x61f   :  { %v1146_v2 = vpop.trf.xlu1 }
 0x620   :  { %v1166_v51 = vsel %vm275_vm0, %v1146_v2, -inf }
 0x621   :  { %1167 = vmax.xlane.f32.xlu0 %v1166_v51  ;;  %2995 = vmatpush3.bf16.msra.mxu0 %v4047_v33 }
 0x622   :  { %3024 = vmatprep.subr.bf16.mxu0 %v4295_v53 }
 0x623   :  { %v1147_v7 = vpop.trf.xlu1 }
 0x624   :  { %v1169_v25 = vsel %vm275_vm0, %v1147_v7, -inf }
 0x625   :  { %1170 = vmax.xlane.f32.xlu0 %v1169_v25 }
 0x6a6   :  { %v1162_v54 = vpop.xlane.xlu0 %1161 }
 0x6a7   :  { %v1172_v9 = vsub.f32 %v1144_v42, %v1162_v54 }
 0x6a9   :  { %v1176_v11 = vmul.f32 1.442695, %v1172_v9 }
 0x6aa   :  { %v1165_v13 = vpop.xlane.xlu0 %1164 }
 0x6ab   :  { %3294 = vpow2.f32 %v1176_v11  ;;  %v1173_v57 = vsub.f32 %v1145_v56, %v1165_v13 }
 0x6ad   :  { %v1178_v14 = vmul.f32 1.442695, %v1173_v57 }
 0x6ae   :  { %v1168_v3 = vpop.xlane.xlu0 %1167 }
 0x6af   :  { %3296 = vpow2.f32 %v1178_v14  ;;  %v1174_v33 = vsub.f32 %v1146_v2, %v1168_v3 }
 0x6b1   :  { %v1180_v5 = vmul.f32 1.442695, %v1174_v33 }
 0x6b2   :  { %v1171_v15 = vpop.xlane.xlu0 %1170 }
 0x6b3   :  { %3298 = vpow2.f32 %v1180_v5  ;;  %v1175_v16 = vsub.f32 %v1147_v7, %v1171_v15 }
 0x6b5   :  { %v4299_v17 = vpop.eup %3294  ;;  %v1182_v35 = vmul.f32 1.442695, %v1175_v16 }
 0x6b6   :  { %v1184_v27 = vsel %vm275_vm0, %v4299_v17, 0.0 }
 0x6b7   :  { %3300 = vpow2.f32 %v1182_v35  ;;  %1185 = vadd.xlane.f32.xlu0 %v1184_v27 }
 0x6b9   :  { %v4303_v18 = vpop.eup %3296 }
 0x6ba   :  { %v1187_v46 = vsel %vm275_vm0, %v4303_v18, 0.0 }
 0x6bb   :  { %1188 = vadd.xlane.f32.xlu0 %v1187_v46 }
 0x6bd   :  { %v4307_v19 = vpop.eup %3298 }
 0x6be   :  { %v1190_v20 = vsel %vm275_vm0, %v4307_v19, 0.0 }
 0x6bf   :  { %1191 = vadd.xlane.f32.xlu0 %v1190_v20 }
 0x6c1   :  { %v4311_v21 = vpop.eup %3300 }
 0x6c2   :  { %v1193_v22 = vsel %vm275_vm0, %v4311_v21, 0.0 }
 0x6c3   :  { %1194 = vadd.xlane.f32.xlu0 %v1193_v22 }
 0x6c7   :  { %1207 = vmax.xlane.f32.xlu0 %v1206_v62 }
 0x6cb   :  { %1210 = vmax.xlane.f32.xlu0 %v1209_v24 }
 0x6cf   :  { %1213 = vmax.xlane.f32.xlu0 %v1212_v31 }
 0x6d3   :  { %1216 = vmax.xlane.f32.xlu0 %v1215_v60 }
 0x6d6   :  { %v1089_v55 = vpop.f32.mrb[24].mxu0 }
 0x6d7   :  { %v4325_v36 = vpop.f32.mrb[25].mxu0  ;;  %1219 = vmax.xlane.f32.xlu0 %v1218_v48 }
 0x6d8   :  { %v1093_v58 = vpop.f32.mrb[26].mxu0 }
 0x6d9   :  { %v1298_v63 = vpack.c.bf16 %v1093_v58, %v1089_v55  ;;  %v4329_v23 = vpop.f32.mrb[27].mxu0 }
 0x6db   :  { %2968 = vmatprep.subr.bf16.mxu1 %v1298_v63  ;;  %1222 = vmax.xlane.f32.xlu0 %v1221_v44 }
 0x6dc   :  { %2969 = vmatpush3.bf16.msra.mxu1 %v1298_v63 }
 0x6de   :  { %v1099_v43 = vpop.f32.mrb[28].mxu0 }
 0x6df   :  { %v4333_v34 = vpop.f32.mrb[29].mxu0  ;;  %1225 = vmax.xlane.f32.xlu0 %v1224_v12 }
 0x6e0   :  { %v1103_v49 = vpop.f32.mrb[30].mxu0 }
 0x6e1   :  { %v1299_v45 = vpack.c.bf16 %v1103_v49, %v1099_v43  ;;  %v4337_v37 = vpop.f32.mrb[31].mxu0 }
 0x6e3   :  { %2970 = vmatprep.subr.bf16.mxu1 %v1299_v45  ;;  %1228 = vmax.xlane.f32.xlu0 %v1227_v59 }
 0x6e4   :  { %2971 = vmatpush3.bf16.msra.mxu1 %v1299_v45  ;;  %v4383_v45 = vld [vmem:[%s4990_s6] ss:$0 sm:$0xff] }
 0x6e7   :  { %v1109_v39 = vpop.f32.mrb[32].mxu0 }
 0x6e8   :  { %v4339_v52 = vpop.f32.mrb[33].mxu0 }
 0x6e9   :  { %v1113_v28 = vpop.f32.mrb[34].mxu0 }
 0x6ea   :  { %v1300_v8 = vpack.c.bf16 %v1113_v28, %v1109_v39  ;;  %v4341_v50 = vpop.f32.mrb[35].mxu0 }
 0x6ec   :  { %2972 = vmatprep.subr.bf16.mxu1 %v1300_v8 }
 0x6ed   :  { %2973 = vmatpush3.bf16.msra.mxu1 %v1300_v8 }
 0x6ef   :  { %v1119_v41 = vpop.f32.mrb[36].mxu0 }
 0x6f0   :  { %v4343_v42 = vpop.f32.mrb[37].mxu0 }
 0x6f1   :  { %v1123_v61 = vpop.f32.mrb[38].mxu0 }
 0x6f2   :  { %v1301_v4 = vpack.c.bf16 %v1123_v61, %v1119_v41  ;;  %v4345_v1 = vpop.f32.mrb[39].mxu0 }
 0x6f4   :  { %2974 = vmatprep.subr.bf16.mxu1 %v1301_v4 }
 0x6f5   :  { %2975 = vmatpush3.bf16.msra.mxu1 %v1301_v4 }
 0x744   :  { %v1186_v56 = vpop.xlane.xlu0 %1185 }
 0x745   :  { %3302 = vrcp.f32 %v1186_v56 }
 0x748   :  { %v1189_v6 = vpop.xlane.xlu0 %1188 }
 0x749   :  { %3304 = vrcp.f32 %v1189_v6 }
 0x74c   :  { %v1192_v2 = vpop.xlane.xlu0 %1191 }
 0x74d   :  { %3306 = vrcp.f32 %v1192_v2 }
 0x74f   :  { %v3303_v7 = vpop.eup %3302 }
 0x750   :  { %v1195_v51 = vpop.xlane.xlu0 %1194  ;;  %v1200_v9 = vmul.f32 %v3303_v7, %v4299_v17 }
 0x751   :  { %3308 = vrcp.f32 %v1195_v51  ;;  %v4410_v51 = vld [vmem:[%s4991_s7] ss:$0 sm:$0xff] }
 0x753   :  { %v3305_v25 = vpop.eup %3304 }
 0x754   :  { %v1208_v54 = vpop.xlane.xlu0 %1207  ;;  %v1201_v11 = vmul.f32 %v3305_v25, %v4303_v18 }
 0x755   :  { %v1230_v13 = vsub.f32 %v4194_v0, %v1208_v54 }
 0x756   :  { %v4350_v57 = vpack.c.bf16 %v1201_v11, %v1200_v9 }
 0x757   :  { %v1238_v14 = vmul.f32 1.442695, %v1230_v13  ;;  %v3307_v33 = vpop.eup %3306 }
 0x758   :  { %2976 = vmatprep.mubr.msk.bf16.mxu1 %vm275_vm0, %v4350_v57  ;;  %v1211_v3 = vpop.xlane.xlu0 %1210  ;;  %v1202_v35 = vmul.f32 %v3307_v33, %v4307_v19 }
 0x759   :  { %3310 = vpow2.f32 %v1238_v14  ;;  %v1231_v5 = vsub.f32 %v4200_v26, %v1211_v3 }
 0x75b   :  { %v3309_v15 = vpop.eup %3308  ;;  %v1240_v16 = vmul.f32 1.442695, %v1231_v5 }
 0x75c   :  { %v1203_v17 = vmul.f32 %v3309_v15, %v4311_v21  ;;  %v1214_v27 = vpop.xlane.xlu0 %1213 }
 0x75d   :  { %3312 = vpow2.f32 %v1240_v16  ;;  %v1232_v0 = vsub.f32 %v4206_v29, %v1214_v27 }
 0x75e   :  { %v4358_v18 = vpack.c.bf16 %v1203_v17, %v1202_v35 }
 0x75f   :  { %v1242_v46 = vmul.f32 1.442695, %v1232_v0 }
 0x760   :  { %v1217_v20 = vpop.xlane.xlu0 %1216  ;;  %2977 = vmatmul.mubr.msk.bf16.vlgmr.msra.gmra.mrb[20].mxu1 %vm275_vm0, %v4358_v18 }
 0x761   :  { %3314 = vpow2.f32 %v1242_v46  ;;  %v1233_v26 = vsub.f32 %v4212_v38, %v1217_v20 }
 0x763   :  { %v4363_v22 = vpop.eup %3310  ;;  %v1244_v62 = vmul.f32 1.442695, %v1233_v26 }
 0x764   :  { %v1220_v19 = vpop.xlane.xlu0 %1219  ;;  %v1254_v21 = vsel %vm322_vm1, %v4363_v22, 0.0 }
 0x765   :  { %3316 = vpow2.f32 %v1244_v62  ;;  %v1234_v29 = vsub.f32 %v4218_v30, %v1220_v19  ;;  %1255 = vadd.xlane.f32.xlu0 %v1254_v21  ;;  %v4428_v21 = vld [vmem:[%s4986_s2 + $0x24] ss:$8 sps:$4 sm:$0xff]  }
 0x767   :  { %v3313_v24 = vpop.eup %3312  ;;  %v1246_v31 = vmul.f32 1.442695, %v1234_v29  ;;  %v4435_v29 = vld [vmem:[%s4986_s2 + $0x34] ss:$8 sps:$4 sm:$0xff]  }
 0x768   :  { %v1223_v60 = vpop.xlane.xlu0 %1222  ;;  %v1257_v48 = vsel %vm322_vm1, %v3313_v24, 0.0 }
 0x769   :  { %3318 = vpow2.f32 %v1246_v31  ;;  %v1235_v55 = vsub.f32 %v4224_v32, %v1223_v60  ;;  %1258 = vadd.xlane.f32.xlu0 %v1257_v48  ;;  %v4449_v31 = vld [vmem:[%s4986_s2 + $0x54] ss:$8 sps:$4 sm:$0xff]   ;;  %v4456_v60 = vld [vmem:[%s4986_s2 + $0x64] ss:$8 sps:$4 sm:$0xff]  }
 0x76a   :  { %v4463_v48 = vld [vmem:[%s4986_s2 + $0x74] ss:$8 sps:$4 sm:$0xff]  }
 0x76b   :  { %v4370_v38 = vpop.eup %3314  ;;  %v1248_v58 = vmul.f32 1.442695, %v1235_v55 }
 0x76c   :  { %v1226_v44 = vpop.xlane.xlu0 %1225  ;;  %v1260_v63 = vsel %vm322_vm1, %v4370_v38, 0.0 }
 0x76d   :  { %3320 = vpow2.f32 %v1248_v58  ;;  %v1236_v30 = vsub.f32 %v4230_v40, %v1226_v44  ;;  %1261 = vadd.xlane.f32.xlu0 %v1260_v63  ;;  %v1649_v40 = vadd.f32 %v4383_v45, %v4325_v36  ;;  %v1651_v36 = vadd.f32 %v4383_v45, %v4333_v34 }
 0x76f   :  { %v4375_v12 = vpop.eup %3316  ;;  %v1250_v43 = vmul.f32 1.442695, %v1236_v30 }
 0x770   :  { %v1229_v49 = vpop.xlane.xlu0 %1228  ;;  %v1263_v59 = vsel %vm322_vm1, %v4375_v12, 0.0 }
 0x771   :  { %3322 = vpow2.f32 %v1250_v43  ;;  %v1237_v32 = vsub.f32 %v4236_v47, %v1229_v49  ;;  %1264 = vadd.xlane.f32.xlu0 %v1263_v59  ;;  %v1650_v47 = vadd.f32 %v4383_v45, %v4329_v23 }
 0x773   :  { %v4387_v39 = vpop.eup %3318  ;;  %v1252_v28 = vmul.f32 1.442695, %v1237_v32 }
 0x774   :  { %v1266_v8 = vsel %vm322_vm1, %v4387_v39, 0.0 }
 0x775   :  { %3324 = vpow2.f32 %v1252_v28  ;;  %1267 = vadd.xlane.f32.xlu1 %v1266_v8 }
 0x776   :  { %3326 = vtanh.f32 %v1649_v40 }
 0x777   :  { %v4393_v41 = vpop.eup %3320  ;;  %3328 = vtanh.f32 %v1650_v47 }
 0x778   :  { %v1269_v61 = vsel %vm322_vm1, %v4393_v41, 0.0  ;;  %3330 = vtanh.f32 %v1651_v36 }
 0x779   :  { %1270 = vadd.xlane.f32.xlu0 %v1269_v61 }
 0x77b   :  { %v4399_v4 = vpop.eup %3322 }
 0x77c   :  { %v1272_v56 = vsel %vm322_vm1, %v4399_v4, 0.0 }
 0x77d   :  { %1273 = vadd.xlane.f32.xlu0 %v1272_v56 }
 0x77f   :  { %v4403_v6 = vpop.eup %3324 }
 0x780   :  { %v3327_v23 = vpop.eup %3326  ;;  %v1275_v2 = vsel %vm322_vm1, %v4403_v6, 0.0 }
 0x781   :  { %1276 = vadd.xlane.f32.xlu0 %v1275_v2  ;;  %v1681_v34 = vmul.f32 %v4410_v51, %v3327_v23  ;;  %v3329_v7 = vpop.eup %3328 }
 0x782   :  { %v1682_v25 = vmul.f32 %v4410_v51, %v3329_v7  ;;  %v3331_v54 = vpop.eup %3330 }
 0x783   :  { %v1683_v9 = vmul.f32 %v4410_v51, %v3331_v54 }
 0x785   :  { %1697 = vadd.xlane.f32.xlu0 %v1681_v34 }
 0x789   :  { %1699 = vadd.xlane.f32.xlu0 %v1682_v25 }
 0x78d   :  { %1701 = vadd.xlane.f32.xlu0 %v1683_v9 }
 0x7f2   :  { %v1256_v11 = vpop.xlane.xlu0 %1255 }
 0x7f3   :  { %3332 = vrcp.f32 %v1256_v11 }
 0x7f6   :  { %v1259_v13 = vpop.xlane.xlu0 %1258 }
 0x7f7   :  { %3334 = vrcp.f32 %v1259_v13 }
 0x7fa   :  { %v1262_v55 = vpop.xlane.xlu0 %1261 }
 0x7fb   :  { %3336 = vrcp.f32 %v1262_v55 }
 0x7fd   :  { %v3333_v14 = vpop.eup %3332 }
 0x7fe   :  { %v1286_v3 = vmul.f32 %v3333_v14, %v4363_v22  ;;  %v4421_v22 = vld [vmem:[%s4986_s2 + $0x14] ss:$8 sps:$4 sm:$0xff]   ;;  %v1265_v58 = vpop.xlane.xlu0 %1264 }
 0x7ff   :  { %3338 = vrcp.f32 %v1265_v58 }
 0x801   :  { %v3335_v33 = vpop.eup %3334 }
 0x802   :  { %v1287_v5 = vmul.f32 %v3335_v33, %v3313_v24  ;;  %v4442_v24 = vld [vmem:[%s4986_s2 + $0x44] ss:$8 sps:$4 sm:$0xff]   ;;  %v1268_v63 = vpop.xlane.xlu1 %1267 }
 0x803   :  { %3340 = vrcp.f32 %v1268_v63 }
 0x804   :  { %v1294_v15 = vpack.c.bf16 %v1287_v5, %v1286_v3 }
 0x805   :  { %v3337_v40 = vpop.eup %3336 }
 0x806   :  { %3004 = vmatprep.mubr.msk.bf16.mxu1 %vm322_vm1, %v1294_v15  ;;  %v1271_v44 = vpop.xlane.xlu0 %1270  ;;  %v1288_v23 = vmul.f32 %v3337_v40, %v4370_v38 }
 0x807   :  { %3342 = vrcp.f32 %v1271_v44 }
 0x809   :  { %v3339_v47 = vpop.eup %3338 }
 0x80a   :  { %v1274_v30 = vpop.xlane.xlu0 %1273  ;;  %v1289_v2 = vmul.f32 %v3339_v47, %v4375_v12 }
 0x80b   :  { %3344 = vrcp.f32 %v1274_v30 }
 0x80c   :  { %v1295_v54 = vpack.c.bf16 %v1289_v2, %v1288_v23 }
 0x80d   :  { %v3341_v36 = vpop.eup %3340 }
 0x80e   :  { %v1277_v59 = vpop.xlane.xlu0 %1276  ;;  %v1290_v34 = vmul.f32 %v3341_v36, %v4387_v39 }
 0x80f   :  { %3346 = vrcp.f32 %v1277_v59 }
 0x811   :  { %v3343_v56 = vpop.eup %3342 }
 0x812   :  { %v1291_v7 = vmul.f32 %v3343_v56, %v4393_v41 }
 0x814   :  { %v1296_v11 = vpack.c.bf16 %v1291_v7, %v1290_v34 }
 0x815   :  { %v3345_v25 = vpop.eup %3344 }
 0x816   :  { %v1292_v13 = vmul.f32 %v3345_v25, %v4399_v4 }
 0x819   :  { %v3347_v9 = vpop.eup %3346 }
 0x81a   :  { %v1293_v38 = vmul.f32 %v3347_v9, %v4403_v6  ;;  %v3570_v9 = vld [vmem:[%s4986_s2] ss:$8 sps:$4 sm:$0xff]  }
 0x81c   :  { %v1297_v14 = vpack.c.bf16 %v1293_v38, %v1292_v13 }
 0x833   :  { %v2978_v16 = vpop.f32.mrb[20].mxu1 }
 0x834   :  { %v1342_v35 = vpop.f32.mrb[21].mxu1  ;;  %v1359_v27 = vmax.f32 %v2978_v16, 0.0  ;;  %v4481_v16 = vld [vmem:[%s4988_s4] ss:$0 sm:$0xff] }
 0x835   :  { %v2979_v17 = vpop.f32.mrb[22].mxu1  ;;  %v1357_v20 = vmax.f32 %v1342_v35, 0.0 }
 0x836   :  { %v1360_v0 = vmax.f32 %v2979_v17, 0.0  ;;  %v1345_v46 = vpop.f32.mrb[23].mxu1 }
 0x837   :  { %v1358_v26 = vmax.f32 %v1345_v46, 0.0  ;;  %v4490_v46 = vld [vmem:[%s4989_s5] ss:$0 sm:$0xff] }
 0x838   :  { %v1362_v62 = vpack.c.bf16 %v1360_v0, %v1359_v27 }
 0x839   :  { %v1361_v19 = vpack.c.bf16 %v1358_v26, %v1357_v20 }
 0x83b   :  { %2996 = vmatprep.mubr.bf16.mxu0 %v1361_v19 }
 0x83c   :  { %2997 = vmatmul.mubr.bf16.vlgmr.msra.gmra.mrb[40].mxu0 %v1362_v62 }
 0x83d   :  { %3025 = vmatpush3.bf16.msra.mxu0 %v4295_v53 }
 0x83e   :  { %3026 = vmatprep.subr.bf16.mxu0 %v4421_v22 }
 0x841   :  { %3027 = vmatpush3.bf16.msra.mxu0 %v4421_v22 }
 0x842   :  { %3028 = vmatprep.subr.bf16.mxu0 %v4428_v21 }
 0x845   :  { %3029 = vmatpush3.bf16.msra.mxu0 %v4428_v21 }
 0x846   :  { %3030 = vmatprep.subr.bf16.mxu0 %v4435_v29 }
 0x849   :  { %3031 = vmatpush3.bf16.msra.mxu0 %v4435_v29 }
 0x84a   :  { %3032 = vmatprep.subr.bf16.mxu0 %v4442_v24 }
 0x84d   :  { %3033 = vmatpush3.bf16.msra.mxu0 %v4442_v24 }
 0x84e   :  { %3034 = vmatprep.subr.bf16.mxu0 %v4449_v31 }
 0x851   :  { %3035 = vmatpush3.bf16.msra.mxu0 %v4449_v31 }
 0x852   :  { %3036 = vmatprep.subr.bf16.mxu0 %v4456_v60 }
 0x855   :  { %3037 = vmatpush3.bf16.msra.mxu0 %v4456_v60 }
 0x856   :  { %3038 = vmatprep.subr.bf16.mxu0 %v4463_v48 }
 0x859   :  { %3039 = vmatpush3.bf16.msra.mxu0 %v4463_v48 }
 0x90f   :  { %v2998_v43 = vpop.f32.mrb[40].mxu0 }
 0x910   :  { %v1397_v49 = vpop.f32.mrb[41].mxu0 }
 0x911   :  { %v2999_v32 = vpop.f32.mrb[42].mxu0 }
 0x912   :  { %v1413_v28 = vpack.c.bf16 %v2999_v32, %v2998_v43  ;;  %v1400_v8 = vpop.f32.mrb[43].mxu0 }
 0x913   :  { %v1412_v61 = vpack.c.bf16 %v1400_v8, %v1397_v49 }
 0x915   :  { %3000 = vmatprep.subr.bf16.mxu1 %v1412_v61 }
 0x916   :  { %3001 = vmatpush3.bf16.msra.mxu1 %v1412_v61 }
 0x917   :  { %3002 = vmatprep.subr.bf16.mxu1 %v1413_v28 }
 0x91a   :  { %3003 = vmatpush3.bf16.msra.mxu1 %v1413_v28 }
 0x91d   :  { %3005 = vmatmul.mubr.msk.bf16.vlgmr.msra.gmra.mrb[24].mxu1 %vm322_vm1, %v1295_v54 }
 0x91e   :  { %3008 = vmatprep.mubr.msk.bf16.mxu1 %vm322_vm1, %v1296_v11  ;;  %v3571_v11 = vld [vmem:[%s4986_s2 + $0x10] ss:$8 sps:$4 sm:$0xff]  }
 0x925   :  { %3009 = vmatmul.mubr.msk.bf16.gmra.mrb[28].mxu1 %vm322_vm1, %v1297_v14 }
 0x926   :  { %3020 = vmatprep.mubr.msk.bf16.mxu1 %vm275_vm0, %v4350_v57 }
 0x9f0   :  { %v3006_v12 = vpop.f32.mrb[24].mxu1 }
 0x9f1   :  { %v1493_v39 = vmax.f32 %v3006_v12, 0.0  ;;  %v1460_v41 = vpop.f32.mrb[25].mxu1 }
 0x9f2   :  { %v1491_v3 = vmax.f32 %v1460_v41, 0.0  ;;  %v3007_v33 = vpop.f32.mrb[26].mxu1 }
 0x9f3   :  { %v1494_v5 = vmax.f32 %v3007_v33, 0.0  ;;  %v1463_v15 = vpop.f32.mrb[27].mxu1  ;;  %v1558_v35 = vmul.f32 %v4481_v16, %v1493_v39 }
 0x9f4   :  { %v1556_v4 = vmul.f32 %v4481_v16, %v1491_v3  ;;  %v1492_v6 = vmax.f32 %v1463_v15, 0.0 }
 0x9f5   :  { %v1500_v17 = vpack.c.bf16 %v1494_v5, %v1493_v39  ;;  %v1559_v57 = vmul.f32 %v4481_v16, %v1494_v5  ;;  %v4502_v55 = vadd.f32 %v4490_v46, %v1558_v35 }
 0x9f6   :  { %v1499_v27 = vpack.c.bf16 %v1492_v6, %v1491_v3  ;;  %v1557_v0 = vmul.f32 %v4481_v16, %v1492_v6  ;;  %v4496_v26 = vadd.f32 %v4490_v46, %v1556_v4  ;;  %v1652_v3 = vadd.f32 %v4383_v45, %v4337_v37 }
 0x9f7   :  { %v4493_v20 = vadd.f32 %v4490_v46, %v1559_v57 }
 0x9f8   :  { %v4499_v62 = vadd.f32 %v4490_v46, %v1557_v0  ;;  %v3010_v19 = vpop.f32.mrb[28].mxu1  ;;  %3012 = vmatprep.subr.bf16.mxu1 %v1499_v27 }
 0x9f9   :  { %v1497_v58 = vmax.f32 %v3010_v19, 0.0  ;;  %v1476_v44 = vpop.f32.mrb[29].mxu1  ;;  %3013 = vmatpush3.bf16.msra.mxu1 %v1499_v27  ;;  %v1581_v49 = vpack.c.bf16 %v4493_v20, %v4502_v55 }
 0x9fa   :  { %v1495_v63 = vmax.f32 %v1476_v44, 0.0  ;;  %v3011_v30 = vpop.f32.mrb[30].mxu1  ;;  %3014 = vmatprep.subr.bf16.mxu1 %v1500_v17  ;;  %v1580_v43 = vpack.c.bf16 %v4499_v62, %v4496_v26 }
 0x9fb   :  { %v1498_v59 = vmax.f32 %v3011_v30, 0.0  ;;  %v1479_v32 = vpop.f32.mrb[31].mxu1  ;;  %v1562_v8 = vmul.f32 %v4481_v16, %v1497_v58 }
 0x9fc   :  { %v1560_v40 = vmul.f32 %v4481_v16, %v1495_v63  ;;  %v1496_v28 = vmax.f32 %v1479_v32, 0.0  ;;  %3040 = vmatprep.mubr.bf16.mxu0 %v1580_v43 }
 0x9fd   :  { %v1502_v47 = vpack.c.bf16 %v1498_v59, %v1497_v58  ;;  %v1563_v61 = vmul.f32 %v4481_v16, %v1498_v59  ;;  %3015 = vmatpush3.bf16.msra.mxu1 %v1500_v17  ;;  %3041 = vmatmul.mubr.bf16.vlgmr.msra.gmra.mrb[44].mxu0 %v1581_v49  ;;  %v4522_v7 = vadd.f32 %v4490_v46, %v1562_v8 }
 0x9fe   :  { %v1501_v36 = vpack.c.bf16 %v1496_v28, %v1495_v63  ;;  %v1561_v56 = vmul.f32 %v4481_v16, %v1496_v28  ;;  %v4516_v2 = vadd.f32 %v4490_v46, %v1560_v40  ;;  %v1653_v58 = vadd.f32 %v4383_v45, %v4339_v52 }
 0x9ff   :  { %v4513_v23 = vadd.f32 %v4490_v46, %v1563_v61 }
 0xa00   :  { %v4519_v34 = vadd.f32 %v4490_v46, %v1561_v56  ;;  %3016 = vmatprep.subr.bf16.mxu1 %v1501_v36 }
 0xa01   :  { %3017 = vmatpush3.bf16.msra.mxu1 %v1501_v36  ;;  %v1583_v54 = vpack.c.bf16 %v4513_v23, %v4522_v7 }
 0xa02   :  { %3018 = vmatprep.subr.bf16.mxu1 %v1502_v47  ;;  %v1582_v25 = vpack.c.bf16 %v4519_v34, %v4516_v2 }
 0xa04   :  { %3044 = vmatprep.mubr.bf16.mxu0 %v1582_v25 }
 0xa05   :  { %3019 = vmatpush3.bf16.msra.mxu1 %v1502_v47  ;;  %3045 = vmatmul.mubr.bf16.gmra.mrb[48].mxu0 %v1583_v54 }
 0xa06   :  { %1868 = vmatprep.subr.bf16.mxu1 %v4295_v53  ;;  %v3572_v53 = vld [vmem:[%s4986_s2 + $0x20] ss:$8 sps:$4 sm:$0xff]  }
 0xa08   :  { %3021 = vmatmul.mubr.msk.bf16.vlgmr.msra.gmra.mrb[32].mxu1 %vm275_vm0, %v4358_v18  ;;  %v3573_v18 = vld [vmem:[%s4986_s2 + $0x30] ss:$8 sps:$4 sm:$0xff]  }
 0xa09   :  { %1869 = vmatpush1.bf16.msra.mxu1 %v3570_v9  ;;  %1900 = vmatprep.mubr.bf16.mxu1 %v3662_v10 }
 0xa0a   :  { %1870 = vmatprep.subr.bf16.mxu1 %v4421_v22  ;;  %v3574_v22 = vld [vmem:[%s4986_s2 + $0x40] ss:$8 sps:$4 sm:$0xff]  }
 0xa0d   :  { %1871 = vmatpush1.bf16.msra.mxu1 %v3571_v11 }
 0xa0e   :  { %1872 = vmatprep.subr.bf16.mxu1 %v4428_v21  ;;  %v3575_v21 = vld [vmem:[%s4986_s2 + $0x50] ss:$8 sps:$4 sm:$0xff]  }
 0xa11   :  { %1873 = vmatpush1.bf16.msra.mxu1 %v3572_v53 }
 0xa12   :  { %1874 = vmatprep.subr.bf16.mxu1 %v4435_v29  ;;  %v3576_v29 = vld [vmem:[%s4986_s2 + $0x60] ss:$8 sps:$4 sm:$0xff]  }
 0xa15   :  { %1875 = vmatpush1.bf16.msra.mxu1 %v3573_v18 }
 0xa16   :  { %1876 = vmatprep.subr.bf16.mxu1 %v4442_v24  ;;  %v3577_v24 = vld [vmem:[%s4986_s2 + $0x70] ss:$8 sps:$4 sm:$0xff]  }
 0xa19   :  { %1877 = vmatpush1.bf16.msra.mxu1 %v3574_v22 }
 0xa1a   :  { %1878 = vmatprep.subr.bf16.mxu1 %v4449_v31  ;;  %v4566_v31 = vld [vmem:[%s4987_s3] sm:$0xff]  }
 0xa1d   :  { %1879 = vmatpush1.bf16.msra.mxu1 %v3575_v21 }
 0xa1e   :  { %1880 = vmatprep.subr.bf16.mxu1 %v4456_v60 }
 0xa21   :  { %1881 = vmatpush1.bf16.msra.mxu1 %v3576_v29 }
 0xa22   :  { %1882 = vmatprep.subr.bf16.mxu1 %v4463_v48  ;;  %v1654_v48 = vadd.f32 %v4383_v45, %v4341_v50  ;;  %v1656_v50 = vadd.f32 %v4383_v45, %v4345_v1 }
 0xa25   :  { %1883 = vmatpush1.bf16.msra.mxu1 %v3577_v24 }
 0xa26   :  { %3060 = vmatprep.subr.bf16.mxu1 %v4566_v31 }
 0xad0   :  { %v3042_v60 = vpop.f32.mrb[44].mxu0 }
 0xad1   :  { %v1618_v13 = vpop.f32.mrb[45].mxu0  ;;  %v1659_v5 = vadd.f32 %v4383_v45, %v3042_v60 }
 0xad2   :  { %v1657_v38 = vadd.f32 %v4383_v45, %v1618_v13  ;;  %v3043_v14 = vpop.f32.mrb[46].mxu0 }
 0xad3   :  { %v1660_v12 = vadd.f32 %v4383_v45, %v3043_v14  ;;  %v1621_v39 = vpop.f32.mrb[47].mxu0 }
 0xad4   :  { %3348 = vtanh.f32 %v1657_v38  ;;  %v1658_v41 = vadd.f32 %v4383_v45, %v1621_v39 }
 0xad5   :  { %3350 = vtanh.f32 %v1660_v12 }
 0xad6   :  { %3352 = vtanh.f32 %v1658_v41 }
 0xad7   :  { %3354 = vtanh.f32 %v1654_v48 }
 0xad8   :  { %v3046_v33 = vpop.f32.mrb[48].mxu0  ;;  %3356 = vtanh.f32 %v1652_v3 }
 0xad9   :  { %v1634_v15 = vpop.f32.mrb[49].mxu0  ;;  %3358 = vtanh.f32 %v1659_v5  ;;  %v1663_v24 = vadd.f32 %v4383_v45, %v3046_v33  ;;  %v4611_v5 = vld [vmem:[%s4985_s1 + $0x80] sm:$0xff] }
 0xada   :  { %v3047_v4 = vpop.f32.mrb[50].mxu0  ;;  %v1661_v56 = vadd.f32 %v4383_v45, %v1634_v15  ;;  %v4617_v15 = vld [vmem:[%s4985_s1 + $0x88] sm:$0xff] }
 0xadb   :  { %v3022_v6 = vpop.f32.mrb[32].mxu1  ;;  %v1637_v35 = vpop.f32.mrb[51].mxu0  ;;  %v1664_v40 = vadd.f32 %v4383_v45, %v3047_v4  ;;  %v4623_v4 = vld [vmem:[%s4985_s1 + $0x90] sm:$0xff] }
 0xadc   :  { %v1554_v17 = vmax.f32 %v3022_v6, 0.0  ;;  %v1662_v57 = vadd.f32 %v4383_v45, %v1637_v35  ;;  %v1537_v27 = vpop.f32.mrb[33].mxu1  ;;  %v4641_v6 = vld [vmem:[%s4985_s1 + $0xa8] sm:$0xff]  ;;  %v4647_v35 = vld [vmem:[%s4985_s1 + $0xb0] sm:$0xff] }
 0xadd   :  { %v1552_v0 = vmax.f32 %v1537_v27, 0.0  ;;  %v3023_v37 = vpop.f32.mrb[34].mxu1 }
 0xade   :  { %v3349_v19 = vpop.eup %3348  ;;  %v1574_v44 = vmul.f32 %v4481_v16, %v1554_v17  ;;  %3360 = vtanh.f32 %v1662_v57  ;;  %v1555_v63 = vmax.f32 %v3023_v37, 0.0  ;;  %v1540_v30 = vpop.f32.mrb[35].mxu1  ;;  %v4653_v17 = vld [vmem:[%s4985_s1 + $0xb8] sm:$0xff] }
 0xadf   :  { %v3351_v43 = vpop.eup %3350  ;;  %3362 = vtanh.f32 %v1656_v50  ;;  %v1572_v1 = vmul.f32 %v4481_v16, %v1552_v0  ;;  %v1553_v49 = vmax.f32 %v1540_v30, 0.0  ;;  %v1689_v59 = vmul.f32 %v4410_v51, %v3349_v19  ;;  %v4635_v50 = vld [vmem:[%s4985_s1 + $0xa0] sm:$0xff]  ;;  %v1698_v57 = vpop.xlane.xlu0 %1697 }
 0xae0   :  { %v3353_v32 = vpop.eup %3352  ;;  %v1578_v28 = vadd.f32 %v4490_v46, %v1574_v44  ;;  %v1575_v8 = vmul.f32 %v4481_v16, %v1555_v63  ;;  %v1692_v52 = vmul.f32 %v4410_v51, %v3351_v43  ;;  %3364 = vtanh.f32 %v1653_v58 }
 0xae1   :  { %v3355_v47 = vpop.eup %3354  ;;  %v1576_v61 = vadd.f32 %v4490_v46, %v1572_v1  ;;  %v1573_v36 = vmul.f32 %v4481_v16, %v1553_v49  ;;  %1713 = vadd.xlane.f32.xlu0 %v1689_v59  ;;  %v1690_v9 = vmul.f32 %v4410_v51, %v3353_v32  ;;  %3366 = vtanh.f32 %v1664_v40 }
 0xae2   :  { %1853 = vst [vmem:[#allocation4 + $0x30] sm:$0xff] %v1578_v28  ;;  %v1579_v25 = vadd.f32 %v4490_v46, %v1575_v8  ;;  %1719 = vadd.xlane.f32.xlu1 %v1692_v52  ;;  %v3357_v11 = vpop.eup %3356  ;;  %v1686_v53 = vmul.f32 %v4410_v51, %v3355_v47  ;;  %v1655_v16 = vadd.f32 %v4383_v45, %v4343_v42  ;;  %3368 = vtanh.f32 %v1661_v56 }
 0xae3   :  { %1851 = vst [vmem:[#allocation4 + $0x20] sm:$0xff] %v1576_v61  ;;  %v1577_v54 = vadd.f32 %v4490_v46, %v1573_v36  ;;  %v3359_v18 = vpop.eup %3358  ;;  %v1684_v22 = vmul.f32 %v4410_v51, %v3357_v11  ;;  %v1700_v27 = vpop.xlane.xlu0 %1699 }
 0xae4   :  { %1854 = vst [vmem:[#allocation4 + $0x38] sm:$0xff] %v1579_v25  ;;  %3370 = vtanh.f32 %v1655_v16  ;;  %v1691_v60 = vmul.f32 %v4410_v51, %v3359_v18 }
 0xae5   :  { %1852 = vst [vmem:[#allocation4 + $0x28] sm:$0xff] %v1577_v54  ;;  %1715 = vadd.xlane.f32.xlu0 %v1690_v9  ;;  %3372 = vtanh.f32 %v1663_v24 }
 0xae6   :  { %1707 = vadd.xlane.f32.xlu1 %v1686_v53 }
 0xae7   :  { %v1702_v0 = vpop.xlane.xlu0 %1701 }
 0xae8   :  { %v3361_v21 = vpop.eup %3360 }
 0xae9   :  { %v3363_v29 = vpop.eup %3362  ;;  %1703 = vadd.xlane.f32.xlu0 %v1684_v22  ;;  %v1694_v46 = vmul.f32 %v4410_v51, %v3361_v21 }
 0xaea   :  { %v3365_v13 = vpop.eup %3364  ;;  %v1688_v42 = vmul.f32 %v4410_v51, %v3363_v29 }
 0xaeb   :  { %1723 = vadd.xlane.f32.xlu1 %v1694_v46  ;;  %v3367_v38 = vpop.eup %3366  ;;  %v1685_v14 = vmul.f32 %v4410_v51, %v3365_v13 }
 0xaec   :  { %v3369_v48 = vpop.eup %3368  ;;  %v1696_v12 = vmul.f32 %v4410_v51, %v3367_v38 }
 0xaed   :  { %1717 = vadd.xlane.f32.xlu0 %v1691_v60  ;;  %v1693_v39 = vmul.f32 %v4410_v51, %v3369_v48 }
 0xaee   :  { %v3371_v45 = vpop.eup %3370 }
 0xaef   :  { %1711 = vadd.xlane.f32.xlu1 %v1688_v42  ;;  %v1687_v41 = vmul.f32 %v4410_v51, %v3371_v45  ;;  %v3373_v3 = vpop.eup %3372 }
 0xaf0   :  { %v1695_v33 = vmul.f32 %v4410_v51, %v3373_v3  ;;  %v4629_v51 = vld [vmem:[%s4985_s1 + $0x98] sm:$0xff] }
 0xaf1   :  { %1705 = vadd.xlane.f32.xlu0 %v1685_v14 }
 0xaf3   :  { %1727 = vadd.xlane.f32.xlu1 %v1696_v12 }
 0xaf5   :  { %1721 = vadd.xlane.f32.xlu0 %v1693_v39 }
 0xaf9   :  { %1709 = vadd.xlane.f32.xlu0 %v1687_v41 }
 0xafd   :  { %1725 = vadd.xlane.f32.xlu0 %v1695_v33 }
 0xb2a   :  { %1941 = vxpose.xlu0.b32.start [1/8] (short) (narrow) %v4611_v5, 32 }
 0xb2e   :  { %1942 = vxpose.xlu0.b32.cont [2/8] (short) (narrow) %v4617_v15, 32 }
 0xb32   :  { %1943 = vxpose.xlu0.b32.cont [3/8] (short) (narrow) %v4623_v4, 32 }
 0xb36   :  { %1944 = vxpose.xlu0.b32.cont [4/8] (short) (narrow) %v4629_v51, 32 }
 0xb3a   :  { %1945 = vxpose.xlu0.b32.cont [5/8] (short) (narrow) %v4635_v50, 32 }
 0xb3e   :  { %1946 = vxpose.xlu0.b32.cont [6/8] (short) (narrow) %v4641_v6, 32 }
 0xb42   :  { %1947 = vxpose.xlu0.b32.cont [7/8] (short) (narrow) %v4647_v35, 32 }
 0xb46   :  { %1948 = vxpose.xlu0.b32.end [8/8] (short) (narrow) %v4653_v17, 32 }
 0xb6e   :  { %v1714_v37 = vpop.xlane.xlu0 %1713 }
 0xb6f   :  { %v1729_v19 = vmax.f32 %v1698_v57, %v1714_v37  ;;  %v1720_v58 = vpop.xlane.xlu1 %1719 }
 0xb71   :  { %v1737_v44 = vsub.f32 %v1698_v57, %v1729_v19  ;;  %v1761_v63 = vsub.f32 %v1714_v37, %v1729_v19 }
 0xb72   :  { %v1716_v30 = vpop.xlane.xlu0 %1715 }
 0xb73   :  { %v1745_v43 = vmul.f32 1.442695, %v1737_v44  ;;  %v1769_v1 = vmul.f32 1.442695, %v1761_v63  ;;  %v1730_v49 = vmax.f32 %v1700_v27, %v1716_v30  ;;  %v1708_v59 = vpop.xlane.xlu1 %1707 }
 0xb75   :  { %3374 = vpow2.f32 %v1745_v43  ;;  %v1738_v32 = vsub.f32 %v1700_v27, %v1730_v49  ;;  %v1762_v40 = vsub.f32 %v1716_v30, %v1730_v49 }
 0xb76   :  { %3376 = vpow2.f32 %v1769_v1  ;;  %v1704_v28 = vpop.xlane.xlu0 %1703 }
 0xb77   :  { %v1747_v8 = vmul.f32 1.442695, %v1738_v32  ;;  %v1771_v52 = vmul.f32 1.442695, %v1762_v40  ;;  %v1732_v47 = vmax.f32 %v1704_v28, %v1720_v58 }
 0xb78   :  { %v1724_v61 = vpop.xlane.xlu1 %1723 }
 0xb79   :  { %3378 = vpow2.f32 %v1747_v8  ;;  %v1740_v36 = vsub.f32 %v1704_v28, %v1732_v47  ;;  %v1764_v56 = vsub.f32 %v1720_v58, %v1732_v47  ;;  %v1734_v25 = vmax.f32 %v1708_v59, %v1724_v61 }
 0xb7a   :  { %3380 = vpow2.f32 %v1771_v52  ;;  %v1718_v54 = vpop.xlane.xlu0 %1717 }
 0xb7b   :  { %v1751_v9 = vmul.f32 1.442695, %v1740_v36  ;;  %v1775_v11 = vmul.f32 1.442695, %v1764_v56  ;;  %v1742_v53 = vsub.f32 %v1708_v59, %v1734_v25  ;;  %v1766_v16 = vsub.f32 %v1724_v61, %v1734_v25 }
 0xb7c   :  { %v1731_v18 = vmax.f32 %v1702_v0, %v1718_v54  ;;  %v1712_v22 = vpop.xlane.xlu1 %1711 }
 0xb7d   :  { %3382 = vpow2.f32 %v1751_v9  ;;  %v1755_v21 = vmul.f32 1.442695, %v1742_v53  ;;  %v1779_v29 = vmul.f32 1.442695, %v1766_v16 }
 0xb7e   :  { %3384 = vpow2.f32 %v1775_v11  ;;  %v1739_v46 = vsub.f32 %v1702_v0, %v1731_v18  ;;  %v1763_v24 = vsub.f32 %v1718_v54, %v1731_v18  ;;  %v1706_v60 = vpop.xlane.xlu0 %1705  ;;  %v3579_v18 = vld [vmem:[#allocation2] sm:$0xff] }
 0xb7f   :  { %v3375_v13 = vpop.eup %3374  ;;  %3386 = vpow2.f32 %v1755_v21 }
 0xb80   :  { %v3377_v42 = vpop.eup %3376  ;;  %3388 = vpow2.f32 %v1779_v29  ;;  %v1749_v38 = vmul.f32 1.442695, %v1739_v46  ;;  %v1773_v14 = vmul.f32 1.442695, %v1763_v24  ;;  %v1728_v48 = vpop.xlane.xlu1 %1727 }
 0xb81   :  { %v1785_v12 = vadd.f32 %v3377_v42, %v3375_v13  ;;  %v1736_v39 = vmax.f32 %v1712_v22, %v1728_v48 }
 0xb82   :  { %3390 = vpow2.f32 %v1749_v38  ;;  %v1722_v45 = vpop.xlane.xlu0 %1721 }
 0xb83   :  { %v3379_v41 = vpop.eup %3378  ;;  %3392 = vrcp.f32 %v1785_v12  ;;  %v1744_v3 = vsub.f32 %v1712_v22, %v1736_v39  ;;  %v1768_v33 = vsub.f32 %v1728_v48, %v1736_v39  ;;  %v1733_v57 = vmax.f32 %v1706_v60, %v1722_v45 }
 0xb84   :  { %v3381_v27 = vpop.eup %3380  ;;  %3394 = vpow2.f32 %v1773_v14 }
 0xb85   :  { %v1786_v0 = vadd.f32 %v3381_v27, %v3379_v41  ;;  %v1759_v37 = vmul.f32 1.442695, %v1744_v3  ;;  %v1783_v19 = vmul.f32 1.442695, %v1768_v33  ;;  %v1741_v58 = vsub.f32 %v1706_v60, %v1733_v57 }
 0xb86   :  { %v1765_v44 = vsub.f32 %v1722_v45, %v1733_v57  ;;  %v1710_v63 = vpop.xlane.xlu0 %1709 }
 0xb87   :  { %v3383_v30 = vpop.eup %3382  ;;  %3396 = vrcp.f32 %v1786_v0  ;;  %v1753_v43 = vmul.f32 1.442695, %v1741_v58 }
 0xb88   :  { %v3385_v1 = vpop.eup %3384  ;;  %3398 = vpow2.f32 %v1759_v37  ;;  %v1777_v49 = vmul.f32 1.442695, %v1765_v44  ;;  %v3581_v37 = vld [vmem:[#allocation2 + $0x18] sm:$0xff] }
 0xb89   :  { %v3387_v59 = vpop.eup %3386  ;;  %v1788_v32 = vadd.f32 %v3385_v1, %v3383_v30  ;;  %3400 = vpow2.f32 %v1783_v19 }
 0xb8a   :  { %v3389_v40 = vpop.eup %3388  ;;  %3402 = vpow2.f32 %v1753_v43  ;;  %v1726_v28 = vpop.xlane.xlu0 %1725  ;;  %v3582_v43 = vld [vmem:[#allocation2 + $0x28] sm:$0xff] }
 0xb8b   :  { %3404 = vrcp.f32 %v1788_v32  ;;  %v1790_v8 = vadd.f32 %v3389_v40, %v3387_v59  ;;  %v1735_v52 = vmax.f32 %v1710_v63, %v1726_v28 }
 0xb8c   :  { %v3391_v47 = vpop.eup %3390  ;;  %3406 = vpow2.f32 %v1777_v49 }
 0xb8d   :  { %v3393_v61 = vpop.eup %3392  ;;  %3408 = vrcp.f32 %v1790_v8  ;;  %v1743_v36 = vsub.f32 %v1710_v63, %v1735_v52  ;;  %v1767_v56 = vsub.f32 %v1726_v28, %v1735_v52 }
 0xb8e   :  { %v3395_v25 = vpop.eup %3394  ;;  %v1801_v54 = vmul.f32 %v3393_v61, %v3375_v13  ;;  %v1817_v9 = vmul.f32 %v3393_v61, %v3377_v42  ;;  %v3580_v13 = vld [vmem:[#allocation2 + $0x8] sm:$0xff]  ;;  %v3584_v61 = vld [vmem:[#allocation2 + $0x10] sm:$0xff] }
 0xb8f   :  { %v1787_v11 = vadd.f32 %v3395_v25, %v3391_v47  ;;  %v1757_v53 = vmul.f32 1.442695, %v1743_v36  ;;  %v1781_v16 = vmul.f32 1.442695, %v1767_v56 }
 0xb90   :  { %v1809_v22 = vmul.f32 %v3579_v18, %v1801_v54  ;;  %v1825_v21 = vmul.f32 %v1817_v9, %v4496_v26 }
 0xb91   :  { %v3397_v29 = vpop.eup %3396  ;;  %3410 = vrcp.f32 %v1787_v11 }
 0xb92   :  { %v3399_v46 = vpop.eup %3398  ;;  %v1802_v24 = vmul.f32 %v3397_v29, %v3379_v41  ;;  %v1818_v60 = vmul.f32 %v3397_v29, %v3381_v27  ;;  %3412 = vpow2.f32 %v1757_v53  ;;  %v1833_v38 = vadd.f32 %v1825_v21, %v1809_v22  ;;  %v3586_v53 = vld [vmem:[#allocation2 + $0x38] sm:$0xff] }
 0xb93   :  { %v3401_v14 = vpop.eup %3400  ;;  %3414 = vpow2.f32 %v1781_v16  ;;  %v3587_v21 = vld [vmem:[%s4987_s3 + $0x18] sm:$0xff]  }
 0xb94   :  { %v3403_v48 = vpop.eup %3402  ;;  %v1792_v12 = vadd.f32 %v3401_v14, %v3399_v46  ;;  %v1810_v42 = vmul.f32 %v3580_v13, %v1802_v24  ;;  %v1826_v39 = vmul.f32 %v1818_v60, %v4499_v62  ;;  %1842 = vst [vmem:[#allocation2 + $0x40] sm:$0xff] %v1833_v38 }
 0xb95   :  { %v3405_v45 = vpop.eup %3404 }
 0xb96   :  { %v3407_v3 = vpop.eup %3406  ;;  %3416 = vrcp.f32 %v1792_v12  ;;  %v1834_v26 = vadd.f32 %v1826_v39, %v1810_v42  ;;  %v1804_v33 = vmul.f32 %v3405_v45, %v3383_v30  ;;  %v1820_v57 = vmul.f32 %v3405_v45, %v3385_v1 }
 0xb97   :  { %v3409_v0 = vpop.eup %3408  ;;  %v1789_v41 = vadd.f32 %v3407_v3, %v3403_v48 }
 0xb98   :  { %1843 = vst [vmem:[#allocation2 + $0x48] sm:$0xff] %v1834_v26  ;;  %v1864_v27 = vpack.c.bf16 %v1834_v26, %v1833_v38  ;;  %v1812_v19 = vmul.f32 %v3581_v37, %v1804_v33  ;;  %v1828_v58 = vmul.f32 %v1820_v57, %v4493_v20  ;;  %v1806_v44 = vmul.f32 %v3409_v0, %v3387_v59  ;;  %v3583_v20 = vld [vmem:[%s4987_s3 + $0x8] sm:$0xff]   ;;  %v3593_v37 = vld [vmem:[%s4987_s3 + $0x38] sm:$0xff]  }
 0xb99   :  { %3418 = vrcp.f32 %v1789_v41  ;;  %v1822_v63 = vmul.f32 %v3409_v0, %v3389_v40  ;;  %v3591_v26 = vld [vmem:[%s4987_s3 + $0x28] sm:$0xff]   ;;  %v3592_v41 = vld [vmem:[%s4987_s3 + $0x30] sm:$0xff]  }
 0xb9a   :  { %1901 = vmatmul.mubr.bf16.vlgmr.msra.gmra.mrb[36].mxu1 %v1864_v27  ;;  %v1836_v62 = vadd.f32 %v1828_v58, %v1812_v19  ;;  %v1814_v49 = vmul.f32 %v3582_v43, %v1806_v44  ;;  %v4696_v44 = vld [vmem:[%s4986_s2 + $0x4] ss:$8 sps:$4 sm:$0xff]  }
 0xb9b   :  { %v3411_v32 = vpop.eup %3410  ;;  %1910 = vmatprep.mubr.bf16.mxu1 %v3662_v10  ;;  %v1830_v30 = vmul.f32 %v1822_v63, %v4519_v34  ;;  %3061 = vmatpush3.bf16.msra.mxu1 %v4566_v31 }
 0xb9c   :  { %v3413_v1 = vpop.eup %3412  ;;  %v1803_v28 = vmul.f32 %v3411_v32, %v3391_v47  ;;  %v1819_v8 = vmul.f32 %v3411_v32, %v3395_v25  ;;  %1845 = vst [vmem:[#allocation2 + $0x58] sm:$0xff] %v1836_v62  ;;  %3062 = vmatprep.subr.bf16.mxu1 %v3583_v20  ;;  %v3585_v47 = vld [vmem:[%s4987_s3 + $0x10] sm:$0xff]  }
 0xb9d   :  { %v3415_v59 = vpop.eup %3414  ;;  %v1838_v40 = vadd.f32 %v1830_v30, %v1814_v49 }
 0xb9e   :  { %v1791_v52 = vadd.f32 %v3415_v59, %v3413_v1  ;;  %v1811_v36 = vmul.f32 %v3584_v61, %v1803_v28  ;;  %v1827_v56 = vmul.f32 %v1819_v8, %v4502_v55 }
 0xb9f   :  { %1847 = vst [vmem:[#allocation2 + $0x68] sm:$0xff] %v1838_v40  ;;  %3063 = vmatpush3.bf16.msra.mxu1 %v3583_v20 }
 0xba0   :  { %v3417_v34 = vpop.eup %3416  ;;  %3420 = vrcp.f32 %v1791_v52  ;;  %v1835_v31 = vadd.f32 %v1827_v56, %v1811_v36  ;;  %3064 = vmatprep.subr.bf16.mxu1 %v3585_v47 }
 0xba1   :  { %v1808_v25 = vmul.f32 %v3417_v34, %v3399_v46  ;;  %v1824_v54 = vmul.f32 %v3417_v34, %v3401_v14  ;;  %v3588_v46 = vld [vmem:[#allocation2 + $0x20] sm:$0xff] }
 0xba2   :  { %1844 = vst [vmem:[#allocation2 + $0x50] sm:$0xff] %v1835_v31  ;;  %v1865_v9 = vpack.c.bf16 %v1836_v62, %v1835_v31 }
 0xba3   :  { %v3419_v11 = vpop.eup %3418  ;;  %v1816_v16 = vmul.f32 %v3586_v53, %v1808_v25  ;;  %v1832_v18 = vmul.f32 %v1824_v54, %v4513_v23  ;;  %3065 = vmatpush3.bf16.msra.mxu1 %v3585_v47  ;;  %v3589_v23 = vld [vmem:[%s4987_s3 + $0x20] sm:$0xff]   ;;  %v2019_v54 = vsel %vm322_vm1, %v4611_v5, -inf  ;;  %v2028_v53 = vsel %vm322_vm1, %v4629_v51, -inf }
 0xba4   :  { %1911 = vmatmul.mubr.bf16.gmra.mrb[40].mxu1 %v1865_v9  ;;  %v1805_v55 = vmul.f32 %v3419_v11, %v3403_v48  ;;  %v1821_v22 = vmul.f32 %v3419_v11, %v3407_v3  ;;  %3066 = vmatprep.subr.bf16.mxu1 %v3587_v21  ;;  %v2022_v9 = vsel %vm322_vm1, %v4617_v15, -inf  ;;  %v2025_v11 = vsel %vm322_vm1, %v4623_v4, -inf }
 0xba5   :  { %1920 = vmatprep.mubr.bf16.mxu1 %v3662_v10  ;;  %v1840_v29 = vadd.f32 %v1832_v18, %v1816_v16  ;;  %v2031_v16 = vsel %vm322_vm1, %v4635_v50, -inf  ;;  %v2034_v18 = vsel %vm322_vm1, %v4641_v6, -inf }
 0xba6   :  { %v1813_v24 = vmul.f32 %v3588_v46, %v1805_v55  ;;  %v1829_v60 = vmul.f32 %v1821_v22, %v4516_v2  ;;  %v3590_v2 = vld [vmem:[#allocation2 + $0x30] sm:$0xff] }
 0xba7   :  { %1849 = vst [vmem:[#allocation2 + $0x78] sm:$0xff] %v1840_v29  ;;  %3067 = vmatpush3.bf16.msra.mxu1 %v3587_v21 }
 0xba8   :  { %v1837_v38 = vadd.f32 %v1829_v60, %v1813_v24  ;;  %3068 = vmatprep.subr.bf16.mxu1 %v3589_v23  ;;  %v2040_v60 = vsel %vm322_vm1, %v4653_v17, -inf }
 0xbaa   :  { %v3421_v14 = vpop.eup %3420  ;;  %1846 = vst [vmem:[#allocation2 + $0x60] sm:$0xff] %v1837_v38  ;;  %v1866_v48 = vpack.c.bf16 %v1838_v40, %v1837_v38  ;;  %v1957_v12 = vpop.trf.xlu0 }
 0xbab   :  { %v1973_v13 = vsel %vm275_vm0, %v1957_v12, -inf  ;;  %v1807_v42 = vmul.f32 %v3421_v14, %v3413_v1  ;;  %v1823_v39 = vmul.f32 %v3421_v14, %v3415_v59  ;;  %3069 = vmatpush3.bf16.msra.mxu1 %v3589_v23 }
 0xbac   :  { %1921 = vmatmul.mubr.bf16.gmra.mrb[44].mxu1 %v1866_v48  ;;  %1974 = vmax.xlane.f32.xlu1 %v1973_v13 }
 0xbad   :  { %1930 = vmatprep.mubr.bf16.mxu1 %v3662_v10  ;;  %v1815_v45 = vmul.f32 %v3590_v2, %v1807_v42  ;;  %v1831_v3 = vmul.f32 %v1823_v39, %v4522_v7  ;;  %3070 = vmatprep.subr.bf16.mxu1 %v3591_v26 }
 0xbae   :  { %v1958_v33 = vpop.trf.xlu0 }
 0xbaf   :  { %v1976_v57 = vsel %vm275_vm0, %v1958_v33, -inf  ;;  %v1839_v0 = vadd.f32 %v1831_v3, %v1815_v45  ;;  %3071 = vmatpush3.bf16.msra.mxu1 %v3591_v26 }
 0xbb0   :  { %1977 = vmax.xlane.f32.xlu1 %v1976_v57  ;;  %3072 = vmatprep.subr.bf16.mxu1 %v3592_v41 }
 0xbb1   :  { %1848 = vst [vmem:[#allocation2 + $0x70] sm:$0xff] %v1839_v0  ;;  %v1867_v10 = vpack.c.bf16 %v1840_v29, %v1839_v0  ;;  %v2037_v29 = vsel %vm322_vm1, %v4647_v35, -inf }
 0xbb2   :  { %v1959_v27 = vpop.trf.xlu0 }
 0xbb3   :  { %v1979_v7 = vsel %vm275_vm0, %v1959_v27, -inf  ;;  %3073 = vmatpush3.bf16.msra.mxu1 %v3592_v41 }
 0xbb4   :  { %1931 = vmatmul.mubr.bf16.gmra.mrb[48].mxu1 %v1867_v10  ;;  %1980 = vmax.xlane.f32.xlu1 %v1979_v7 }
 0xbb5   :  { %3074 = vmatprep.subr.bf16.mxu1 %v3593_v37 }
 0xbb6   :  { %v1960_v19 = vpop.trf.xlu0 }
 0xbb7   :  { %v1982_v58 = vsel %vm275_vm0, %v1960_v19, -inf  ;;  %3075 = vmatpush3.bf16.msra.mxu1 %v3593_v37 }
 0xbb8   :  { %1983 = vmax.xlane.f32.xlu1 %v1982_v58  ;;  %3104 = vmatprep.subr.bf16.mxu1 %v4696_v44 }
 0xc39   :  { %v1975_v63 = vpop.xlane.xlu1 %1974 }
 0xc3a   :  { %v1985_v62 = vsub.f32 %v1957_v12, %v1975_v63 }
 0xc3c   :  { %v1989_v43 = vmul.f32 1.442695, %v1985_v62 }
 0xc3d   :  { %v1978_v49 = vpop.xlane.xlu1 %1977 }
 0xc3e   :  { %3422 = vpow2.f32 %v1989_v43  ;;  %v1986_v32 = vsub.f32 %v1958_v33, %v1978_v49 }
 0xc40   :  { %v1991_v30 = vmul.f32 1.442695, %v1986_v32 }
 0xc41   :  { %v1981_v1 = vpop.xlane.xlu1 %1980 }
 0xc42   :  { %3424 = vpow2.f32 %v1991_v30  ;;  %v1987_v28 = vsub.f32 %v1959_v27, %v1981_v1 }
 0xc44   :  { %v1993_v8 = vmul.f32 1.442695, %v1987_v28 }
 0xc45   :  { %v1984_v20 = vpop.xlane.xlu1 %1983 }
 0xc46   :  { %3426 = vpow2.f32 %v1993_v8  ;;  %v1988_v59 = vsub.f32 %v1960_v19, %v1984_v20 }
 0xc48   :  { %v4699_v40 = vpop.eup %3422  ;;  %v1995_v52 = vmul.f32 1.442695, %v1988_v59 }
 0xc49   :  { %v1997_v61 = vsel %vm275_vm0, %v4699_v40, 0.0 }
 0xc4a   :  { %3428 = vpow2.f32 %v1995_v52  ;;  %1998 = vadd.xlane.f32.xlu1 %v1997_v61  ;;  %v4759_v61 = vld [vmem:[%s4990_s6] ss:$0 sm:$0xff] }
 0xc4c   :  { %v4703_v36 = vpop.eup %3424 }
 0xc4d   :  { %v2000_v56 = vsel %vm275_vm0, %v4703_v36, 0.0 }
 0xc4e   :  { %2001 = vadd.xlane.f32.xlu1 %v2000_v56 }
 0xc50   :  { %v4707_v34 = vpop.eup %3426 }
 0xc51   :  { %v2003_v31 = vsel %vm275_vm0, %v4707_v34, 0.0 }
 0xc52   :  { %2004 = vadd.xlane.f32.xlu1 %v2003_v31 }
 0xc54   :  { %v4711_v47 = vpop.eup %3428 }
 0xc55   :  { %v2006_v25 = vsel %vm275_vm0, %v4711_v47, 0.0 }
 0xc56   :  { %2007 = vadd.xlane.f32.xlu1 %v2006_v25 }
 0xc5a   :  { %2020 = vmax.xlane.f32.xlu1 %v2019_v54 }
 0xc5e   :  { %2023 = vmax.xlane.f32.xlu1 %v2022_v9 }
 0xc62   :  { %2026 = vmax.xlane.f32.xlu1 %v2025_v11 }
 0xc66   :  { %2029 = vmax.xlane.f32.xlu1 %v2028_v53 }
 0xc6a   :  { %2032 = vmax.xlane.f32.xlu1 %v2031_v16 }
 0xc6d   :  { %v1902_v55 = vpop.f32.mrb[36].mxu1 }
 0xc6e   :  { %v4727_v22 = vpop.f32.mrb[37].mxu1  ;;  %2035 = vmax.xlane.f32.xlu1 %v2034_v18 }
 0xc6f   :  { %v1906_v21 = vpop.f32.mrb[38].mxu1 }
 0xc70   :  { %v2111_v46 = vpack.c.bf16 %v1906_v21, %v1902_v55  ;;  %v4731_v24 = vpop.f32.mrb[39].mxu1 }
 0xc72   :  { %3048 = vmatprep.subr.bf16.mxu0 %v2111_v46  ;;  %2038 = vmax.xlane.f32.xlu1 %v2037_v29 }
 0xc73   :  { %3049 = vmatpush3.bf16.msra.mxu0 %v2111_v46 }
 0xc76   :  { %2041 = vmax.xlane.f32.xlu1 %v2040_v60 }
 0xc77   :  { %v1912_v38 = vpop.f32.mrb[40].mxu1 }
 0xc78   :  { %v4735_v23 = vpop.f32.mrb[41].mxu1 }
 0xc79   :  { %v1916_v14 = vpop.f32.mrb[42].mxu1 }
 0xc7a   :  { %v2112_v48 = vpack.c.bf16 %v1916_v14, %v1912_v38  ;;  %v4737_v12 = vpop.f32.mrb[43].mxu1 }
 0xc7c   :  { %3050 = vmatprep.subr.bf16.mxu0 %v2112_v48 }
 0xc7d   :  { %3051 = vmatpush3.bf16.msra.mxu0 %v2112_v48 }
 0xc7f   :  { %v1922_v13 = vpop.f32.mrb[44].mxu1 }
 0xc80   :  { %v4739_v42 = vpop.f32.mrb[45].mxu1 }
 0xc81   :  { %v1926_v39 = vpop.f32.mrb[46].mxu1 }
 0xc82   :  { %v2113_v2 = vpack.c.bf16 %v1926_v39, %v1922_v13  ;;  %v4741_v45 = vpop.f32.mrb[47].mxu1 }
 0xc84   :  { %3052 = vmatprep.subr.bf16.mxu0 %v2113_v2 }
 0xc85   :  { %3053 = vmatpush3.bf16.msra.mxu0 %v2113_v2 }
 0xc87   :  { %v1932_v3 = vpop.f32.mrb[48].mxu1 }
 0xc88   :  { %v4743_v26 = vpop.f32.mrb[49].mxu1 }
 0xc89   :  { %v1936_v33 = vpop.f32.mrb[50].mxu1 }
 0xc8a   :  { %v2114_v57 = vpack.c.bf16 %v1936_v33, %v1932_v3  ;;  %v1938_v0 = vpop.f32.mrb[51].mxu1 }
 0xc8c   :  { %3054 = vmatprep.subr.bf16.mxu0 %v2114_v57 }
 0xc8d   :  { %3055 = vmatpush3.bf16.msra.mxu0 %v2114_v57 }
 0xcd7   :  { %v1999_v41 = vpop.xlane.xlu1 %1998 }
 0xcd8   :  { %3430 = vrcp.f32 %v1999_v41 }
 0xcdb   :  { %v2002_v10 = vpop.xlane.xlu1 %2001 }
 0xcdc   :  { %3432 = vrcp.f32 %v2002_v10 }
 0xcdf   :  { %v2005_v27 = vpop.xlane.xlu1 %2004 }
 0xce0   :  { %3434 = vrcp.f32 %v2005_v27 }
 0xce2   :  { %v3431_v37 = vpop.eup %3430 }
 0xce3   :  { %v2008_v7 = vpop.xlane.xlu1 %2007  ;;  %v2013_v63 = vmul.f32 %v3431_v37, %v4699_v40 }
 0xce4   :  { %3436 = vrcp.f32 %v2008_v7 }
 0xce6   :  { %v3433_v19 = vpop.eup %3432 }
 0xce7   :  { %v2021_v58 = vpop.xlane.xlu1 %2020  ;;  %v2014_v62 = vmul.f32 %v3433_v19, %v4703_v36  ;;  %v2469_v36 = vadd.f32 %v4759_v61, %v1938_v0  ;;  %v2463_v0 = vadd.f32 %v4759_v61, %v4731_v24  ;;  %v2465_v24 = vadd.f32 %v4759_v61, %v4737_v12 }
 0xce8   :  { %v2043_v43 = vsub.f32 %v4611_v5, %v2021_v58 }
 0xce9   :  { %v4748_v49 = vpack.c.bf16 %v2014_v62, %v2013_v63  ;;  %v2467_v62 = vadd.f32 %v4759_v61, %v4741_v45 }
 0xcea   :  { %v2051_v32 = vmul.f32 1.442695, %v2043_v43  ;;  %v3435_v1 = vpop.eup %3434 }
 0xceb   :  { %3056 = vmatprep.mubr.msk.bf16.mxu0 %vm275_vm0, %v4748_v49  ;;  %v2024_v30 = vpop.xlane.xlu1 %2023  ;;  %v2015_v59 = vmul.f32 %v3435_v1, %v4707_v34 }
 0xcec   :  { %3438 = vpow2.f32 %v2051_v32  ;;  %v2044_v28 = vsub.f32 %v4617_v15, %v2024_v30  ;;  %v2468_v32 = vadd.f32 %v4759_v61, %v4743_v26 }
 0xcee   :  { %v3437_v8 = vpop.eup %3436  ;;  %v2053_v20 = vmul.f32 1.442695, %v2044_v28 }
 0xcef   :  { %v2016_v40 = vmul.f32 %v3437_v8, %v4711_v47  ;;  %v2027_v52 = vpop.xlane.xlu1 %2026 }
 0xcf0   :  { %3440 = vpow2.f32 %v2053_v20  ;;  %v2045_v5 = vsub.f32 %v4623_v4, %v2027_v52 }
 0xcf1   :  { %v4762_v56 = vpack.c.bf16 %v2016_v40, %v2015_v59 }
 0xcf2   :  { %v2055_v15 = vmul.f32 1.442695, %v2045_v5 }
 0xcf3   :  { %v2030_v31 = vpop.xlane.xlu1 %2029  ;;  %3057 = vmatmul.mubr.msk.bf16.vlgmr.msra.gmra.mrb[52].mxu0 %vm275_vm0, %v4762_v56 }
 0xcf4   :  { %3442 = vpow2.f32 %v2055_v15  ;;  %v2046_v34 = vsub.f32 %v4629_v51, %v2030_v31 }
 0xcf5   :  { %3444 = vtanh.f32 %v2469_v36 }
 0xcf6   :  { %v4767_v47 = vpop.eup %3438  ;;  %v2057_v4 = vmul.f32 1.442695, %v2046_v34 }
 0xcf7   :  { %v2033_v25 = vpop.xlane.xlu1 %2032  ;;  %v2067_v54 = vsel %vm322_vm1, %v4767_v47, 0.0 }
 0xcf8   :  { %3446 = vpow2.f32 %v2057_v4  ;;  %v2047_v9 = vsub.f32 %v4635_v50, %v2033_v25  ;;  %2068 = vadd.xlane.f32.xlu1 %v2067_v54 }
 0xcfa   :  { %v4772_v11 = vpop.eup %3440  ;;  %v2059_v53 = vmul.f32 1.442695, %v2047_v9 }
 0xcfb   :  { %v2036_v16 = vpop.xlane.xlu1 %2035  ;;  %v2070_v18 = vsel %vm322_vm1, %v4772_v11, 0.0 }
 0xcfc   :  { %3448 = vpow2.f32 %v2059_v53  ;;  %v2048_v51 = vsub.f32 %v4641_v6, %v2036_v16  ;;  %2071 = vadd.xlane.f32.xlu1 %v2070_v18  ;;  %v4787_v6 = vld [vmem:[%s4991_s7] ss:$0 sm:$0xff] }
 0xcfe   :  { %v4777_v55 = vpop.eup %3442  ;;  %v2061_v21 = vmul.f32 1.442695, %v2048_v51 }
 0xcff   :  { %v3445_v29 = vpop.eup %3444  ;;  %v2039_v46 = vpop.xlane.xlu1 %2038  ;;  %v2073_v50 = vsel %vm322_vm1, %v4777_v55, 0.0 }
 0xd00   :  { %3450 = vpow2.f32 %v2061_v21  ;;  %v2049_v60 = vsub.f32 %v4647_v35, %v2039_v46  ;;  %2074 = vadd.xlane.f32.xlu0 %v2073_v50  ;;  %v2501_v48 = vmul.f32 %v4787_v6, %v3445_v29  ;;  %v2462_v35 = vadd.f32 %v4759_v61, %v4727_v22  ;;  %v3599_v46 = vld [vmem:[%s4986_s2 + $0x34] ss:$8 sps:$4 sm:$0xff]  }
 0xd01   :  { %v2464_v22 = vadd.f32 %v4759_v61, %v4735_v23  ;;  %v2466_v23 = vadd.f32 %v4759_v61, %v4739_v42  ;;  %v3601_v50 = vld [vmem:[%s4986_s2 + $0x54] ss:$8 sps:$4 sm:$0xff]  }
 0xd02   :  { %v4782_v38 = vpop.eup %3446  ;;  %v2063_v14 = vmul.f32 1.442695, %v2049_v60  ;;  %v3602_v60 = vld [vmem:[%s4986_s2 + $0x64] ss:$8 sps:$4 sm:$0xff]  }
 0xd03   :  { %v2042_v13 = vpop.xlane.xlu1 %2041  ;;  %v2076_v39 = vsel %vm322_vm1, %v4782_v38, 0.0 }
 0xd04   :  { %3452 = vpow2.f32 %v2063_v14  ;;  %v2050_v2 = vsub.f32 %v4653_v17, %v2042_v13  ;;  %2077 = vadd.xlane.f32.xlu1 %v2076_v39  ;;  %2524 = vadd.xlane.f32.xlu0 %v2501_v48  ;;  %v3603_v14 = vld [vmem:[%s4986_s2 + $0x74] ss:$8 sps:$4 sm:$0xff]  }
 0xd06   :  { %v4795_v3 = vpop.eup %3448  ;;  %v2065_v33 = vmul.f32 1.442695, %v2050_v2 }
 0xd07   :  { %v2079_v57 = vsel %vm322_vm1, %v4795_v3, 0.0 }
 0xd08   :  { %3454 = vpow2.f32 %v2065_v33  ;;  %2080 = vadd.xlane.f32.xlu1 %v2079_v57 }
 0xd09   :  { %3456 = vtanh.f32 %v2462_v35 }
 0xd0a   :  { %v4801_v41 = vpop.eup %3450  ;;  %3458 = vtanh.f32 %v2463_v0 }
 0xd0b   :  { %v2082_v17 = vsel %vm322_vm1, %v4801_v41, 0.0  ;;  %3460 = vtanh.f32 %v2464_v22 }
 0xd0c   :  { %2083 = vadd.xlane.f32.xlu1 %v2082_v17  ;;  %3462 = vtanh.f32 %v2465_v24 }
 0xd0d   :  { %3464 = vtanh.f32 %v2466_v23 }
 0xd0e   :  { %v4807_v10 = vpop.eup %3452  ;;  %3466 = vtanh.f32 %v2467_v62 }
 0xd0f   :  { %v2085_v27 = vsel %vm322_vm1, %v4807_v10, 0.0  ;;  %3468 = vtanh.f32 %v2468_v32 }
 0xd10   :  { %2086 = vadd.xlane.f32.xlu1 %v2085_v27 }
 0xd12   :  { %v4813_v7 = vpop.eup %3454 }
 0xd13   :  { %v3457_v37 = vpop.eup %3456  ;;  %v2088_v19 = vsel %vm322_vm1, %v4813_v7, 0.0 }
 0xd14   :  { %2089 = vadd.xlane.f32.xlu1 %v2088_v19  ;;  %v2494_v58 = vmul.f32 %v4787_v6, %v3457_v37  ;;  %v3459_v63 = vpop.eup %3458 }
 0xd15   :  { %v2495_v12 = vmul.f32 %v4787_v6, %v3459_v63  ;;  %v3461_v43 = vpop.eup %3460 }
 0xd16   :  { %v2496_v30 = vmul.f32 %v4787_v6, %v3461_v43  ;;  %v3463_v1 = vpop.eup %3462 }
 0xd17   :  { %v2497_v42 = vmul.f32 %v4787_v6, %v3463_v1  ;;  %v3465_v28 = vpop.eup %3464 }
 0xd18   :  { %2510 = vadd.xlane.f32.xlu1 %v2494_v58  ;;  %v2498_v8 = vmul.f32 %v4787_v6, %v3465_v28  ;;  %v3467_v45 = vpop.eup %3466 }
 0xd19   :  { %v2499_v20 = vmul.f32 %v4787_v6, %v3467_v45  ;;  %v3469_v59 = vpop.eup %3468 }
 0xd1a   :  { %v2500_v40 = vmul.f32 %v4787_v6, %v3469_v59 }
 0xd1c   :  { %2512 = vadd.xlane.f32.xlu1 %v2495_v12 }
 0xd20   :  { %2514 = vadd.xlane.f32.xlu1 %v2496_v30 }
 0xd24   :  { %2516 = vadd.xlane.f32.xlu1 %v2497_v42 }
 0xd28   :  { %2518 = vadd.xlane.f32.xlu1 %v2498_v8 }
 0xd2c   :  { %2520 = vadd.xlane.f32.xlu1 %v2499_v20 }
 0xd30   :  { %2522 = vadd.xlane.f32.xlu1 %v2500_v40 }
 0xd85   :  { %v2069_v26 = vpop.xlane.xlu1 %2068 }
 0xd86   :  { %3470 = vrcp.f32 %v2069_v26  ;;  %v4869_v26 = vld [vmem:[%s4988_s4] ss:$0 sm:$0xff]  ;;  %s3663_s4 = smov [#allocation4]  }
 0xd89   :  { %v2072_v52 = vpop.xlane.xlu1 %2071 }
 0xd8a   :  { %3472 = vrcp.f32 %v2072_v52 }
 0xd8d   :  { %v2075_v2 = vpop.xlane.xlu0 %2074 }
 0xd8e   :  { %3474 = vrcp.f32 %v2075_v2 }
 0xd90   :  { %v3471_v5 = vpop.eup %3470 }
 0xd91   :  { %v2099_v36 = vmul.f32 %v3471_v5, %v4767_v47  ;;  %v3597_v47 = vld [vmem:[%s4986_s2 + $0x14] ss:$8 sps:$4 sm:$0xff]   ;;  %v2078_v48 = vpop.xlane.xlu1 %2077 }
 0xd92   :  { %3476 = vrcp.f32 %v2078_v48 }
 0xd94   :  { %v3473_v15 = vpop.eup %3472 }
 0xd95   :  { %v2100_v31 = vmul.f32 %v3473_v15, %v4772_v11  ;;  %v3598_v11 = vld [vmem:[%s4986_s2 + $0x24] ss:$8 sps:$4 sm:$0xff]   ;;  %v2081_v13 = vpop.xlane.xlu1 %2080 }
 0xd96   :  { %3478 = vrcp.f32 %v2081_v13 }
 0xd97   :  { %v2107_v34 = vpack.c.bf16 %v2100_v31, %v2099_v36  ;;  %v4878_v31 = vld [vmem:[%s4989_s5] ss:$0 sm:$0xff]  ;;  %s2685_s5 = sshll.u32 %s3663_s4, 4  ;;  %s2686_s5 = int_to_ptr.vmem [resolvable:$true] %s2685_s5 }
 0xd98   :  { %v3475_v22 = vpop.eup %3474  ;;  %s3614_s25 = scalar_lea.vmem %s2686_s5, 1536  ;;  %p3619_p1 = scmp.lt.s32.totalorder %s2686_s5, %s2686_s5 }
 0xd99   :  { %3084 = vmatprep.mubr.msk.bf16.mxu0 %vm322_vm1, %v2107_v34  ;;  %v2084_v39 = vpop.xlane.xlu1 %2083  ;;  %v2101_v63 = vmul.f32 %v3475_v22, %v4777_v55  ;;  %p3615_p0 = scmp.ne.s32.totalorder %s2686_s5, %s3614_s25  ;;  %p3620_p2 = scmp.lt.s32.totalorder %s3614_s25, %s3614_s25 }
 0xd9a   :  { %3480 = vrcp.f32 %v2084_v39 }
 0xd9b   :  { %p3621_p3 = por %p3620_p2, %p3619_p1 }
 0xd9c   :  { %v3477_v37 = vpop.eup %3476 }
 0xd9d   :  { %v2087_v35 = vpop.xlane.xlu1 %2086  ;;  %v2102_v62 = vmul.f32 %v3477_v37, %v4782_v38  ;;  %p3622_p4 = pnand %p3621_p3, %p3615_p0 }
 0xd9e   :  { %3482 = vrcp.f32 %v2087_v35 }
 0xd9f   :  { %v2108_v30 = vpack.c.bf16 %v2102_v62, %v2101_v63 }
 0xda0   :  { %v3479_v23 = vpop.eup %3478 }
 0xda1   :  { %v2090_v0 = vpop.xlane.xlu1 %2089  ;;  %v2103_v12 = vmul.f32 %v3479_v23, %v4795_v3 }
 0xda2   :  { %3484 = vrcp.f32 %v2090_v0 }
 0xda4   :  { %v3481_v58 = vpop.eup %3480 }
 0xda5   :  { %v2104_v43 = vmul.f32 %v3481_v58, %v4801_v41 }
 0xda7   :  { %v2109_v42 = vpack.c.bf16 %v2104_v43, %v2103_v12 }
 0xda8   :  { %v3483_v32 = vpop.eup %3482 }
 0xda9   :  { %v2105_v28 = vmul.f32 %v3483_v32, %v4807_v10 }
 0xdac   :  { %v3485_v1 = vpop.eup %3484 }
 0xdad   :  { %v2106_v55 = vmul.f32 %v3485_v1, %v4813_v7 }
 0xdaf   :  { %v2110_v8 = vpack.c.bf16 %v2106_v55, %v2105_v28 }
 0xdc6   :  { %v3058_v4 = vpop.f32.mrb[52].mxu0 }
 0xdc7   :  { %v2155_v25 = vpop.f32.mrb[53].mxu0  ;;  %v2172_v9 = vmax.f32 %v3058_v4, 0.0 }
 0xdc8   :  { %v3059_v54 = vpop.f32.mrb[54].mxu0  ;;  %v2170_v18 = vmax.f32 %v2155_v25, 0.0 }
 0xdc9   :  { %v2173_v53 = vmax.f32 %v3059_v54, 0.0  ;;  %v2158_v16 = vpop.f32.mrb[55].mxu0 }
 0xdca   :  { %v2171_v51 = vmax.f32 %v2158_v16, 0.0 }
 0xdcb   :  { %v2175_v21 = vpack.c.bf16 %v2173_v53, %v2172_v9 }
 0xdcc   :  { %v2174_v29 = vpack.c.bf16 %v2171_v51, %v2170_v18 }
 0xdce   :  { %3076 = vmatprep.mubr.bf16.mxu1 %v2174_v29 }
 0xdcf   :  { %3077 = vmatmul.mubr.bf16.vlgmr.msra.gmra.mrb[52].mxu1 %v2175_v21 }
 0xdd0   :  { %3105 = vmatpush3.bf16.msra.mxu1 %v4696_v44  ;;  %v3600_v44 = vld [vmem:[%s4986_s2 + $0x44] ss:$8 sps:$4 sm:$0xff]  }
 0xdd1   :  { %3106 = vmatprep.subr.bf16.mxu1 %v3597_v47 }
 0xdd4   :  { %3107 = vmatpush3.bf16.msra.mxu1 %v3597_v47 }
 0xdd5   :  { %3108 = vmatprep.subr.bf16.mxu1 %v3598_v11 }
 0xdd8   :  { %3109 = vmatpush3.bf16.msra.mxu1 %v3598_v11 }
 0xdd9   :  { %3110 = vmatprep.subr.bf16.mxu1 %v3599_v46 }
 0xddc   :  { %3111 = vmatpush3.bf16.msra.mxu1 %v3599_v46 }
 0xddd   :  { %3112 = vmatprep.subr.bf16.mxu1 %v3600_v44 }
 0xde0   :  { %3113 = vmatpush3.bf16.msra.mxu1 %v3600_v44 }
 0xde1   :  { %3114 = vmatprep.subr.bf16.mxu1 %v3601_v50 }
 0xde4   :  { %3115 = vmatpush3.bf16.msra.mxu1 %v3601_v50 }
 0xde5   :  { %3116 = vmatprep.subr.bf16.mxu1 %v3602_v60 }
 0xde8   :  { %3117 = vmatpush3.bf16.msra.mxu1 %v3602_v60 }
 0xde9   :  { %3118 = vmatprep.subr.bf16.mxu1 %v3603_v14 }
 0xdec   :  { %3119 = vmatpush3.bf16.msra.mxu1 %v3603_v14 }
 0xea2   :  { %v3078_v33 = vpop.f32.mrb[52].mxu1 }
 0xea3   :  { %v2210_v57 = vpop.f32.mrb[53].mxu1 }
 0xea4   :  { %v3079_v17 = vpop.f32.mrb[54].mxu1 }
 0xea5   :  { %v2226_v27 = vpack.c.bf16 %v3079_v17, %v3078_v33  ;;  %v2213_v24 = vpop.f32.mrb[55].mxu1 }
 0xea6   :  { %v2225_v19 = vpack.c.bf16 %v2213_v24, %v2210_v57 }
 0xea8   :  { %3080 = vmatprep.subr.bf16.mxu0 %v2225_v19 }
 0xea9   :  { %3081 = vmatpush3.bf16.msra.mxu0 %v2225_v19 }
 0xeaa   :  { %3082 = vmatprep.subr.bf16.mxu0 %v2226_v27 }
 0xead   :  { %3083 = vmatpush3.bf16.msra.mxu0 %v2226_v27 }
 0xeb0   :  { %3085 = vmatmul.mubr.msk.bf16.vlgmr.msra.gmra.mrb[56].mxu0 %vm322_vm1, %v2108_v30 }
 0xeb1   :  { %3088 = vmatprep.mubr.msk.bf16.mxu0 %vm322_vm1, %v2109_v42 }
 0xeb8   :  { %3089 = vmatmul.mubr.msk.bf16.gmra.mrb[60].mxu0 %vm322_vm1, %v2110_v8 }
 0xeb9   :  { %3100 = vmatprep.mubr.msk.bf16.mxu0 %vm275_vm0, %v4748_v49 }
 0xf83   :  { %v3086_v38 = vpop.f32.mrb[56].mxu0 }
 0xf84   :  { %v2306_v3 = vmax.f32 %v3086_v38, 0.0  ;;  %v2273_v41 = vpop.f32.mrb[57].mxu0 }
 0xf85   :  { %v2304_v45 = vmax.f32 %v2273_v41, 0.0  ;;  %v3087_v20 = vpop.f32.mrb[58].mxu0 }
 0xf86   :  { %v2307_v59 = vmax.f32 %v3087_v20, 0.0  ;;  %v2276_v40 = vpop.f32.mrb[59].mxu0  ;;  %v2371_v52 = vmul.f32 %v4869_v26, %v2306_v3 }
 0xf87   :  { %v2369_v10 = vmul.f32 %v4869_v26, %v2304_v45  ;;  %v2305_v7 = vmax.f32 %v2276_v40, 0.0 }
 0xf88   :  { %v2313_v5 = vpack.c.bf16 %v2307_v59, %v2306_v3  ;;  %v2372_v49 = vmul.f32 %v4869_v26, %v2307_v59  ;;  %v4890_v9 = vadd.f32 %v4878_v31, %v2371_v52 }
 0xf89   :  { %v2312_v36 = vpack.c.bf16 %v2305_v7, %v2304_v45  ;;  %v2370_v15 = vmul.f32 %v4869_v26, %v2305_v7  ;;  %v4884_v4 = vadd.f32 %v4878_v31, %v2369_v10 }
 0xf8a   :  { %v4881_v34 = vadd.f32 %v4878_v31, %v2372_v49 }
 0xf8b   :  { %v4887_v25 = vadd.f32 %v4878_v31, %v2370_v15  ;;  %v3090_v54 = vpop.f32.mrb[60].mxu0  ;;  %3092 = vmatprep.subr.bf16.mxu0 %v2312_v36 }
 0xf8c   :  { %v2310_v53 = vmax.f32 %v3090_v54, 0.0  ;;  %v2289_v16 = vpop.f32.mrb[61].mxu0  ;;  %3093 = vmatpush3.bf16.msra.mxu0 %v2312_v36  ;;  %v2394_v29 = vpack.c.bf16 %v4881_v34, %v4890_v9 }
 0xf8d   :  { %v2308_v18 = vmax.f32 %v2289_v16, 0.0  ;;  %v3091_v51 = vpop.f32.mrb[62].mxu0  ;;  %3094 = vmatprep.subr.bf16.mxu0 %v2313_v5  ;;  %v2393_v21 = vpack.c.bf16 %v4887_v25, %v4884_v4 }
 0xf8e   :  { %v2311_v47 = vmax.f32 %v3091_v51, 0.0  ;;  %v2292_v11 = vpop.f32.mrb[63].mxu0  ;;  %v2375_v50 = vmul.f32 %v4869_v26, %v2310_v53 }
 0xf8f   :  { %v2373_v46 = vmul.f32 %v4869_v26, %v2308_v18  ;;  %v2309_v44 = vmax.f32 %v2292_v11, 0.0  ;;  %3120 = vmatprep.mubr.bf16.mxu1 %v2393_v21 }
 0xf90   :  { %v2315_v60 = vpack.c.bf16 %v2311_v47, %v2310_v53  ;;  %v2376_v14 = vmul.f32 %v4869_v26, %v2311_v47  ;;  %3095 = vmatpush3.bf16.msra.mxu0 %v2313_v5  ;;  %3121 = vmatmul.mubr.bf16.vlgmr.msra.gmra.mrb[56].mxu1 %v2394_v29  ;;  %v4910_v33 = vadd.f32 %v4878_v31, %v2375_v50 }
 0xf91   :  { %v2314_v48 = vpack.c.bf16 %v2309_v44, %v2308_v18  ;;  %v2374_v13 = vmul.f32 %v4869_v26, %v2309_v44  ;;  %v4904_v2 = vadd.f32 %v4878_v31, %v2373_v46 }
 0xf92   :  { %v4901_v39 = vadd.f32 %v4878_v31, %v2376_v14 }
 0xf93   :  { %v4907_v35 = vadd.f32 %v4878_v31, %v2374_v13  ;;  %3096 = vmatprep.subr.bf16.mxu0 %v2314_v48 }
 0xf94   :  { %3097 = vmatpush3.bf16.msra.mxu0 %v2314_v48  ;;  %v2396_v0 = vpack.c.bf16 %v4901_v39, %v4910_v33 }
 0xf95   :  { %3098 = vmatprep.subr.bf16.mxu0 %v2315_v60  ;;  %v2395_v57 = vpack.c.bf16 %v4907_v35, %v4904_v2 }
 0xf97   :  { %3124 = vmatprep.mubr.bf16.mxu1 %v2395_v57 }
 0xf98   :  { %3099 = vmatpush3.bf16.msra.mxu0 %v2315_v60  ;;  %3125 = vmatmul.mubr.bf16.gmra.mrb[60].mxu1 %v2396_v0 }
 0xf9b   :  { %3101 = vmatmul.mubr.msk.bf16.vlgmr.msra.gmra.mrb[64].mxu0 %vm275_vm0, %v4762_v56 }
0x1063   :  { %v3122_v17 = vpop.f32.mrb[56].mxu1 }
0x1064   :  { %v2472_v22 = vadd.f32 %v4759_v61, %v3122_v17  ;;  %v2431_v27 = vpop.f32.mrb[57].mxu1 }
0x1065   :  { %v2470_v24 = vadd.f32 %v4759_v61, %v2431_v27  ;;  %v3123_v37 = vpop.f32.mrb[58].mxu1 }
0x1066   :  { %3486 = vtanh.f32 %v2472_v22  ;;  %v2473_v19 = vadd.f32 %v4759_v61, %v3123_v37  ;;  %v2434_v23 = vpop.f32.mrb[59].mxu1 }
0x1067   :  { %3488 = vtanh.f32 %v2470_v24  ;;  %v2471_v58 = vadd.f32 %v4759_v61, %v2434_v23 }
0x1068   :  { %3490 = vtanh.f32 %v2473_v19 }
0x1069   :  { %3492 = vtanh.f32 %v2471_v58 }
0x106b   :  { %v3126_v63 = vpop.f32.mrb[60].mxu1 }
0x106c   :  { %v2476_v62 = vadd.f32 %v4759_v61, %v3126_v63  ;;  %v2447_v56 = vpop.f32.mrb[61].mxu1 }
0x106d   :  { %v2474_v12 = vadd.f32 %v4759_v61, %v2447_v56  ;;  %v3127_v43 = vpop.f32.mrb[62].mxu1 }
0x106e   :  { %v3102_v32 = vpop.f32.mrb[64].mxu0  ;;  %v2450_v30 = vpop.f32.mrb[63].mxu1  ;;  %v2477_v1 = vadd.f32 %v4759_v61, %v3127_v43 }
0x106f   :  { %3494 = vtanh.f32 %v2474_v12  ;;  %v2367_v42 = vmax.f32 %v3102_v32, 0.0  ;;  %v2475_v28 = vadd.f32 %v4759_v61, %v2450_v30  ;;  %v2350_v55 = vpop.f32.mrb[65].mxu0 }
0x1070   :  { %v3487_v8 = vpop.eup %3486  ;;  %3496 = vtanh.f32 %v2476_v62  ;;  %v2365_v38 = vmax.f32 %v2350_v55, 0.0  ;;  %v3103_v3 = vpop.f32.mrb[66].mxu0 }
0x1071   :  { %v3489_v41 = vpop.eup %3488  ;;  %v2387_v45 = vmul.f32 %v4869_v26, %v2367_v42  ;;  %3498 = vtanh.f32 %v2475_v28  ;;  %v2368_v20 = vmax.f32 %v3103_v3, 0.0  ;;  %v2353_v59 = vpop.f32.mrb[67].mxu0  ;;  %v2504_v40 = vmul.f32 %v4787_v6, %v3487_v8 }
0x1072   :  { %v3491_v10 = vpop.eup %3490  ;;  %v2385_v7 = vmul.f32 %v4869_v26, %v2365_v38  ;;  %v2366_v52 = vmax.f32 %v2353_v59, 0.0  ;;  %3500 = vtanh.f32 %v2477_v1  ;;  %v2502_v16 = vmul.f32 %v4787_v6, %v3489_v41 }
0x1073   :  { %v2391_v61 = vadd.f32 %v4878_v31, %v2387_v45  ;;  %v2388_v5 = vmul.f32 %v4869_v26, %v2368_v20  ;;  %2530 = vadd.xlane.f32.xlu1 %v2504_v40  ;;  %v2505_v49 = vmul.f32 %v4787_v6, %v3491_v10  ;;  %v3493_v36 = vpop.eup %3492 }
0x1074   :  { %v2389_v15 = vadd.f32 %v4878_v31, %v2385_v7  ;;  %v2386_v54 = vmul.f32 %v4869_v26, %v2366_v52  ;;  %v2503_v51 = vmul.f32 %v4787_v6, %v3493_v36 }
0x1075   :  { %2666 = vst [vmem:[#allocation4 + $0x50] sm:$0xff] %v2391_v61  ;;  %v2392_v53 = vadd.f32 %v4878_v31, %v2388_v5  ;;  %2532 = vadd.xlane.f32.xlu0 %v2505_v49 }
0x1076   :  { %2664 = vst [vmem:[#allocation4 + $0x40] sm:$0xff] %v2389_v15  ;;  %v2390_v18 = vadd.f32 %v4878_v31, %v2386_v54 }
0x1077   :  { %2667 = vst [vmem:[#allocation4 + $0x58] sm:$0xff] %v2392_v53  ;;  %2526 = vadd.xlane.f32.xlu1 %v2502_v16 }
0x1078   :  { %2665 = vst [vmem:[#allocation4 + $0x48] sm:$0xff] %v2390_v18 }
0x1079   :  { %v3495_v21 = vpop.eup %3494  ;;  %2528 = vadd.xlane.f32.xlu0 %v2503_v51 }
0x107a   :  { %v3497_v29 = vpop.eup %3496  ;;  %v2506_v47 = vmul.f32 %v4787_v6, %v3495_v21 }
0x107b   :  { %v3499_v26 = vpop.eup %3498  ;;  %v2508_v44 = vmul.f32 %v4787_v6, %v3497_v29 }
0x107c   :  { %2534 = vadd.xlane.f32.xlu1 %v2506_v47  ;;  %v2507_v11 = vmul.f32 %v4787_v6, %v3499_v26  ;;  %v3501_v46 = vpop.eup %3500 }
0x107d   :  { %v2509_v31 = vmul.f32 %v4787_v6, %v3501_v46 }
0x107e   :  { %2536 = vadd.xlane.f32.xlu0 %v2507_v11 }
0x1080   :  { %2538 = vadd.xlane.f32.xlu1 %v2508_v44 }
0x1082   :  { %2540 = vadd.xlane.f32.xlu0 %v2509_v31 }
0x1083   :  { %3625 = shalt.err (!%p3622_p4)
}
0x1084   :  { %s3626_s28 = scalar_lea.hbm %s4993_s9, 1536 }
0x1085   :  { %p3627_p5 = scmp.ne.s32.totalorder %s4993_s9, %s3626_s28  ;;  %p3630_p6 = scmp.lt.u32.totalorder %s3626_s28, %s4993_s9 }
0x1087   :  { %p3632_p7 = pnand %p3630_p6, %p3627_p5 }
0x1089   :  { %3635 = shalt.err (!%p3632_p7)
}
0x108a   :  { %s3664_s10 = smov 128   ;;  %s3665_s7 = smov 8   ;;  %v2511_v6 = vpop.xlane.xlu1 %2510  ;;  %v4957_v0 = vpop.xlane.xlu0 %2524 }
0x108b   :  { %2691 = dma.vmem_to_hbm [thread:$0]  %s2686_s5, 1536, %s4993_s9, [#allocation5], %s3664_s10, %s3664_s10, %s3665_s7  }
0x108c   :  { %s3666_s9 = smov [#allocation2]  }
0x108d   :  { %s2673_s13 = sshll.u32 %s3666_s9, 4  ;;  %s2674_s13 = int_to_ptr.vmem [resolvable:$true] %s2673_s13 }
0x108e   :  { %v2513_v50 = vpop.xlane.xlu1 %2512  ;;  %s3636_s14 = scalar_lea.vmem %s2674_s13, 3072  ;;  %p3641_p9 = scmp.lt.s32.totalorder %s2674_s13, %s2674_s13 }
0x108f   :  { %p3637_p8 = scmp.ne.s32.totalorder %s2674_s13, %s3636_s14  ;;  %p3642_p10 = scmp.lt.s32.totalorder %s3636_s14, %s3636_s14 }
0x1091   :  { %p3643_p11 = por %p3642_p10, %p3641_p9 }
0x1092   :  { %v2515_v60 = vpop.xlane.xlu1 %2514 }
0x1093   :  { %p3644_p12 = pnand %p3643_p11, %p3637_p8 }
0x1096   :  { %v2517_v14 = vpop.xlane.xlu1 %2516 }
0x109a   :  { %v2519_v48 = vpop.xlane.xlu1 %2518 }
0x109e   :  { %v2521_v13 = vpop.xlane.xlu1 %2520 }
0x10a2   :  { %v2523_v57 = vpop.xlane.xlu1 %2522 }
0x1100   :  { %v2531_v17 = vpop.xlane.xlu1 %2530 }
0x1101   :  { %v2544_v22 = vmax.f32 %v2515_v60, %v2531_v17 }
0x1102   :  { %v2533_v27 = vpop.xlane.xlu0 %2532 }
0x1103   :  { %v2552_v24 = vsub.f32 %v2515_v60, %v2544_v22  ;;  %v2576_v37 = vsub.f32 %v2531_v17, %v2544_v22  ;;  %v2545_v19 = vmax.f32 %v2517_v14, %v2533_v27 }
0x1104   :  { %v2527_v23 = vpop.xlane.xlu1 %2526 }
0x1105   :  { %v2562_v58 = vmul.f32 1.442695, %v2552_v24  ;;  %v2586_v63 = vmul.f32 1.442695, %v2576_v37  ;;  %v2553_v62 = vsub.f32 %v2517_v14, %v2545_v19  ;;  %v2577_v56 = vsub.f32 %v2533_v27, %v2545_v19 }
0x1106   :  { %v2542_v12 = vmax.f32 %v2511_v6, %v2527_v23  ;;  %v2529_v43 = vpop.xlane.xlu0 %2528 }
0x1107   :  { %3502 = vpow2.f32 %v2562_v58  ;;  %v2564_v32 = vmul.f32 1.442695, %v2553_v62  ;;  %v2588_v30 = vmul.f32 1.442695, %v2577_v56  ;;  %v2543_v1 = vmax.f32 %v2513_v50, %v2529_v43 }
0x1108   :  { %3504 = vpow2.f32 %v2586_v63  ;;  %v2550_v42 = vsub.f32 %v2511_v6, %v2542_v12  ;;  %v2574_v28 = vsub.f32 %v2527_v23, %v2542_v12 }
0x1109   :  { %3506 = vpow2.f32 %v2564_v32  ;;  %v2551_v55 = vsub.f32 %v2513_v50, %v2543_v1  ;;  %v2575_v8 = vsub.f32 %v2529_v43, %v2543_v1  ;;  %v2535_v38 = vpop.xlane.xlu1 %2534 }
0x110a   :  { %3508 = vpow2.f32 %v2588_v30  ;;  %v2558_v3 = vmul.f32 1.442695, %v2550_v42  ;;  %v2582_v41 = vmul.f32 1.442695, %v2574_v28  ;;  %v2546_v45 = vmax.f32 %v2519_v48, %v2535_v38  ;;  %v3606_v42 = vld [vmem:[#allocation2 + $0x50] sm:$0xff] }
0x110b   :  { %v2560_v20 = vmul.f32 1.442695, %v2551_v55  ;;  %v2584_v59 = vmul.f32 1.442695, %v2575_v8  ;;  %v2537_v40 = vpop.xlane.xlu0 %2536 }
0x110c   :  { %3510 = vpow2.f32 %v2558_v3  ;;  %v2554_v10 = vsub.f32 %v2519_v48, %v2546_v45  ;;  %v2578_v7 = vsub.f32 %v2535_v38, %v2546_v45  ;;  %v2547_v52 = vmax.f32 %v2521_v13, %v2537_v40 }
0x110d   :  { %3512 = vpow2.f32 %v2582_v41  ;;  %v2539_v61 = vpop.xlane.xlu1 %2538 }
0x110e   :  { %3514 = vpow2.f32 %v2560_v20  ;;  %v2566_v5 = vmul.f32 1.442695, %v2554_v10  ;;  %v2590_v49 = vmul.f32 1.442695, %v2578_v7  ;;  %v2555_v36 = vsub.f32 %v2521_v13, %v2547_v52 }
0x110f   :  { %3516 = vpow2.f32 %v2584_v59  ;;  %v2579_v15 = vsub.f32 %v2537_v40, %v2547_v52  ;;  %v2548_v54 = vmax.f32 %v2523_v57, %v2539_v61  ;;  %v2541_v53 = vpop.xlane.xlu0 %2540  ;;  %v3607_v59 = vld [vmem:[#allocation2 + $0x58] sm:$0xff] }
0x1110   :  { %3518 = vpow2.f32 %v2566_v5  ;;  %v2568_v16 = vmul.f32 1.442695, %v2555_v36  ;;  %v2549_v18 = vmax.f32 %v4957_v0, %v2541_v53 }
0x1111   :  { %v3503_v51 = vpop.eup %3502  ;;  %3520 = vpow2.f32 %v2590_v49  ;;  %v2592_v21 = vmul.f32 1.442695, %v2579_v15  ;;  %v2556_v29 = vsub.f32 %v2523_v57, %v2548_v54  ;;  %v2580_v47 = vsub.f32 %v2539_v61, %v2548_v54  ;;  %v3608_v15 = vld [vmem:[#allocation2 + $0x40] sm:$0xff] }
0x1112   :  { %v3505_v26 = vpop.eup %3504  ;;  %3522 = vpow2.f32 %v2568_v16  ;;  %v2557_v11 = vsub.f32 %v4957_v0, %v2549_v18  ;;  %v2581_v6 = vsub.f32 %v2541_v53, %v2549_v18 }
0x1113   :  { %v3507_v46 = vpop.eup %3506  ;;  %v2600_v44 = vadd.f32 %v3505_v26, %v3503_v51  ;;  %3524 = vpow2.f32 %v2592_v21  ;;  %v2570_v31 = vmul.f32 1.442695, %v2556_v29  ;;  %v2594_v60 = vmul.f32 1.442695, %v2580_v47  ;;  %v3609_v21 = vld [vmem:[#allocation2 + $0x48] sm:$0xff] }
0x1114   :  { %v3509_v50 = vpop.eup %3508  ;;  %v2572_v48 = vmul.f32 1.442695, %v2557_v11  ;;  %v2596_v57 = vmul.f32 1.442695, %v2581_v6 }
0x1115   :  { %3526 = vrcp.f32 %v2600_v44  ;;  %v2601_v14 = vadd.f32 %v3509_v50, %v3507_v46  ;;  %v3610_v44 = vld [vmem:[#allocation2 + $0x60] sm:$0xff] }
0x1116   :  { %v3511_v13 = vpop.eup %3510  ;;  %3528 = vpow2.f32 %v2570_v31 }
0x1117   :  { %v3513_v17 = vpop.eup %3512  ;;  %3530 = vrcp.f32 %v2601_v14 }
0x1118   :  { %v3515_v22 = vpop.eup %3514  ;;  %v2598_v27 = vadd.f32 %v3513_v17, %v3511_v13  ;;  %3532 = vpow2.f32 %v2594_v60  ;;  %v3611_v60 = vld [vmem:[#allocation2 + $0x68] sm:$0xff] }
0x1119   :  { %v3517_v24 = vpop.eup %3516  ;;  %3534 = vpow2.f32 %v2572_v48 }
0x111a   :  { %v3519_v0 = vpop.eup %3518  ;;  %3536 = vrcp.f32 %v2598_v27  ;;  %v2599_v37 = vadd.f32 %v3517_v24, %v3515_v22 }
0x111b   :  { %v3521_v19 = vpop.eup %3520  ;;  %3538 = vpow2.f32 %v2596_v57 }
0x111c   :  { %v3523_v23 = vpop.eup %3522  ;;  %3540 = vrcp.f32 %v2599_v37  ;;  %v2602_v58 = vadd.f32 %v3521_v19, %v3519_v0 }
0x111d   :  { %v3525_v63 = vpop.eup %3524 }
0x111e   :  { %3542 = vrcp.f32 %v2602_v58  ;;  %v2603_v62 = vadd.f32 %v3525_v63, %v3523_v23  ;;  %v3613_v58 = vld [vmem:[#allocation2 + $0x78] sm:$0xff] }
0x111f   :  { %v3527_v56 = vpop.eup %3526 }
0x1120   :  { %v3529_v12 = vpop.eup %3528  ;;  %v2616_v43 = vmul.f32 %v3527_v56, %v3503_v51  ;;  %v2632_v32 = vmul.f32 %v3527_v56, %v3505_v26  ;;  %3544 = vrcp.f32 %v2603_v62 }
0x1121   :  { %v3531_v30 = vpop.eup %3530 }
0x1122   :  { %v3533_v1 = vpop.eup %3532  ;;  %v2624_v28 = vmul.f32 %v3606_v42, %v2616_v43  ;;  %v2640_v55 = vmul.f32 %v2632_v32, %v4890_v9  ;;  %v2617_v8 = vmul.f32 %v3531_v30, %v3507_v46  ;;  %v2633_v38 = vmul.f32 %v3531_v30, %v3509_v50 }
0x1123   :  { %v3535_v3 = vpop.eup %3534  ;;  %v2604_v41 = vadd.f32 %v3533_v1, %v3529_v12 }
0x1124   :  { %v3537_v45 = vpop.eup %3536  ;;  %v2648_v20 = vadd.f32 %v2640_v55, %v2624_v28  ;;  %v2625_v40 = vmul.f32 %v3607_v59, %v2617_v8  ;;  %v2641_v10 = vmul.f32 %v2633_v38, %v4881_v34 }
0x1125   :  { %v3539_v7 = vpop.eup %3538  ;;  %v2614_v52 = vmul.f32 %v3537_v45, %v3511_v13  ;;  %v2630_v61 = vmul.f32 %v3537_v45, %v3513_v17  ;;  %3546 = vrcp.f32 %v2604_v41 }
0x1126   :  { %v3541_v5 = vpop.eup %3540  ;;  %2657 = vst [vmem:[#allocation2 + $0x90] sm:$0xff] %v2648_v20  ;;  %v2649_v49 = vadd.f32 %v2641_v10, %v2625_v40  ;;  %v2605_v36 = vadd.f32 %v3539_v7, %v3535_v3 }
0x1127   :  { %v2622_v9 = vmul.f32 %v3608_v15, %v2614_v52  ;;  %v2638_v54 = vmul.f32 %v2630_v61, %v4884_v4  ;;  %v2615_v53 = vmul.f32 %v3541_v5, %v3515_v22  ;;  %v2631_v16 = vmul.f32 %v3541_v5, %v3517_v24  ;;  %v3612_v24 = vld [vmem:[#allocation2 + $0x70] sm:$0xff] }
0x1128   :  { %v3543_v18 = vpop.eup %3542  ;;  %2658 = vst [vmem:[#allocation2 + $0x98] sm:$0xff] %v2649_v49  ;;  %3548 = vrcp.f32 %v2605_v36 }
0x1129   :  { %v2646_v51 = vadd.f32 %v2638_v54, %v2622_v9  ;;  %v2623_v34 = vmul.f32 %v3609_v21, %v2615_v53  ;;  %v2639_v29 = vmul.f32 %v2631_v16, %v4887_v25  ;;  %v2618_v47 = vmul.f32 %v3543_v18, %v3519_v0 }
0x112a   :  { %v3545_v26 = vpop.eup %3544  ;;  %v2634_v11 = vmul.f32 %v3543_v18, %v3521_v19 }
0x112b   :  { %2655 = vst [vmem:[#allocation2 + $0x80] sm:$0xff] %v2646_v51  ;;  %v2647_v46 = vadd.f32 %v2639_v29, %v2623_v34  ;;  %v2626_v31 = vmul.f32 %v3610_v44, %v2618_v47  ;;  %v2619_v6 = vmul.f32 %v3545_v26, %v3523_v23  ;;  %v2635_v50 = vmul.f32 %v3545_v26, %v3525_v63 }
0x112c   :  { %v2642_v4 = vmul.f32 %v2634_v11, %v4904_v2 }
0x112d   :  { %2656 = vst [vmem:[#allocation2 + $0x88] sm:$0xff] %v2647_v46  ;;  %v2627_v14 = vmul.f32 %v3611_v60, %v2619_v6  ;;  %v2643_v48 = vmul.f32 %v2635_v50, %v4907_v35 }
0x112e   :  { %v2650_v13 = vadd.f32 %v2642_v4, %v2626_v31 }
0x112f   :  { %v3547_v17 = vpop.eup %3546  ;;  %v2651_v57 = vadd.f32 %v2643_v48, %v2627_v14 }
0x1130   :  { %2659 = vst [vmem:[#allocation2 + $0xa0] sm:$0xff] %v2650_v13  ;;  %v2620_v25 = vmul.f32 %v3547_v17, %v3529_v12  ;;  %v2636_v22 = vmul.f32 %v3547_v17, %v3533_v1 }
0x1131   :  { %2660 = vst [vmem:[#allocation2 + $0xa8] sm:$0xff] %v2651_v57 }
0x1132   :  { %v3549_v27 = vpop.eup %3548  ;;  %v2628_v0 = vmul.f32 %v3612_v24, %v2620_v25  ;;  %v2644_v37 = vmul.f32 %v2636_v22, %v4910_v33 }
0x1133   :  { %v2621_v19 = vmul.f32 %v3549_v27, %v3535_v3  ;;  %v2637_v23 = vmul.f32 %v3549_v27, %v3539_v7 }
0x1134   :  { %v2652_v2 = vadd.f32 %v2644_v37, %v2628_v0 }
0x1135   :  { %v2629_v63 = vmul.f32 %v3613_v58, %v2621_v19  ;;  %v2645_v35 = vmul.f32 %v2637_v23, %v4901_v39 }
0x1136   :  { %2661 = vst [vmem:[#allocation2 + $0xb0] sm:$0xff] %v2652_v2 }
0x1137   :  { %v2653_v62 = vadd.f32 %v2645_v35, %v2629_v63 }
0x1139   :  { %2662 = vst [vmem:[#allocation2 + $0xb8] sm:$0xff] %v2653_v62 }
0x113a   :  { %3647 = shalt.err (!%p3644_p12)
}
0x113b   :  { %s3648_s16 = scalar_lea.hbm %s4992_s8, 3072 }
0x113c   :  { %p3649_p13 = scmp.ne.s32.totalorder %s4992_s8, %s3648_s16  ;;  %p3652_p0 = scmp.lt.u32.totalorder %s3648_s16, %s4992_s8 }
0x113e   :  { %p3654_p1 = pnand %p3652_p0, %p3649_p13 }
0x1140   :  { %3657 = shalt.err (!%p3654_p1)
}
0x1141   :  { %2679 = dma.vmem_to_hbm [thread:$0]  %s2674_s13, 3072, %s4992_s8, [#allocation3], %s3664_s10, %s3664_s10, %s3665_s7  }
0x1142   :  { %3658 = dma.done.wait [#allocation3], 3072  }
0x1143   :  { %3659 = vsyncadd [#allocation3], 4294964224 }
0x1144   :  { %3660 = dma.done.wait [#allocation5], 1536  }
0x1145   :  { %3661 = vsyncadd [#allocation5], 4294965760 }
0x1146   :  { %2698 = vsyncpa [#allocation3], 1 }
0x1147   :  { %2699 = vsyncpa [#allocation5], 1 }

</bundles_post_ra>
